<compile_context>
chip_gen: v7x
topology: tpu7x:2x2x1
jax: 0.10.0
libtpu: 0.0.40
codegen_flags: <defaults>
</compile_context>

<pallas_src>
import functools

import jax
import jax.numpy as jnp
from jax.experimental import pallas as pl
from jax.experimental.pallas import tpu as pltpu

_SUBLANE = 8
_LANE = 128


def _round_up(x, m):
    return (x + m - 1) // m * m


def _pad_axis(a, axis, new_size):
    pad = new_size - a.shape[axis]
    if pad <= 0:
        return a
    widths = [(0, 0)] * a.ndim
    widths[axis] = (0, pad)
    return jnp.pad(a, widths)


def _pad_gate_mat(w, hp):
    """Pad a (D, 3H) gate-stacked matrix to (D, 3*Hp), padding each gate block
    separately so the [r | z | n] slices stay 128-lane aligned."""
    d, three_h = w.shape
    h = three_h // 3
    w = w.reshape(d, 3, h)
    w = _pad_axis(w, 2, hp)
    return w.reshape(d, 3 * hp)


# ----------------------------------------------------------------------------
# Fused kernel: all GRU layers + fc(relu(.)) head in one grid step.
# ----------------------------------------------------------------------------
def _gru_net_kernel(n_layers, seq_len, x_ref, h0_ref, *args):
    """Argument layout (after x_ref, h0_ref):

      per layer l: wih (Din_p, 3Hp), whh (Hp, 3Hp), bih (1, 3Hp), bhh (1, 3Hp)
      fc_w (Hp, Op), fc_b (1, Op)
      outputs: out (Bp, Op), h_out (L, Bp, Hp)
      scratch: seq_buf (T*Bp, Hp), gi_buf (T*Bp, 3Hp)

    x_ref is the time-major, padded, flattened input (T*Bp, Dp).
    """
    L, T = n_layers, seq_len
    layer_refs = args[:4 * L]
    fc_w_ref, fc_b_ref = args[4 * L], args[4 * L + 1]
    out_ref, h_out_ref = args[4 * L + 2], args[4 * L + 3]
    seq_ref, gi_ref = args[4 * L + 4], args[4 * L + 5]

    Bp = h0_ref.shape[1]
    Hp = h0_ref.shape[2]

    h_last = None
    for l in range(L):  # static layer count -> unrolled at trace time
        wih_ref, whh_ref, bih_ref, bhh_ref = layer_refs[4 * l: 4 * l + 4]

        # ---- Phase 1: input projection for ALL timesteps as one big GEMM.
        #      (b_ih folded into the GEMM epilogue.)
        src = x_ref[...] if l == 0 else seq_ref[...]
        gi_ref[...] = (
            jnp.dot(src, wih_ref[...], preferred_element_type=jnp.float32)
            + bih_ref[...]
        )

        # ---- Phase 2: sequential recurrence; only h @ W_hh is on the critical path.
        whh = whh_ref[...]
        bhh = bhh_ref[...]
        write_seq = l < L - 1  # last layer: only the final hidden state is needed

        def step(t, h):
            row = pl.multiple_of(t * Bp, Bp)
            gi = gi_ref[pl.ds(row, Bp), :]                       # (Bp, 3Hp)
            gh = jnp.dot(h, whh, preferred_element_type=jnp.float32) + bhh
            # PyTorch gate order [r, z, n]; b_hh's n-part stays inside r*(h_n+b_hn).
            r = jax.nn.sigmoid(gi[:, :Hp] + gh[:, :Hp])
            z = jax.nn.sigmoid(gi[:, Hp:2 * Hp] + gh[:, Hp:2 * Hp])
            n = jnp.tanh(gi[:, 2 * Hp:] + r * gh[:, 2 * Hp:])
            h_new = (1.0 - z) * n + z * h
            if write_seq:
                seq_ref[pl.ds(row, Bp), :] = h_new
            return h_new

        h0 = h0_ref[l].astype(jnp.float32)
        h_last = jax.lax.fori_loop(0, T, step, h0, unroll=True)
        h_out_ref[l] = h_last.astype(h_out_ref.dtype)

    # ---- fc(relu(out[:, -1])) head on the final hidden state (still in vregs).
    act = jnp.maximum(h_last, 0.0)
    out_ref[...] = (
        jnp.dot(act, fc_w_ref[...], preferred_element_type=jnp.float32)
        + fc_b_ref[...]
    ).astype(out_ref.dtype)


# ----------------------------------------------------------------------------
# Wrapper: pad to (8, 128) tiles, run the fused kernel, slice back.
# ----------------------------------------------------------------------------
@functools.partial(jax.jit, static_argnames=("n_layers",))
def gru_net_forward(x, h, params, n_layers):
    """Equivalent of GRUNet.forward(x, h) (eval mode; dropout = identity).

    x: (B, T, input_dim)  batch-first
    h: (n_layers, B, hidden_dim)
    Returns (out (B, output_dim), h_new (n_layers, B, hidden_dim)).
    """
    B, T, D = x.shape
    H = h.shape[-1]
    O = params["fc_b"].shape[-1]

    Bp = _round_up(B, _SUBLANE)
    Hp = _round_up(H, _LANE)
    Dp = _round_up(D, _LANE)
    Op = _round_up(O, _LANE)

    # Time-major, padded, flattened input: (T*Bp, Dp). Zero-padding is exact:
    # padded hidden columns stay 0 through the recurrence, padded batch rows are
    # sliced away at the end.
    x_t = jnp.transpose(x, (1, 0, 2))                               # (T, B, D)
    x_p = _pad_axis(_pad_axis(x_t, 1, Bp), 2, Dp).reshape(T * Bp, Dp)
    h_p = _pad_axis(_pad_axis(h, 1, Bp), 2, Hp)                     # (L, Bp, Hp)

    flat_w = []
    for layer in range(n_layers):
        wih_t, whh_t, bih, bhh = params["gru"][layer]
        din_p = Dp if layer == 0 else Hp
        flat_w.append(_pad_axis(_pad_gate_mat(wih_t, Hp), 0, din_p))  # (Din_p, 3Hp)
        flat_w.append(_pad_axis(_pad_gate_mat(whh_t, Hp), 0, Hp))     # (Hp, 3Hp)
        flat_w.append(_pad_gate_mat(bih, Hp))                         # (1, 3Hp)
        flat_w.append(_pad_gate_mat(bhh, Hp))                         # (1, 3Hp)

    fc_w_p = _pad_axis(_pad_axis(params["fc_w_t"], 0, Hp), 1, Op)     # (Hp, Op)
    fc_b_p = _pad_axis(params["fc_b"], 1, Op)                         # (1, Op)

    kernel = functools.partial(_gru_net_kernel, n_layers, T)

    out_p, h_out_p = pl.pallas_call(
        kernel,
        out_shape=(
            jax.ShapeDtypeStruct((Bp, Op), jnp.float32),
            jax.ShapeDtypeStruct((n_layers, Bp, Hp), jnp.float32),
        ),
        scratch_shapes=[
            pltpu.VMEM((T * Bp, Hp), jnp.float32),       # inter-layer sequence buffer
            pltpu.VMEM((T * Bp, 3 * Hp), jnp.float32),   # precomputed input gates
        ],
    )(x_p, h_p, *flat_w, fc_w_p, fc_b_p)

    return out_p[:B, :O], h_out_p[:, :B, :H]


# ----------------------------------------------------------------------------
# Deterministic parameter construction (matches nn.GRU / nn.Linear shapes).
# ----------------------------------------------------------------------------
def init_params(key, input_dim, hidden_dim, output_dim, n_layers):
    params = {"gru": []}
    scale = 1.0 / jnp.sqrt(hidden_dim)
    for layer in range(n_layers):
        d_in = input_dim if layer == 0 else hidden_dim
        key, k1, k2, k3, k4 = jax.random.split(key, 5)
        # PyTorch stores weight_ih_l{l}: (3H, d_in); we keep the transpose (d_in, 3H).
        wih_t = jax.random.uniform(k1, (d_in, 3 * hidden_dim), jnp.float32, -scale, scale)
        whh_t = jax.random.uniform(k2, (hidden_dim, 3 * hidden_dim), jnp.float32, -scale, scale)
        bih = jax.random.uniform(k3, (1, 3 * hidden_dim), jnp.float32, -scale, scale)
        bhh = jax.random.uniform(k4, (1, 3 * hidden_dim), jnp.float32, -scale, scale)
        params["gru"].append((wih_t, whh_t, bih, bhh))
    key, k5, k6 = jax.random.split(key, 3)
    params["fc_w_t"] = jax.random.uniform(k5, (hidden_dim, output_dim), jnp.float32, -scale, scale)
    params["fc_b"] = jax.random.uniform(k6, (1, output_dim), jnp.float32, -scale, scale)
    return params


# ----------------------------------------------------------------------------
# Pure-JAX reference (for correctness check).
# ----------------------------------------------------------------------------
def gru_net_reference(x, h, params, n_layers):
    layer_in = x                                    # (B, T, D)
    h_finals = []
    for layer in range(n_layers):
        wih_t, whh_t, bih, bhh = params["gru"][layer]
        H = whh_t.shape[0]

        def step(h_prev, x_t):
            gi = x_t @ wih_t + bih
            gh = h_prev @ whh_t + bhh
            r = jax.nn.sigmoid(gi[:, :H] + gh[:, :H])
            z = jax.nn.sigmoid(gi[:, H:2 * H] + gh[:, H:2 * H])
            n = jnp.tanh(gi[:, 2 * H:] + r * gh[:, 2 * H:])
            h_new = (1.0 - z) * n + z * h_prev
            return h_new, h_new

        h_T, outs = jax.lax.scan(step, h[layer], jnp.transpose(layer_in, (1, 0, 2)))
        h_finals.append(h_T)
        layer_in = jnp.transpose(outs, (1, 0, 2))
    out = jnp.maximum(layer_in[:, -1], 0.0) @ params["fc_w_t"] + params["fc_b"]
    return out, jnp.stack(h_finals, axis=0)


# ----------------------------------------------------------------------------
if __name__ == "__main__":
    # Small shapes consistent with GRUNet(input_dim, hidden_dim, output_dim, n_layers)
    batch, seq = 2, 8
    input_dim, hidden_dim, output_dim, n_layers = 16, 32, 4, 2

    key = jax.random.PRNGKey(0)
    key, kx = jax.random.split(key)
    params = init_params(key, input_dim, hidden_dim, output_dim, n_layers)

    x = jax.random.normal(kx, (batch, seq, input_dim), jnp.float32)   # batch_first
    h0 = jnp.zeros((n_layers, batch, hidden_dim), jnp.float32)        # init_hidden()

    out, h_new = gru_net_forward(x, h0, params, n_layers)
    out = jax.block_until_ready(out)
    h_new = jax.block_until_ready(h_new)

    ref_out, ref_h = gru_net_reference(x, h0, params, n_layers)
    assert out.shape == (batch, output_dim)
    assert h_new.shape == (n_layers, batch, hidden_dim)
    assert jnp.allclose(out, ref_out, atol=1e-5, rtol=1e-5)
    assert jnp.allclose(h_new, ref_h, atol=1e-5, rtol=1e-5)

    print("KERNEL_OK")
</pallas_src>

<mosaic_0001>
module attributes {stable_mosaic.version = 11 : i64} {
  func.func @_gru_net_kernel(%arg0: memref<64x128xf32, #tpu.memory_space<vmem>>, %arg1: memref<2x8x128xf32, #tpu.memory_space<vmem>>, %arg2: memref<128x384xf32, #tpu.memory_space<vmem>>, %arg3: memref<128x384xf32, #tpu.memory_space<vmem>>, %arg4: memref<1x384xf32, #tpu.memory_space<vmem>>, %arg5: memref<1x384xf32, #tpu.memory_space<vmem>>, %arg6: memref<128x384xf32, #tpu.memory_space<vmem>>, %arg7: memref<128x384xf32, #tpu.memory_space<vmem>>, %arg8: memref<1x384xf32, #tpu.memory_space<vmem>>, %arg9: memref<1x384xf32, #tpu.memory_space<vmem>>, %arg10: memref<128x128xf32, #tpu.memory_space<vmem>>, %arg11: memref<1x128xf32, #tpu.memory_space<vmem>>, %arg12: memref<8x128xf32, #tpu.memory_space<vmem>>, %arg13: memref<2x8x128xf32, #tpu.memory_space<vmem>>, %arg14: memref<64x128xf32, #tpu.memory_space<vmem>>, %arg15: memref<64x384xf32, #tpu.memory_space<vmem>>) attributes {dimension_semantics = [], scalar_prefetch = 0 : i64, scratch_operands = 2 : i64, tpu.core_type = #tpu.core_type<tc>} {
    %c0 = arith.constant 0 : index
    %c0_0 = arith.constant 0 : index
    %0 = vector.load %arg0[%c0, %c0_0] : memref<64x128xf32, #tpu.memory_space<vmem>>, vector<64x128xf32>
    %c0_1 = arith.constant 0 : index
    %c0_2 = arith.constant 0 : index
    %1 = vector.load %arg2[%c0_1, %c0_2] : memref<128x384xf32, #tpu.memory_space<vmem>>, vector<128x384xf32>
    %cst = arith.constant dense<0.000000e+00> : vector<64x384xf32>
    %2 = tpu.matmul %0, %1, %cst {dimension_numbers = #tpu.dot_dimension_numbers<[1], [0], [0], [1], [0, 0, 1, 1], [], []>} : vector<64x128xf32>, vector<128x384xf32>, vector<64x384xf32> -> vector<64x384xf32>
    %c0_3 = arith.constant 0 : index
    %c0_4 = arith.constant 0 : index
    %3 = vector.load %arg4[%c0_3, %c0_4] : memref<1x384xf32, #tpu.memory_space<vmem>>, vector<1x384xf32>
    %4 = vector.broadcast %3 : vector<1x384xf32> to vector<64x384xf32>
    %5 = arith.addf %2, %4 : vector<64x384xf32>
    %c0_5 = arith.constant 0 : index
    %c0_6 = arith.constant 0 : index
    %6 = vector.load %arg15[%c0_5, %c0_6] : memref<64x384xf32, #tpu.memory_space<vmem>>, vector<64x384xf32>
    tpu.vector_store %arg15[%c0_5, %c0_6], %5 {strides = array<i32>} : memref<64x384xf32, #tpu.memory_space<vmem>>, vector<64x384xf32>,
    %c0_7 = arith.constant 0 : index
    %c0_8 = arith.constant 0 : index
    %7 = vector.load %arg3[%c0_7, %c0_8] : memref<128x384xf32, #tpu.memory_space<vmem>>, vector<128x384xf32>
    %c0_9 = arith.constant 0 : index
    %c0_10 = arith.constant 0 : index
    %8 = vector.load %arg5[%c0_9, %c0_10] : memref<1x384xf32, #tpu.memory_space<vmem>>, vector<1x384xf32>
    %c0_11 = arith.constant 0 : index
    %c0_12 = arith.constant 0 : index
    %c0_13 = arith.constant 0 : index
    %9 = vector.load %arg1[%c0_11, %c0_12, %c0_13] : memref<2x8x128xf32, #tpu.memory_space<vmem>>, vector<1x8x128xf32>
    %10 = vector.shape_cast %9 : vector<1x8x128xf32> to vector<8x128xf32>
    %c0_i32 = arith.constant 0 : i32
    %c8_i32 = arith.constant 8 : i32
    %11 = arith.muli %c0_i32, %c8_i32 : i32
    %12 = tpu.assume_multiple %11, 8 : i32
    %13 = arith.index_cast %12 : i32 to index
    %c0_14 = arith.constant 0 : index
    %14 = vector.load %arg15[%13, %c0_14] : memref<64x384xf32, #tpu.memory_space<vmem>>, vector<8x384xf32>
    %cst_15 = arith.constant dense<0.000000e+00> : vector<8x384xf32>
    %15 = tpu.matmul %10, %7, %cst_15 {dimension_numbers = #tpu.dot_dimension_numbers<[1], [0], [0], [1], [0, 0, 1, 1], [], []>} : vector<8x128xf32>, vector<128x384xf32>, vector<8x384xf32> -> vector<8x384xf32>
    %16 = vector.broadcast %8 : vector<1x384xf32> to vector<8x384xf32>
    %17 = arith.addf %15, %16 : vector<8x384xf32>
    %18 = vector.extract_strided_slice %14 {offsets = [0, 0], sizes = [8, 128], strides = [1, 1]} : vector<8x384xf32> to vector<8x128xf32>
    %19 = vector.extract_strided_slice %17 {offsets = [0, 0], sizes = [8, 128], strides = [1, 1]} : vector<8x384xf32> to vector<8x128xf32>
    %20 = arith.addf %18, %19 : vector<8x128xf32>
    %21 = arith.negf %20 : vector<8x128xf32>
    %22 = math.exp %21 : vector<8x128xf32>
    %cst_16 = arith.constant 1.000000e+00 : f32
    %23 = vector.broadcast %cst_16 : f32 to vector<8x128xf32>
    %24 = arith.addf %23, %22 : vector<8x128xf32>
    %25 = arith.divf %23, %24 : vector<8x128xf32>
    %26 = vector.extract_strided_slice %14 {offsets = [0, 128], sizes = [8, 128], strides = [1, 1]} : vector<8x384xf32> to vector<8x128xf32>
    %27 = vector.extract_strided_slice %17 {offsets = [0, 128], sizes = [8, 128], strides = [1, 1]} : vector<8x384xf32> to vector<8x128xf32>
    %28 = arith.addf %26, %27 : vector<8x128xf32>
    %29 = arith.negf %28 : vector<8x128xf32>
    %30 = math.exp %29 : vector<8x128xf32>
    %cst_17 = arith.constant 1.000000e+00 : f32
    %31 = vector.broadcast %cst_17 : f32 to vector<8x128xf32>
    %32 = arith.addf %31, %30 : vector<8x128xf32>
    %33 = arith.divf %31, %32 : vector<8x128xf32>
    %34 = vector.extract_strided_slice %14 {offsets = [0, 256], sizes = [8, 128], strides = [1, 1]} : vector<8x384xf32> to vector<8x128xf32>
    %35 = vector.extract_strided_slice %17 {offsets = [0, 256], sizes = [8, 128], strides = [1, 1]} : vector<8x384xf32> to vector<8x128xf32>
    %36 = arith.mulf %25, %35 : vector<8x128xf32>
    %37 = arith.addf %34, %36 : vector<8x128xf32>
    %38 = math.tanh %37 : vector<8x128xf32>
    %cst_18 = arith.constant 1.000000e+00 : f32
    %39 = vector.broadcast %cst_18 : f32 to vector<8x128xf32>
    %40 = arith.subf %39, %33 : vector<8x128xf32>
    %41 = arith.mulf %40, %38 : vector<8x128xf32>
    %42 = arith.mulf %33, %10 : vector<8x128xf32>
    %43 = arith.addf %41, %42 : vector<8x128xf32>
    %44 = arith.index_cast %12 : i32 to index
    %c0_19 = arith.constant 0 : index
    %45 = vector.load %arg14[%44, %c0_19] : memref<64x128xf32, #tpu.memory_space<vmem>>, vector<8x128xf32>
    tpu.vector_store %arg14[%44, %c0_19], %43 {strides = array<i32>} : memref<64x128xf32, #tpu.memory_space<vmem>>, vector<8x128xf32>,
    %c1_i32 = arith.constant 1 : i32
    %c8_i32_20 = arith.constant 8 : i32
    %46 = arith.muli %c1_i32, %c8_i32_20 : i32
    %47 = tpu.assume_multiple %46, 8 : i32
    %48 = arith.index_cast %47 : i32 to index
    %c0_21 = arith.constant 0 : index
    %49 = vector.load %arg15[%48, %c0_21] : memref<64x384xf32, #tpu.memory_space<vmem>>, vector<8x384xf32>
    %cst_22 = arith.constant dense<0.000000e+00> : vector<8x384xf32>
    %50 = tpu.matmul %43, %7, %cst_22 {dimension_numbers = #tpu.dot_dimension_numbers<[1], [0], [0], [1], [0, 0, 1, 1], [], []>} : vector<8x128xf32>, vector<128x384xf32>, vector<8x384xf32> -> vector<8x384xf32>
    %51 = vector.broadcast %8 : vector<1x384xf32> to vector<8x384xf32>
    %52 = arith.addf %50, %51 : vector<8x384xf32>
    %53 = vector.extract_strided_slice %49 {offsets = [0, 0], sizes = [8, 128], strides = [1, 1]} : vector<8x384xf32> to vector<8x128xf32>
    %54 = vector.extract_strided_slice %52 {offsets = [0, 0], sizes = [8, 128], strides = [1, 1]} : vector<8x384xf32> to vector<8x128xf32>
    %55 = arith.addf %53, %54 : vector<8x128xf32>
    %56 = arith.negf %55 : vector<8x128xf32>
    %57 = math.exp %56 : vector<8x128xf32>
    %cst_23 = arith.constant 1.000000e+00 : f32
    %58 = vector.broadcast %cst_23 : f32 to vector<8x128xf32>
    %59 = arith.addf %58, %57 : vector<8x128xf32>
    %60 = arith.divf %58, %59 : vector<8x128xf32>
    %61 = vector.extract_strided_slice %49 {offsets = [0, 128], sizes = [8, 128], strides = [1, 1]} : vector<8x384xf32> to vector<8x128xf32>
    %62 = vector.extract_strided_slice %52 {offsets = [0, 128], sizes = [8, 128], strides = [1, 1]} : vector<8x384xf32> to vector<8x128xf32>
    %63 = arith.addf %61, %62 : vector<8x128xf32>
    %64 = arith.negf %63 : vector<8x128xf32>
    %65 = math.exp %64 : vector<8x128xf32>
    %cst_24 = arith.constant 1.000000e+00 : f32
    %66 = vector.broadcast %cst_24 : f32 to vector<8x128xf32>
    %67 = arith.addf %66, %65 : vector<8x128xf32>
    %68 = arith.divf %66, %67 : vector<8x128xf32>
    %69 = vector.extract_strided_slice %49 {offsets = [0, 256], sizes = [8, 128], strides = [1, 1]} : vector<8x384xf32> to vector<8x128xf32>
    %70 = vector.extract_strided_slice %52 {offsets = [0, 256], sizes = [8, 128], strides = [1, 1]} : vector<8x384xf32> to vector<8x128xf32>
    %71 = arith.mulf %60, %70 : vector<8x128xf32>
    %72 = arith.addf %69, %71 : vector<8x128xf32>
    %73 = math.tanh %72 : vector<8x128xf32>
    %cst_25 = arith.constant 1.000000e+00 : f32
    %74 = vector.broadcast %cst_25 : f32 to vector<8x128xf32>
    %75 = arith.subf %74, %68 : vector<8x128xf32>
    %76 = arith.mulf %75, %73 : vector<8x128xf32>
    %77 = arith.mulf %68, %43 : vector<8x128xf32>
    %78 = arith.addf %76, %77 : vector<8x128xf32>
    %79 = arith.index_cast %47 : i32 to index
    %c0_26 = arith.constant 0 : index
    %80 = vector.load %arg14[%79, %c0_26] : memref<64x128xf32, #tpu.memory_space<vmem>>, vector<8x128xf32>
    tpu.vector_store %arg14[%79, %c0_26], %78 {strides = array<i32>} : memref<64x128xf32, #tpu.memory_space<vmem>>, vector<8x128xf32>,
    %c2_i32 = arith.constant 2 : i32
    %c8_i32_27 = arith.constant 8 : i32
    %81 = arith.muli %c2_i32, %c8_i32_27 : i32
    %82 = tpu.assume_multiple %81, 8 : i32
    %83 = arith.index_cast %82 : i32 to index
    %c0_28 = arith.constant 0 : index
    %84 = vector.load %arg15[%83, %c0_28] : memref<64x384xf32, #tpu.memory_space<vmem>>, vector<8x384xf32>
    %cst_29 = arith.constant dense<0.000000e+00> : vector<8x384xf32>
    %85 = tpu.matmul %78, %7, %cst_29 {dimension_numbers = #tpu.dot_dimension_numbers<[1], [0], [0], [1], [0, 0, 1, 1], [], []>} : vector<8x128xf32>, vector<128x384xf32>, vector<8x384xf32> -> vector<8x384xf32>
    %86 = vector.broadcast %8 : vector<1x384xf32> to vector<8x384xf32>
    %87 = arith.addf %85, %86 : vector<8x384xf32>
    %88 = vector.extract_strided_slice %84 {offsets = [0, 0], sizes = [8, 128], strides = [1, 1]} : vector<8x384xf32> to vector<8x128xf32>
    %89 = vector.extract_strided_slice %87 {offsets = [0, 0], sizes = [8, 128], strides = [1, 1]} : vector<8x384xf32> to vector<8x128xf32>
    %90 = arith.addf %88, %89 : vector<8x128xf32>
    %91 = arith.negf %90 : vector<8x128xf32>
    %92 = math.exp %91 : vector<8x128xf32>
    %cst_30 = arith.constant 1.000000e+00 : f32
    %93 = vector.broadcast %cst_30 : f32 to vector<8x128xf32>
    %94 = arith.addf %93, %92 : vector<8x128xf32>
    %95 = arith.divf %93, %94 : vector<8x128xf32>
    %96 = vector.extract_strided_slice %84 {offsets = [0, 128], sizes = [8, 128], strides = [1, 1]} : vector<8x384xf32> to vector<8x128xf32>
    %97 = vector.extract_strided_slice %87 {offsets = [0, 128], sizes = [8, 128], strides = [1, 1]} : vector<8x384xf32> to vector<8x128xf32>
    %98 = arith.addf %96, %97 : vector<8x128xf32>
    %99 = arith.negf %98 : vector<8x128xf32>
    %100 = math.exp %99 : vector<8x128xf32>
    %cst_31 = arith.constant 1.000000e+00 : f32
    %101 = vector.broadcast %cst_31 : f32 to vector<8x128xf32>
    %102 = arith.addf %101, %100 : vector<8x128xf32>
    %103 = arith.divf %101, %102 : vector<8x128xf32>
    %104 = vector.extract_strided_slice %84 {offsets = [0, 256], sizes = [8, 128], strides = [1, 1]} : vector<8x384xf32> to vector<8x128xf32>
    %105 = vector.extract_strided_slice %87 {offsets = [0, 256], sizes = [8, 128], strides = [1, 1]} : vector<8x384xf32> to vector<8x128xf32>
    %106 = arith.mulf %95, %105 : vector<8x128xf32>
    %107 = arith.addf %104, %106 : vector<8x128xf32>
    %108 = math.tanh %107 : vector<8x128xf32>
    %cst_32 = arith.constant 1.000000e+00 : f32
    %109 = vector.broadcast %cst_32 : f32 to vector<8x128xf32>
    %110 = arith.subf %109, %103 : vector<8x128xf32>
    %111 = arith.mulf %110, %108 : vector<8x128xf32>
    %112 = arith.mulf %103, %78 : vector<8x128xf32>
    %113 = arith.addf %111, %112 : vector<8x128xf32>
    %114 = arith.index_cast %82 : i32 to index
    %c0_33 = arith.constant 0 : index
    %115 = vector.load %arg14[%114, %c0_33] : memref<64x128xf32, #tpu.memory_space<vmem>>, vector<8x128xf32>
    tpu.vector_store %arg14[%114, %c0_33], %113 {strides = array<i32>} : memref<64x128xf32, #tpu.memory_space<vmem>>, vector<8x128xf32>,
    %c3_i32 = arith.constant 3 : i32
    %c8_i32_34 = arith.constant 8 : i32
    %116 = arith.muli %c3_i32, %c8_i32_34 : i32
    %117 = tpu.assume_multiple %116, 8 : i32
    %118 = arith.index_cast %117 : i32 to index
    %c0_35 = arith.constant 0 : index
    %119 = vector.load %arg15[%118, %c0_35] : memref<64x384xf32, #tpu.memory_space<vmem>>, vector<8x384xf32>
    %cst_36 = arith.constant dense<0.000000e+00> : vector<8x384xf32>
    %120 = tpu.matmul %113, %7, %cst_36 {dimension_numbers = #tpu.dot_dimension_numbers<[1], [0], [0], [1], [0, 0, 1, 1], [], []>} : vector<8x128xf32>, vector<128x384xf32>, vector<8x384xf32> -> vector<8x384xf32>
    %121 = vector.broadcast %8 : vector<1x384xf32> to vector<8x384xf32>
    %122 = arith.addf %120, %121 : vector<8x384xf32>
    %123 = vector.extract_strided_slice %119 {offsets = [0, 0], sizes = [8, 128], strides = [1, 1]} : vector<8x384xf32> to vector<8x128xf32>
    %124 = vector.extract_strided_slice %122 {offsets = [0, 0], sizes = [8, 128], strides = [1, 1]} : vector<8x384xf32> to vector<8x128xf32>
    %125 = arith.addf %123, %124 : vector<8x128xf32>
    %126 = arith.negf %125 : vector<8x128xf32>
    %127 = math.exp %126 : vector<8x128xf32>
    %cst_37 = arith.constant 1.000000e+00 : f32
    %128 = vector.broadcast %cst_37 : f32 to vector<8x128xf32>
    %129 = arith.addf %128, %127 : vector<8x128xf32>
    %130 = arith.divf %128, %129 : vector<8x128xf32>
    %131 = vector.extract_strided_slice %119 {offsets = [0, 128], sizes = [8, 128], strides = [1, 1]} : vector<8x384xf32> to vector<8x128xf32>
    %132 = vector.extract_strided_slice %122 {offsets = [0, 128], sizes = [8, 128], strides = [1, 1]} : vector<8x384xf32> to vector<8x128xf32>
    %133 = arith.addf %131, %132 : vector<8x128xf32>
    %134 = arith.negf %133 : vector<8x128xf32>
    %135 = math.exp %134 : vector<8x128xf32>
    %cst_38 = arith.constant 1.000000e+00 : f32
    %136 = vector.broadcast %cst_38 : f32 to vector<8x128xf32>
    %137 = arith.addf %136, %135 : vector<8x128xf32>
    %138 = arith.divf %136, %137 : vector<8x128xf32>
    %139 = vector.extract_strided_slice %119 {offsets = [0, 256], sizes = [8, 128], strides = [1, 1]} : vector<8x384xf32> to vector<8x128xf32>
    %140 = vector.extract_strided_slice %122 {offsets = [0, 256], sizes = [8, 128], strides = [1, 1]} : vector<8x384xf32> to vector<8x128xf32>
    %141 = arith.mulf %130, %140 : vector<8x128xf32>
    %142 = arith.addf %139, %141 : vector<8x128xf32>
    %143 = math.tanh %142 : vector<8x128xf32>
    %cst_39 = arith.constant 1.000000e+00 : f32
    %144 = vector.broadcast %cst_39 : f32 to vector<8x128xf32>
    %145 = arith.subf %144, %138 : vector<8x128xf32>
    %146 = arith.mulf %145, %143 : vector<8x128xf32>
    %147 = arith.mulf %138, %113 : vector<8x128xf32>
    %148 = arith.addf %146, %147 : vector<8x128xf32>
    %149 = arith.index_cast %117 : i32 to index
    %c0_40 = arith.constant 0 : index
    %150 = vector.load %arg14[%149, %c0_40] : memref<64x128xf32, #tpu.memory_space<vmem>>, vector<8x128xf32>
    tpu.vector_store %arg14[%149, %c0_40], %148 {strides = array<i32>} : memref<64x128xf32, #tpu.memory_space<vmem>>, vector<8x128xf32>,
    %c4_i32 = arith.constant 4 : i32
    %c8_i32_41 = arith.constant 8 : i32
    %151 = arith.muli %c4_i32, %c8_i32_41 : i32
    %152 = tpu.assume_multiple %151, 8 : i32
    %153 = arith.index_cast %152 : i32 to index
    %c0_42 = arith.constant 0 : index
    %154 = vector.load %arg15[%153, %c0_42] : memref<64x384xf32, #tpu.memory_space<vmem>>, vector<8x384xf32>
    %cst_43 = arith.constant dense<0.000000e+00> : vector<8x384xf32>
    %155 = tpu.matmul %148, %7, %cst_43 {dimension_numbers = #tpu.dot_dimension_numbers<[1], [0], [0], [1], [0, 0, 1, 1], [], []>} : vector<8x128xf32>, vector<128x384xf32>, vector<8x384xf32> -> vector<8x384xf32>
    %156 = vector.broadcast %8 : vector<1x384xf32> to vector<8x384xf32>
    %157 = arith.addf %155, %156 : vector<8x384xf32>
    %158 = vector.extract_strided_slice %154 {offsets = [0, 0], sizes = [8, 128], strides = [1, 1]} : vector<8x384xf32> to vector<8x128xf32>
    %159 = vector.extract_strided_slice %157 {offsets = [0, 0], sizes = [8, 128], strides = [1, 1]} : vector<8x384xf32> to vector<8x128xf32>
    %160 = arith.addf %158, %159 : vector<8x128xf32>
    %161 = arith.negf %160 : vector<8x128xf32>
    %162 = math.exp %161 : vector<8x128xf32>
    %cst_44 = arith.constant 1.000000e+00 : f32
    %163 = vector.broadcast %cst_44 : f32 to vector<8x128xf32>
    %164 = arith.addf %163, %162 : vector<8x128xf32>
    %165 = arith.divf %163, %164 : vector<8x128xf32>
    %166 = vector.extract_strided_slice %154 {offsets = [0, 128], sizes = [8, 128], strides = [1, 1]} : vector<8x384xf32> to vector<8x128xf32>
    %167 = vector.extract_strided_slice %157 {offsets = [0, 128], sizes = [8, 128], strides = [1, 1]} : vector<8x384xf32> to vector<8x128xf32>
    %168 = arith.addf %166, %167 : vector<8x128xf32>
    %169 = arith.negf %168 : vector<8x128xf32>
    %170 = math.exp %169 : vector<8x128xf32>
    %cst_45 = arith.constant 1.000000e+00 : f32
    %171 = vector.broadcast %cst_45 : f32 to vector<8x128xf32>
    %172 = arith.addf %171, %170 : vector<8x128xf32>
    %173 = arith.divf %171, %172 : vector<8x128xf32>
    %174 = vector.extract_strided_slice %154 {offsets = [0, 256], sizes = [8, 128], strides = [1, 1]} : vector<8x384xf32> to vector<8x128xf32>
    %175 = vector.extract_strided_slice %157 {offsets = [0, 256], sizes = [8, 128], strides = [1, 1]} : vector<8x384xf32> to vector<8x128xf32>
    %176 = arith.mulf %165, %175 : vector<8x128xf32>
    %177 = arith.addf %174, %176 : vector<8x128xf32>
    %178 = math.tanh %177 : vector<8x128xf32>
    %cst_46 = arith.constant 1.000000e+00 : f32
    %179 = vector.broadcast %cst_46 : f32 to vector<8x128xf32>
    %180 = arith.subf %179, %173 : vector<8x128xf32>
    %181 = arith.mulf %180, %178 : vector<8x128xf32>
    %182 = arith.mulf %173, %148 : vector<8x128xf32>
    %183 = arith.addf %181, %182 : vector<8x128xf32>
    %184 = arith.index_cast %152 : i32 to index
    %c0_47 = arith.constant 0 : index
    %185 = vector.load %arg14[%184, %c0_47] : memref<64x128xf32, #tpu.memory_space<vmem>>, vector<8x128xf32>
    tpu.vector_store %arg14[%184, %c0_47], %183 {strides = array<i32>} : memref<64x128xf32, #tpu.memory_space<vmem>>, vector<8x128xf32>,
    %c5_i32 = arith.constant 5 : i32
    %c8_i32_48 = arith.constant 8 : i32
    %186 = arith.muli %c5_i32, %c8_i32_48 : i32
    %187 = tpu.assume_multiple %186, 8 : i32
    %188 = arith.index_cast %187 : i32 to index
    %c0_49 = arith.constant 0 : index
    %189 = vector.load %arg15[%188, %c0_49] : memref<64x384xf32, #tpu.memory_space<vmem>>, vector<8x384xf32>
    %cst_50 = arith.constant dense<0.000000e+00> : vector<8x384xf32>
    %190 = tpu.matmul %183, %7, %cst_50 {dimension_numbers = #tpu.dot_dimension_numbers<[1], [0], [0], [1], [0, 0, 1, 1], [], []>} : vector<8x128xf32>, vector<128x384xf32>, vector<8x384xf32> -> vector<8x384xf32>
    %191 = vector.broadcast %8 : vector<1x384xf32> to vector<8x384xf32>
    %192 = arith.addf %190, %191 : vector<8x384xf32>
    %193 = vector.extract_strided_slice %189 {offsets = [0, 0], sizes = [8, 128], strides = [1, 1]} : vector<8x384xf32> to vector<8x128xf32>
    %194 = vector.extract_strided_slice %192 {offsets = [0, 0], sizes = [8, 128], strides = [1, 1]} : vector<8x384xf32> to vector<8x128xf32>
    %195 = arith.addf %193, %194 : vector<8x128xf32>
    %196 = arith.negf %195 : vector<8x128xf32>
    %197 = math.exp %196 : vector<8x128xf32>
    %cst_51 = arith.constant 1.000000e+00 : f32
    %198 = vector.broadcast %cst_51 : f32 to vector<8x128xf32>
    %199 = arith.addf %198, %197 : vector<8x128xf32>
    %200 = arith.divf %198, %199 : vector<8x128xf32>
    %201 = vector.extract_strided_slice %189 {offsets = [0, 128], sizes = [8, 128], strides = [1, 1]} : vector<8x384xf32> to vector<8x128xf32>
    %202 = vector.extract_strided_slice %192 {offsets = [0, 128], sizes = [8, 128], strides = [1, 1]} : vector<8x384xf32> to vector<8x128xf32>
    %203 = arith.addf %201, %202 : vector<8x128xf32>
    %204 = arith.negf %203 : vector<8x128xf32>
    %205 = math.exp %204 : vector<8x128xf32>
    %cst_52 = arith.constant 1.000000e+00 : f32
    %206 = vector.broadcast %cst_52 : f32 to vector<8x128xf32>
    %207 = arith.addf %206, %205 : vector<8x128xf32>
    %208 = arith.divf %206, %207 : vector<8x128xf32>
    %209 = vector.extract_strided_slice %189 {offsets = [0, 256], sizes = [8, 128], strides = [1, 1]} : vector<8x384xf32> to vector<8x128xf32>
    %210 = vector.extract_strided_slice %192 {offsets = [0, 256], sizes = [8, 128], strides = [1, 1]} : vector<8x384xf32> to vector<8x128xf32>
    %211 = arith.mulf %200, %210 : vector<8x128xf32>
    %212 = arith.addf %209, %211 : vector<8x128xf32>
    %213 = math.tanh %212 : vector<8x128xf32>
    %cst_53 = arith.constant 1.000000e+00 : f32
    %214 = vector.broadcast %cst_53 : f32 to vector<8x128xf32>
    %215 = arith.subf %214, %208 : vector<8x128xf32>
    %216 = arith.mulf %215, %213 : vector<8x128xf32>
    %217 = arith.mulf %208, %183 : vector<8x128xf32>
    %218 = arith.addf %216, %217 : vector<8x128xf32>
    %219 = arith.index_cast %187 : i32 to index
    %c0_54 = arith.constant 0 : index
    %220 = vector.load %arg14[%219, %c0_54] : memref<64x128xf32, #tpu.memory_space<vmem>>, vector<8x128xf32>
    tpu.vector_store %arg14[%219, %c0_54], %218 {strides = array<i32>} : memref<64x128xf32, #tpu.memory_space<vmem>>, vector<8x128xf32>,
    %c6_i32 = arith.constant 6 : i32
    %c8_i32_55 = arith.constant 8 : i32
    %221 = arith.muli %c6_i32, %c8_i32_55 : i32
    %222 = tpu.assume_multiple %221, 8 : i32
    %223 = arith.index_cast %222 : i32 to index
    %c0_56 = arith.constant 0 : index
    %224 = vector.load %arg15[%223, %c0_56] : memref<64x384xf32, #tpu.memory_space<vmem>>, vector<8x384xf32>
    %cst_57 = arith.constant dense<0.000000e+00> : vector<8x384xf32>
    %225 = tpu.matmul %218, %7, %cst_57 {dimension_numbers = #tpu.dot_dimension_numbers<[1], [0], [0], [1], [0, 0, 1, 1], [], []>} : vector<8x128xf32>, vector<128x384xf32>, vector<8x384xf32> -> vector<8x384xf32>
    %226 = vector.broadcast %8 : vector<1x384xf32> to vector<8x384xf32>
    %227 = arith.addf %225, %226 : vector<8x384xf32>
    %228 = vector.extract_strided_slice %224 {offsets = [0, 0], sizes = [8, 128], strides = [1, 1]} : vector<8x384xf32> to vector<8x128xf32>
    %229 = vector.extract_strided_slice %227 {offsets = [0, 0], sizes = [8, 128], strides = [1, 1]} : vector<8x384xf32> to vector<8x128xf32>
    %230 = arith.addf %228, %229 : vector<8x128xf32>
    %231 = arith.negf %230 : vector<8x128xf32>
    %232 = math.exp %231 : vector<8x128xf32>
    %cst_58 = arith.constant 1.000000e+00 : f32
    %233 = vector.broadcast %cst_58 : f32 to vector<8x128xf32>
    %234 = arith.addf %233, %232 : vector<8x128xf32>
    %235 = arith.divf %233, %234 : vector<8x128xf32>
    %236 = vector.extract_strided_slice %224 {offsets = [0, 128], sizes = [8, 128], strides = [1, 1]} : vector<8x384xf32> to vector<8x128xf32>
    %237 = vector.extract_strided_slice %227 {offsets = [0, 128], sizes = [8, 128], strides = [1, 1]} : vector<8x384xf32> to vector<8x128xf32>
    %238 = arith.addf %236, %237 : vector<8x128xf32>
    %239 = arith.negf %238 : vector<8x128xf32>
    %240 = math.exp %239 : vector<8x128xf32>
    %cst_59 = arith.constant 1.000000e+00 : f32
    %241 = vector.broadcast %cst_59 : f32 to vector<8x128xf32>
    %242 = arith.addf %241, %240 : vector<8x128xf32>
    %243 = arith.divf %241, %242 : vector<8x128xf32>
    %244 = vector.extract_strided_slice %224 {offsets = [0, 256], sizes = [8, 128], strides = [1, 1]} : vector<8x384xf32> to vector<8x128xf32>
    %245 = vector.extract_strided_slice %227 {offsets = [0, 256], sizes = [8, 128], strides = [1, 1]} : vector<8x384xf32> to vector<8x128xf32>
    %246 = arith.mulf %235, %245 : vector<8x128xf32>
    %247 = arith.addf %244, %246 : vector<8x128xf32>
    %248 = math.tanh %247 : vector<8x128xf32>
    %cst_60 = arith.constant 1.000000e+00 : f32
    %249 = vector.broadcast %cst_60 : f32 to vector<8x128xf32>
    %250 = arith.subf %249, %243 : vector<8x128xf32>
    %251 = arith.mulf %250, %248 : vector<8x128xf32>
    %252 = arith.mulf %243, %218 : vector<8x128xf32>
    %253 = arith.addf %251, %252 : vector<8x128xf32>
    %254 = arith.index_cast %222 : i32 to index
    %c0_61 = arith.constant 0 : index
    %255 = vector.load %arg14[%254, %c0_61] : memref<64x128xf32, #tpu.memory_space<vmem>>, vector<8x128xf32>
    tpu.vector_store %arg14[%254, %c0_61], %253 {strides = array<i32>} : memref<64x128xf32, #tpu.memory_space<vmem>>, vector<8x128xf32>,
    %c7_i32 = arith.constant 7 : i32
    %c8_i32_62 = arith.constant 8 : i32
    %256 = arith.muli %c7_i32, %c8_i32_62 : i32
    %257 = tpu.assume_multiple %256, 8 : i32
    %258 = arith.index_cast %257 : i32 to index
    %c0_63 = arith.constant 0 : index
    %259 = vector.load %arg15[%258, %c0_63] : memref<64x384xf32, #tpu.memory_space<vmem>>, vector<8x384xf32>
    %cst_64 = arith.constant dense<0.000000e+00> : vector<8x384xf32>
    %260 = tpu.matmul %253, %7, %cst_64 {dimension_numbers = #tpu.dot_dimension_numbers<[1], [0], [0], [1], [0, 0, 1, 1], [], []>} : vector<8x128xf32>, vector<128x384xf32>, vector<8x384xf32> -> vector<8x384xf32>
    %261 = vector.broadcast %8 : vector<1x384xf32> to vector<8x384xf32>
    %262 = arith.addf %260, %261 : vector<8x384xf32>
    %263 = vector.extract_strided_slice %259 {offsets = [0, 0], sizes = [8, 128], strides = [1, 1]} : vector<8x384xf32> to vector<8x128xf32>
    %264 = vector.extract_strided_slice %262 {offsets = [0, 0], sizes = [8, 128], strides = [1, 1]} : vector<8x384xf32> to vector<8x128xf32>
    %265 = arith.addf %263, %264 : vector<8x128xf32>
    %266 = arith.negf %265 : vector<8x128xf32>
    %267 = math.exp %266 : vector<8x128xf32>
    %cst_65 = arith.constant 1.000000e+00 : f32
    %268 = vector.broadcast %cst_65 : f32 to vector<8x128xf32>
    %269 = arith.addf %268, %267 : vector<8x128xf32>
    %270 = arith.divf %268, %269 : vector<8x128xf32>
    %271 = vector.extract_strided_slice %259 {offsets = [0, 128], sizes = [8, 128], strides = [1, 1]} : vector<8x384xf32> to vector<8x128xf32>
    %272 = vector.extract_strided_slice %262 {offsets = [0, 128], sizes = [8, 128], strides = [1, 1]} : vector<8x384xf32> to vector<8x128xf32>
    %273 = arith.addf %271, %272 : vector<8x128xf32>
    %274 = arith.negf %273 : vector<8x128xf32>
    %275 = math.exp %274 : vector<8x128xf32>
    %cst_66 = arith.constant 1.000000e+00 : f32
    %276 = vector.broadcast %cst_66 : f32 to vector<8x128xf32>
    %277 = arith.addf %276, %275 : vector<8x128xf32>
    %278 = arith.divf %276, %277 : vector<8x128xf32>
    %279 = vector.extract_strided_slice %259 {offsets = [0, 256], sizes = [8, 128], strides = [1, 1]} : vector<8x384xf32> to vector<8x128xf32>
    %280 = vector.extract_strided_slice %262 {offsets = [0, 256], sizes = [8, 128], strides = [1, 1]} : vector<8x384xf32> to vector<8x128xf32>
    %281 = arith.mulf %270, %280 : vector<8x128xf32>
    %282 = arith.addf %279, %281 : vector<8x128xf32>
    %283 = math.tanh %282 : vector<8x128xf32>
    %cst_67 = arith.constant 1.000000e+00 : f32
    %284 = vector.broadcast %cst_67 : f32 to vector<8x128xf32>
    %285 = arith.subf %284, %278 : vector<8x128xf32>
    %286 = arith.mulf %285, %283 : vector<8x128xf32>
    %287 = arith.mulf %278, %253 : vector<8x128xf32>
    %288 = arith.addf %286, %287 : vector<8x128xf32>
    %289 = arith.index_cast %257 : i32 to index
    %c0_68 = arith.constant 0 : index
    %290 = vector.load %arg14[%289, %c0_68] : memref<64x128xf32, #tpu.memory_space<vmem>>, vector<8x128xf32>
    tpu.vector_store %arg14[%289, %c0_68], %288 {strides = array<i32>} : memref<64x128xf32, #tpu.memory_space<vmem>>, vector<8x128xf32>,
    %c8_i32_69 = arith.constant 8 : i32
    %c0_70 = arith.constant 0 : index
    %c0_71 = arith.constant 0 : index
    %c0_72 = arith.constant 0 : index
    %291 = vector.load %arg13[%c0_70, %c0_71, %c0_72] : memref<2x8x128xf32, #tpu.memory_space<vmem>>, vector<1x8x128xf32>
    %292 = vector.shape_cast %291 : vector<1x8x128xf32> to vector<8x128xf32>
    %293 = vector.shape_cast %288 : vector<8x128xf32> to vector<1x8x128xf32>
    tpu.vector_store %arg13[%c0_70, %c0_71, %c0_72], %293 {strides = array<i32>} : memref<2x8x128xf32, #tpu.memory_space<vmem>>, vector<1x8x128xf32>,
    %c0_73 = arith.constant 0 : index
    %c0_74 = arith.constant 0 : index
    %294 = vector.load %arg14[%c0_73, %c0_74] : memref<64x128xf32, #tpu.memory_space<vmem>>, vector<64x128xf32>
    %c0_75 = arith.constant 0 : index
    %c0_76 = arith.constant 0 : index
    %295 = vector.load %arg6[%c0_75, %c0_76] : memref<128x384xf32, #tpu.memory_space<vmem>>, vector<128x384xf32>
    %cst_77 = arith.constant dense<0.000000e+00> : vector<64x384xf32>
    %296 = tpu.matmul %294, %295, %cst_77 {dimension_numbers = #tpu.dot_dimension_numbers<[1], [0], [0], [1], [0, 0, 1, 1], [], []>} : vector<64x128xf32>, vector<128x384xf32>, vector<64x384xf32> -> vector<64x384xf32>
    %c0_78 = arith.constant 0 : index
    %c0_79 = arith.constant 0 : index
    %297 = vector.load %arg8[%c0_78, %c0_79] : memref<1x384xf32, #tpu.memory_space<vmem>>, vector<1x384xf32>
    %298 = vector.broadcast %297 : vector<1x384xf32> to vector<64x384xf32>
    %299 = arith.addf %296, %298 : vector<64x384xf32>
    %c0_80 = arith.constant 0 : index
    %c0_81 = arith.constant 0 : index
    %300 = vector.load %arg15[%c0_80, %c0_81] : memref<64x384xf32, #tpu.memory_space<vmem>>, vector<64x384xf32>
    tpu.vector_store %arg15[%c0_80, %c0_81], %299 {strides = array<i32>} : memref<64x384xf32, #tpu.memory_space<vmem>>, vector<64x384xf32>,
    %c0_82 = arith.constant 0 : index
    %c0_83 = arith.constant 0 : index
    %301 = vector.load %arg7[%c0_82, %c0_83] : memref<128x384xf32, #tpu.memory_space<vmem>>, vector<128x384xf32>
    %c0_84 = arith.constant 0 : index
    %c0_85 = arith.constant 0 : index
    %302 = vector.load %arg9[%c0_84, %c0_85] : memref<1x384xf32, #tpu.memory_space<vmem>>, vector<1x384xf32>
    %c1 = arith.constant 1 : index
    %c0_86 = arith.constant 0 : index
    %c0_87 = arith.constant 0 : index
    %303 = vector.load %arg1[%c1, %c0_86, %c0_87] : memref<2x8x128xf32, #tpu.memory_space<vmem>>, vector<1x8x128xf32>
    %304 = vector.shape_cast %303 : vector<1x8x128xf32> to vector<8x128xf32>
    %c0_i32_88 = arith.constant 0 : i32
    %c8_i32_89 = arith.constant 8 : i32
    %305 = arith.muli %c0_i32_88, %c8_i32_89 : i32
    %306 = tpu.assume_multiple %305, 8 : i32
    %307 = arith.index_cast %306 : i32 to index
    %c0_90 = arith.constant 0 : index
    %308 = vector.load %arg15[%307, %c0_90] : memref<64x384xf32, #tpu.memory_space<vmem>>, vector<8x384xf32>
    %cst_91 = arith.constant dense<0.000000e+00> : vector<8x384xf32>
    %309 = tpu.matmul %304, %301, %cst_91 {dimension_numbers = #tpu.dot_dimension_numbers<[1], [0], [0], [1], [0, 0, 1, 1], [], []>} : vector<8x128xf32>, vector<128x384xf32>, vector<8x384xf32> -> vector<8x384xf32>
    %310 = vector.broadcast %302 : vector<1x384xf32> to vector<8x384xf32>
    %311 = arith.addf %309, %310 : vector<8x384xf32>
    %312 = vector.extract_strided_slice %308 {offsets = [0, 0], sizes = [8, 128], strides = [1, 1]} : vector<8x384xf32> to vector<8x128xf32>
    %313 = vector.extract_strided_slice %311 {offsets = [0, 0], sizes = [8, 128], strides = [1, 1]} : vector<8x384xf32> to vector<8x128xf32>
    %314 = arith.addf %312, %313 : vector<8x128xf32>
    %315 = arith.negf %314 : vector<8x128xf32>
    %316 = math.exp %315 : vector<8x128xf32>
    %cst_92 = arith.constant 1.000000e+00 : f32
    %317 = vector.broadcast %cst_92 : f32 to vector<8x128xf32>
    %318 = arith.addf %317, %316 : vector<8x128xf32>
    %319 = arith.divf %317, %318 : vector<8x128xf32>
    %320 = vector.extract_strided_slice %308 {offsets = [0, 128], sizes = [8, 128], strides = [1, 1]} : vector<8x384xf32> to vector<8x128xf32>
    %321 = vector.extract_strided_slice %311 {offsets = [0, 128], sizes = [8, 128], strides = [1, 1]} : vector<8x384xf32> to vector<8x128xf32>
    %322 = arith.addf %320, %321 : vector<8x128xf32>
    %323 = arith.negf %322 : vector<8x128xf32>
    %324 = math.exp %323 : vector<8x128xf32>
    %cst_93 = arith.constant 1.000000e+00 : f32
    %325 = vector.broadcast %cst_93 : f32 to vector<8x128xf32>
    %326 = arith.addf %325, %324 : vector<8x128xf32>
    %327 = arith.divf %325, %326 : vector<8x128xf32>
    %328 = vector.extract_strided_slice %308 {offsets = [0, 256], sizes = [8, 128], strides = [1, 1]} : vector<8x384xf32> to vector<8x128xf32>
    %329 = vector.extract_strided_slice %311 {offsets = [0, 256], sizes = [8, 128], strides = [1, 1]} : vector<8x384xf32> to vector<8x128xf32>
    %330 = arith.mulf %319, %329 : vector<8x128xf32>
    %331 = arith.addf %328, %330 : vector<8x128xf32>
    %332 = math.tanh %331 : vector<8x128xf32>
    %cst_94 = arith.constant 1.000000e+00 : f32
    %333 = vector.broadcast %cst_94 : f32 to vector<8x128xf32>
    %334 = arith.subf %333, %327 : vector<8x128xf32>
    %335 = arith.mulf %334, %332 : vector<8x128xf32>
    %336 = arith.mulf %327, %304 : vector<8x128xf32>
    %337 = arith.addf %335, %336 : vector<8x128xf32>
    %c1_i32_95 = arith.constant 1 : i32
    %c8_i32_96 = arith.constant 8 : i32
    %338 = arith.muli %c1_i32_95, %c8_i32_96 : i32
    %339 = tpu.assume_multiple %338, 8 : i32
    %340 = arith.index_cast %339 : i32 to index
    %c0_97 = arith.constant 0 : index
    %341 = vector.load %arg15[%340, %c0_97] : memref<64x384xf32, #tpu.memory_space<vmem>>, vector<8x384xf32>
    %cst_98 = arith.constant dense<0.000000e+00> : vector<8x384xf32>
    %342 = tpu.matmul %337, %301, %cst_98 {dimension_numbers = #tpu.dot_dimension_numbers<[1], [0], [0], [1], [0, 0, 1, 1], [], []>} : vector<8x128xf32>, vector<128x384xf32>, vector<8x384xf32> -> vector<8x384xf32>
    %343 = vector.broadcast %302 : vector<1x384xf32> to vector<8x384xf32>
    %344 = arith.addf %342, %343 : vector<8x384xf32>
    %345 = vector.extract_strided_slice %341 {offsets = [0, 0], sizes = [8, 128], strides = [1, 1]} : vector<8x384xf32> to vector<8x128xf32>
    %346 = vector.extract_strided_slice %344 {offsets = [0, 0], sizes = [8, 128], strides = [1, 1]} : vector<8x384xf32> to vector<8x128xf32>
    %347 = arith.addf %345, %346 : vector<8x128xf32>
    %348 = arith.negf %347 : vector<8x128xf32>
    %349 = math.exp %348 : vector<8x128xf32>
    %cst_99 = arith.constant 1.000000e+00 : f32
    %350 = vector.broadcast %cst_99 : f32 to vector<8x128xf32>
    %351 = arith.addf %350, %349 : vector<8x128xf32>
    %352 = arith.divf %350, %351 : vector<8x128xf32>
    %353 = vector.extract_strided_slice %341 {offsets = [0, 128], sizes = [8, 128], strides = [1, 1]} : vector<8x384xf32> to vector<8x128xf32>
    %354 = vector.extract_strided_slice %344 {offsets = [0, 128], sizes = [8, 128], strides = [1, 1]} : vector<8x384xf32> to vector<8x128xf32>
    %355 = arith.addf %353, %354 : vector<8x128xf32>
    %356 = arith.negf %355 : vector<8x128xf32>
    %357 = math.exp %356 : vector<8x128xf32>
    %cst_100 = arith.constant 1.000000e+00 : f32
    %358 = vector.broadcast %cst_100 : f32 to vector<8x128xf32>
    %359 = arith.addf %358, %357 : vector<8x128xf32>
    %360 = arith.divf %358, %359 : vector<8x128xf32>
    %361 = vector.extract_strided_slice %341 {offsets = [0, 256], sizes = [8, 128], strides = [1, 1]} : vector<8x384xf32> to vector<8x128xf32>
    %362 = vector.extract_strided_slice %344 {offsets = [0, 256], sizes = [8, 128], strides = [1, 1]} : vector<8x384xf32> to vector<8x128xf32>
    %363 = arith.mulf %352, %362 : vector<8x128xf32>
    %364 = arith.addf %361, %363 : vector<8x128xf32>
    %365 = math.tanh %364 : vector<8x128xf32>
    %cst_101 = arith.constant 1.000000e+00 : f32
    %366 = vector.broadcast %cst_101 : f32 to vector<8x128xf32>
    %367 = arith.subf %366, %360 : vector<8x128xf32>
    %368 = arith.mulf %367, %365 : vector<8x128xf32>
    %369 = arith.mulf %360, %337 : vector<8x128xf32>
    %370 = arith.addf %368, %369 : vector<8x128xf32>
    %c2_i32_102 = arith.constant 2 : i32
    %c8_i32_103 = arith.constant 8 : i32
    %371 = arith.muli %c2_i32_102, %c8_i32_103 : i32
    %372 = tpu.assume_multiple %371, 8 : i32
    %373 = arith.index_cast %372 : i32 to index
    %c0_104 = arith.constant 0 : index
    %374 = vector.load %arg15[%373, %c0_104] : memref<64x384xf32, #tpu.memory_space<vmem>>, vector<8x384xf32>
    %cst_105 = arith.constant dense<0.000000e+00> : vector<8x384xf32>
    %375 = tpu.matmul %370, %301, %cst_105 {dimension_numbers = #tpu.dot_dimension_numbers<[1], [0], [0], [1], [0, 0, 1, 1], [], []>} : vector<8x128xf32>, vector<128x384xf32>, vector<8x384xf32> -> vector<8x384xf32>
    %376 = vector.broadcast %302 : vector<1x384xf32> to vector<8x384xf32>
    %377 = arith.addf %375, %376 : vector<8x384xf32>
    %378 = vector.extract_strided_slice %374 {offsets = [0, 0], sizes = [8, 128], strides = [1, 1]} : vector<8x384xf32> to vector<8x128xf32>
    %379 = vector.extract_strided_slice %377 {offsets = [0, 0], sizes = [8, 128], strides = [1, 1]} : vector<8x384xf32> to vector<8x128xf32>
    %380 = arith.addf %378, %379 : vector<8x128xf32>
    %381 = arith.negf %380 : vector<8x128xf32>
    %382 = math.exp %381 : vector<8x128xf32>
    %cst_106 = arith.constant 1.000000e+00 : f32
    %383 = vector.broadcast %cst_106 : f32 to vector<8x128xf32>
    %384 = arith.addf %383, %382 : vector<8x128xf32>
    %385 = arith.divf %383, %384 : vector<8x128xf32>
    %386 = vector.extract_strided_slice %374 {offsets = [0, 128], sizes = [8, 128], strides = [1, 1]} : vector<8x384xf32> to vector<8x128xf32>
    %387 = vector.extract_strided_slice %377 {offsets = [0, 128], sizes = [8, 128], strides = [1, 1]} : vector<8x384xf32> to vector<8x128xf32>
    %388 = arith.addf %386, %387 : vector<8x128xf32>
    %389 = arith.negf %388 : vector<8x128xf32>
    %390 = math.exp %389 : vector<8x128xf32>
    %cst_107 = arith.constant 1.000000e+00 : f32
    %391 = vector.broadcast %cst_107 : f32 to vector<8x128xf32>
    %392 = arith.addf %391, %390 : vector<8x128xf32>
    %393 = arith.divf %391, %392 : vector<8x128xf32>
    %394 = vector.extract_strided_slice %374 {offsets = [0, 256], sizes = [8, 128], strides = [1, 1]} : vector<8x384xf32> to vector<8x128xf32>
    %395 = vector.extract_strided_slice %377 {offsets = [0, 256], sizes = [8, 128], strides = [1, 1]} : vector<8x384xf32> to vector<8x128xf32>
    %396 = arith.mulf %385, %395 : vector<8x128xf32>
    %397 = arith.addf %394, %396 : vector<8x128xf32>
    %398 = math.tanh %397 : vector<8x128xf32>
    %cst_108 = arith.constant 1.000000e+00 : f32
    %399 = vector.broadcast %cst_108 : f32 to vector<8x128xf32>
    %400 = arith.subf %399, %393 : vector<8x128xf32>
    %401 = arith.mulf %400, %398 : vector<8x128xf32>
    %402 = arith.mulf %393, %370 : vector<8x128xf32>
    %403 = arith.addf %401, %402 : vector<8x128xf32>
    %c3_i32_109 = arith.constant 3 : i32
    %c8_i32_110 = arith.constant 8 : i32
    %404 = arith.muli %c3_i32_109, %c8_i32_110 : i32
    %405 = tpu.assume_multiple %404, 8 : i32
    %406 = arith.index_cast %405 : i32 to index
    %c0_111 = arith.constant 0 : index
    %407 = vector.load %arg15[%406, %c0_111] : memref<64x384xf32, #tpu.memory_space<vmem>>, vector<8x384xf32>
    %cst_112 = arith.constant dense<0.000000e+00> : vector<8x384xf32>
    %408 = tpu.matmul %403, %301, %cst_112 {dimension_numbers = #tpu.dot_dimension_numbers<[1], [0], [0], [1], [0, 0, 1, 1], [], []>} : vector<8x128xf32>, vector<128x384xf32>, vector<8x384xf32> -> vector<8x384xf32>
    %409 = vector.broadcast %302 : vector<1x384xf32> to vector<8x384xf32>
    %410 = arith.addf %408, %409 : vector<8x384xf32>
    %411 = vector.extract_strided_slice %407 {offsets = [0, 0], sizes = [8, 128], strides = [1, 1]} : vector<8x384xf32> to vector<8x128xf32>
    %412 = vector.extract_strided_slice %410 {offsets = [0, 0], sizes = [8, 128], strides = [1, 1]} : vector<8x384xf32> to vector<8x128xf32>
    %413 = arith.addf %411, %412 : vector<8x128xf32>
    %414 = arith.negf %413 : vector<8x128xf32>
    %415 = math.exp %414 : vector<8x128xf32>
    %cst_113 = arith.constant 1.000000e+00 : f32
    %416 = vector.broadcast %cst_113 : f32 to vector<8x128xf32>
    %417 = arith.addf %416, %415 : vector<8x128xf32>
    %418 = arith.divf %416, %417 : vector<8x128xf32>
    %419 = vector.extract_strided_slice %407 {offsets = [0, 128], sizes = [8, 128], strides = [1, 1]} : vector<8x384xf32> to vector<8x128xf32>
    %420 = vector.extract_strided_slice %410 {offsets = [0, 128], sizes = [8, 128], strides = [1, 1]} : vector<8x384xf32> to vector<8x128xf32>
    %421 = arith.addf %419, %420 : vector<8x128xf32>
    %422 = arith.negf %421 : vector<8x128xf32>
    %423 = math.exp %422 : vector<8x128xf32>
    %cst_114 = arith.constant 1.000000e+00 : f32
    %424 = vector.broadcast %cst_114 : f32 to vector<8x128xf32>
    %425 = arith.addf %424, %423 : vector<8x128xf32>
    %426 = arith.divf %424, %425 : vector<8x128xf32>
    %427 = vector.extract_strided_slice %407 {offsets = [0, 256], sizes = [8, 128], strides = [1, 1]} : vector<8x384xf32> to vector<8x128xf32>
    %428 = vector.extract_strided_slice %410 {offsets = [0, 256], sizes = [8, 128], strides = [1, 1]} : vector<8x384xf32> to vector<8x128xf32>
    %429 = arith.mulf %418, %428 : vector<8x128xf32>
    %430 = arith.addf %427, %429 : vector<8x128xf32>
    %431 = math.tanh %430 : vector<8x128xf32>
    %cst_115 = arith.constant 1.000000e+00 : f32
    %432 = vector.broadcast %cst_115 : f32 to vector<8x128xf32>
    %433 = arith.subf %432, %426 : vector<8x128xf32>
    %434 = arith.mulf %433, %431 : vector<8x128xf32>
    %435 = arith.mulf %426, %403 : vector<8x128xf32>
    %436 = arith.addf %434, %435 : vector<8x128xf32>
    %c4_i32_116 = arith.constant 4 : i32
    %c8_i32_117 = arith.constant 8 : i32
    %437 = arith.muli %c4_i32_116, %c8_i32_117 : i32
    %438 = tpu.assume_multiple %437, 8 : i32
    %439 = arith.index_cast %438 : i32 to index
    %c0_118 = arith.constant 0 : index
    %440 = vector.load %arg15[%439, %c0_118] : memref<64x384xf32, #tpu.memory_space<vmem>>, vector<8x384xf32>
    %cst_119 = arith.constant dense<0.000000e+00> : vector<8x384xf32>
    %441 = tpu.matmul %436, %301, %cst_119 {dimension_numbers = #tpu.dot_dimension_numbers<[1], [0], [0], [1], [0, 0, 1, 1], [], []>} : vector<8x128xf32>, vector<128x384xf32>, vector<8x384xf32> -> vector<8x384xf32>
    %442 = vector.broadcast %302 : vector<1x384xf32> to vector<8x384xf32>
    %443 = arith.addf %441, %442 : vector<8x384xf32>
    %444 = vector.extract_strided_slice %440 {offsets = [0, 0], sizes = [8, 128], strides = [1, 1]} : vector<8x384xf32> to vector<8x128xf32>
    %445 = vector.extract_strided_slice %443 {offsets = [0, 0], sizes = [8, 128], strides = [1, 1]} : vector<8x384xf32> to vector<8x128xf32>
    %446 = arith.addf %444, %445 : vector<8x128xf32>
    %447 = arith.negf %446 : vector<8x128xf32>
    %448 = math.exp %447 : vector<8x128xf32>
    %cst_120 = arith.constant 1.000000e+00 : f32
    %449 = vector.broadcast %cst_120 : f32 to vector<8x128xf32>
    %450 = arith.addf %449, %448 : vector<8x128xf32>
    %451 = arith.divf %449, %450 : vector<8x128xf32>
    %452 = vector.extract_strided_slice %440 {offsets = [0, 128], sizes = [8, 128], strides = [1, 1]} : vector<8x384xf32> to vector<8x128xf32>
    %453 = vector.extract_strided_slice %443 {offsets = [0, 128], sizes = [8, 128], strides = [1, 1]} : vector<8x384xf32> to vector<8x128xf32>
    %454 = arith.addf %452, %453 : vector<8x128xf32>
    %455 = arith.negf %454 : vector<8x128xf32>
    %456 = math.exp %455 : vector<8x128xf32>
    %cst_121 = arith.constant 1.000000e+00 : f32
    %457 = vector.broadcast %cst_121 : f32 to vector<8x128xf32>
    %458 = arith.addf %457, %456 : vector<8x128xf32>
    %459 = arith.divf %457, %458 : vector<8x128xf32>
    %460 = vector.extract_strided_slice %440 {offsets = [0, 256], sizes = [8, 128], strides = [1, 1]} : vector<8x384xf32> to vector<8x128xf32>
    %461 = vector.extract_strided_slice %443 {offsets = [0, 256], sizes = [8, 128], strides = [1, 1]} : vector<8x384xf32> to vector<8x128xf32>
    %462 = arith.mulf %451, %461 : vector<8x128xf32>
    %463 = arith.addf %460, %462 : vector<8x128xf32>
    %464 = math.tanh %463 : vector<8x128xf32>
    %cst_122 = arith.constant 1.000000e+00 : f32
    %465 = vector.broadcast %cst_122 : f32 to vector<8x128xf32>
    %466 = arith.subf %465, %459 : vector<8x128xf32>
    %467 = arith.mulf %466, %464 : vector<8x128xf32>
    %468 = arith.mulf %459, %436 : vector<8x128xf32>
    %469 = arith.addf %467, %468 : vector<8x128xf32>
    %c5_i32_123 = arith.constant 5 : i32
    %c8_i32_124 = arith.constant 8 : i32
    %470 = arith.muli %c5_i32_123, %c8_i32_124 : i32
    %471 = tpu.assume_multiple %470, 8 : i32
    %472 = arith.index_cast %471 : i32 to index
    %c0_125 = arith.constant 0 : index
    %473 = vector.load %arg15[%472, %c0_125] : memref<64x384xf32, #tpu.memory_space<vmem>>, vector<8x384xf32>
    %cst_126 = arith.constant dense<0.000000e+00> : vector<8x384xf32>
    %474 = tpu.matmul %469, %301, %cst_126 {dimension_numbers = #tpu.dot_dimension_numbers<[1], [0], [0], [1], [0, 0, 1, 1], [], []>} : vector<8x128xf32>, vector<128x384xf32>, vector<8x384xf32> -> vector<8x384xf32>
    %475 = vector.broadcast %302 : vector<1x384xf32> to vector<8x384xf32>
    %476 = arith.addf %474, %475 : vector<8x384xf32>
    %477 = vector.extract_strided_slice %473 {offsets = [0, 0], sizes = [8, 128], strides = [1, 1]} : vector<8x384xf32> to vector<8x128xf32>
    %478 = vector.extract_strided_slice %476 {offsets = [0, 0], sizes = [8, 128], strides = [1, 1]} : vector<8x384xf32> to vector<8x128xf32>
    %479 = arith.addf %477, %478 : vector<8x128xf32>
    %480 = arith.negf %479 : vector<8x128xf32>
    %481 = math.exp %480 : vector<8x128xf32>
    %cst_127 = arith.constant 1.000000e+00 : f32
    %482 = vector.broadcast %cst_127 : f32 to vector<8x128xf32>
    %483 = arith.addf %482, %481 : vector<8x128xf32>
    %484 = arith.divf %482, %483 : vector<8x128xf32>
    %485 = vector.extract_strided_slice %473 {offsets = [0, 128], sizes = [8, 128], strides = [1, 1]} : vector<8x384xf32> to vector<8x128xf32>
    %486 = vector.extract_strided_slice %476 {offsets = [0, 128], sizes = [8, 128], strides = [1, 1]} : vector<8x384xf32> to vector<8x128xf32>
    %487 = arith.addf %485, %486 : vector<8x128xf32>
    %488 = arith.negf %487 : vector<8x128xf32>
    %489 = math.exp %488 : vector<8x128xf32>
    %cst_128 = arith.constant 1.000000e+00 : f32
    %490 = vector.broadcast %cst_128 : f32 to vector<8x128xf32>
    %491 = arith.addf %490, %489 : vector<8x128xf32>
    %492 = arith.divf %490, %491 : vector<8x128xf32>
    %493 = vector.extract_strided_slice %473 {offsets = [0, 256], sizes = [8, 128], strides = [1, 1]} : vector<8x384xf32> to vector<8x128xf32>
    %494 = vector.extract_strided_slice %476 {offsets = [0, 256], sizes = [8, 128], strides = [1, 1]} : vector<8x384xf32> to vector<8x128xf32>
    %495 = arith.mulf %484, %494 : vector<8x128xf32>
    %496 = arith.addf %493, %495 : vector<8x128xf32>
    %497 = math.tanh %496 : vector<8x128xf32>
    %cst_129 = arith.constant 1.000000e+00 : f32
    %498 = vector.broadcast %cst_129 : f32 to vector<8x128xf32>
    %499 = arith.subf %498, %492 : vector<8x128xf32>
    %500 = arith.mulf %499, %497 : vector<8x128xf32>
    %501 = arith.mulf %492, %469 : vector<8x128xf32>
    %502 = arith.addf %500, %501 : vector<8x128xf32>
    %c6_i32_130 = arith.constant 6 : i32
    %c8_i32_131 = arith.constant 8 : i32
    %503 = arith.muli %c6_i32_130, %c8_i32_131 : i32
    %504 = tpu.assume_multiple %503, 8 : i32
    %505 = arith.index_cast %504 : i32 to index
    %c0_132 = arith.constant 0 : index
    %506 = vector.load %arg15[%505, %c0_132] : memref<64x384xf32, #tpu.memory_space<vmem>>, vector<8x384xf32>
    %cst_133 = arith.constant dense<0.000000e+00> : vector<8x384xf32>
    %507 = tpu.matmul %502, %301, %cst_133 {dimension_numbers = #tpu.dot_dimension_numbers<[1], [0], [0], [1], [0, 0, 1, 1], [], []>} : vector<8x128xf32>, vector<128x384xf32>, vector<8x384xf32> -> vector<8x384xf32>
    %508 = vector.broadcast %302 : vector<1x384xf32> to vector<8x384xf32>
    %509 = arith.addf %507, %508 : vector<8x384xf32>
    %510 = vector.extract_strided_slice %506 {offsets = [0, 0], sizes = [8, 128], strides = [1, 1]} : vector<8x384xf32> to vector<8x128xf32>
    %511 = vector.extract_strided_slice %509 {offsets = [0, 0], sizes = [8, 128], strides = [1, 1]} : vector<8x384xf32> to vector<8x128xf32>
    %512 = arith.addf %510, %511 : vector<8x128xf32>
    %513 = arith.negf %512 : vector<8x128xf32>
    %514 = math.exp %513 : vector<8x128xf32>
    %cst_134 = arith.constant 1.000000e+00 : f32
    %515 = vector.broadcast %cst_134 : f32 to vector<8x128xf32>
    %516 = arith.addf %515, %514 : vector<8x128xf32>
    %517 = arith.divf %515, %516 : vector<8x128xf32>
    %518 = vector.extract_strided_slice %506 {offsets = [0, 128], sizes = [8, 128], strides = [1, 1]} : vector<8x384xf32> to vector<8x128xf32>
    %519 = vector.extract_strided_slice %509 {offsets = [0, 128], sizes = [8, 128], strides = [1, 1]} : vector<8x384xf32> to vector<8x128xf32>
    %520 = arith.addf %518, %519 : vector<8x128xf32>
    %521 = arith.negf %520 : vector<8x128xf32>
    %522 = math.exp %521 : vector<8x128xf32>
    %cst_135 = arith.constant 1.000000e+00 : f32
    %523 = vector.broadcast %cst_135 : f32 to vector<8x128xf32>
    %524 = arith.addf %523, %522 : vector<8x128xf32>
    %525 = arith.divf %523, %524 : vector<8x128xf32>
    %526 = vector.extract_strided_slice %506 {offsets = [0, 256], sizes = [8, 128], strides = [1, 1]} : vector<8x384xf32> to vector<8x128xf32>
    %527 = vector.extract_strided_slice %509 {offsets = [0, 256], sizes = [8, 128], strides = [1, 1]} : vector<8x384xf32> to vector<8x128xf32>
    %528 = arith.mulf %517, %527 : vector<8x128xf32>
    %529 = arith.addf %526, %528 : vector<8x128xf32>
    %530 = math.tanh %529 : vector<8x128xf32>
    %cst_136 = arith.constant 1.000000e+00 : f32
    %531 = vector.broadcast %cst_136 : f32 to vector<8x128xf32>
    %532 = arith.subf %531, %525 : vector<8x128xf32>
    %533 = arith.mulf %532, %530 : vector<8x128xf32>
    %534 = arith.mulf %525, %502 : vector<8x128xf32>
    %535 = arith.addf %533, %534 : vector<8x128xf32>
    %c7_i32_137 = arith.constant 7 : i32
    %c8_i32_138 = arith.constant 8 : i32
    %536 = arith.muli %c7_i32_137, %c8_i32_138 : i32
    %537 = tpu.assume_multiple %536, 8 : i32
    %538 = arith.index_cast %537 : i32 to index
    %c0_139 = arith.constant 0 : index
    %539 = vector.load %arg15[%538, %c0_139] : memref<64x384xf32, #tpu.memory_space<vmem>>, vector<8x384xf32>
    %cst_140 = arith.constant dense<0.000000e+00> : vector<8x384xf32>
    %540 = tpu.matmul %535, %301, %cst_140 {dimension_numbers = #tpu.dot_dimension_numbers<[1], [0], [0], [1], [0, 0, 1, 1], [], []>} : vector<8x128xf32>, vector<128x384xf32>, vector<8x384xf32> -> vector<8x384xf32>
    %541 = vector.broadcast %302 : vector<1x384xf32> to vector<8x384xf32>
    %542 = arith.addf %540, %541 : vector<8x384xf32>
    %543 = vector.extract_strided_slice %539 {offsets = [0, 0], sizes = [8, 128], strides = [1, 1]} : vector<8x384xf32> to vector<8x128xf32>
    %544 = vector.extract_strided_slice %542 {offsets = [0, 0], sizes = [8, 128], strides = [1, 1]} : vector<8x384xf32> to vector<8x128xf32>
    %545 = arith.addf %543, %544 : vector<8x128xf32>
    %546 = arith.negf %545 : vector<8x128xf32>
    %547 = math.exp %546 : vector<8x128xf32>
    %cst_141 = arith.constant 1.000000e+00 : f32
    %548 = vector.broadcast %cst_141 : f32 to vector<8x128xf32>
    %549 = arith.addf %548, %547 : vector<8x128xf32>
    %550 = arith.divf %548, %549 : vector<8x128xf32>
    %551 = vector.extract_strided_slice %539 {offsets = [0, 128], sizes = [8, 128], strides = [1, 1]} : vector<8x384xf32> to vector<8x128xf32>
    %552 = vector.extract_strided_slice %542 {offsets = [0, 128], sizes = [8, 128], strides = [1, 1]} : vector<8x384xf32> to vector<8x128xf32>
    %553 = arith.addf %551, %552 : vector<8x128xf32>
    %554 = arith.negf %553 : vector<8x128xf32>
    %555 = math.exp %554 : vector<8x128xf32>
    %cst_142 = arith.constant 1.000000e+00 : f32
    %556 = vector.broadcast %cst_142 : f32 to vector<8x128xf32>
    %557 = arith.addf %556, %555 : vector<8x128xf32>
    %558 = arith.divf %556, %557 : vector<8x128xf32>
    %559 = vector.extract_strided_slice %539 {offsets = [0, 256], sizes = [8, 128], strides = [1, 1]} : vector<8x384xf32> to vector<8x128xf32>
    %560 = vector.extract_strided_slice %542 {offsets = [0, 256], sizes = [8, 128], strides = [1, 1]} : vector<8x384xf32> to vector<8x128xf32>
    %561 = arith.mulf %550, %560 : vector<8x128xf32>
    %562 = arith.addf %559, %561 : vector<8x128xf32>
    %563 = math.tanh %562 : vector<8x128xf32>
    %cst_143 = arith.constant 1.000000e+00 : f32
    %564 = vector.broadcast %cst_143 : f32 to vector<8x128xf32>
    %565 = arith.subf %564, %558 : vector<8x128xf32>
    %566 = arith.mulf %565, %563 : vector<8x128xf32>
    %567 = arith.mulf %558, %535 : vector<8x128xf32>
    %568 = arith.addf %566, %567 : vector<8x128xf32>
    %c8_i32_144 = arith.constant 8 : i32
    %c1_145 = arith.constant 1 : index
    %c0_146 = arith.constant 0 : index
    %c0_147 = arith.constant 0 : index
    %569 = vector.load %arg13[%c1_145, %c0_146, %c0_147] : memref<2x8x128xf32, #tpu.memory_space<vmem>>, vector<1x8x128xf32>
    %570 = vector.shape_cast %569 : vector<1x8x128xf32> to vector<8x128xf32>
    %571 = vector.shape_cast %568 : vector<8x128xf32> to vector<1x8x128xf32>
    tpu.vector_store %arg13[%c1_145, %c0_146, %c0_147], %571 {strides = array<i32>} : memref<2x8x128xf32, #tpu.memory_space<vmem>>, vector<1x8x128xf32>,
    %cst_148 = arith.constant 0.000000e+00 : f32
    %572 = vector.broadcast %cst_148 : f32 to vector<8x128xf32>
    %573 = arith.maximumf %568, %572 : vector<8x128xf32>
    %c0_149 = arith.constant 0 : index
    %c0_150 = arith.constant 0 : index
    %574 = vector.load %arg10[%c0_149, %c0_150] : memref<128x128xf32, #tpu.memory_space<vmem>>, vector<128x128xf32>
    %cst_151 = arith.constant dense<0.000000e+00> : vector<8x128xf32>
    %575 = tpu.matmul %573, %574, %cst_151 {dimension_numbers = #tpu.dot_dimension_numbers<[1], [0], [0], [1], [0, 0, 1, 1], [], []>} : vector<8x128xf32>, vector<128x128xf32>, vector<8x128xf32> -> vector<8x128xf32>
    %c0_152 = arith.constant 0 : index
    %c0_153 = arith.constant 0 : index
    %576 = vector.load %arg11[%c0_152, %c0_153] : memref<1x128xf32, #tpu.memory_space<vmem>>, vector<1x128xf32>
    %577 = vector.broadcast %576 : vector<1x128xf32> to vector<8x128xf32>
    %578 = arith.addf %575, %577 : vector<8x128xf32>
    %c0_154 = arith.constant 0 : index
    %c0_155 = arith.constant 0 : index
    %579 = vector.load %arg12[%c0_154, %c0_155] : memref<8x128xf32, #tpu.memory_space<vmem>>, vector<8x128xf32>
    tpu.vector_store %arg12[%c0_154, %c0_155], %578 {strides = array<i32>} : memref<8x128xf32, #tpu.memory_space<vmem>>, vector<8x128xf32>,
    return
  }
}

</mosaic_0001>

<bundles_post_ra>
// kernel: gru_net_forward.1
= control target key start
LH: loop header
LB: loop body
LE: loop exit
PB: predicated region body
PF: predicated region fallthrough
CT: control target
= control target key end

     0   :  { %v5960_v3 = vmov 0.0   ;;  %vm5962_vm0 = vmmov 0   ;;  %s7619_s2 = inlined_call_operand.vmem [shape: f32[128,384], index: 2, kind: input, shape index: {}]   ;;  %s7620_s0 = inlined_call_operand.vmem [shape: f32[64,128], index: 0, kind: input, shape index: {}]   ;;  %s7621_s3 = inlined_call_operand.vmem [shape: f32[128,384], index: 3, kind: input, shape index: {}]   ;;  %s7622_s1 = inlined_call_operand.vmem [shape: f32[2,8,128], index: 1, kind: input, shape index: {}]   ;;  %s7623_s4 = inlined_call_operand.vmem [shape: f32[1,384], index: 4, kind: input, shape index: {}]   ;;  %s7624_s5 = inlined_call_operand.vmem [shape: f32[1,384], index: 5, kind: input, shape index: {}]   ;;  %s7625_s6 = inlined_call_operand.vmem [shape: f32[128,384], index: 6, kind: input, shape index: {}]   ;;  %s7626_s7 = inlined_call_operand.vmem [shape: f32[128,384], index: 7, kind: input, shape index: {}]   ;;  %s7627_s13 = inlined_call_operand.vmem [shape: f32[2,8,128], index: 13, kind: output, shape index: {1}]   ;;  %s7628_s9 = inlined_call_operand.vmem [shape: f32[1,384], index: 9, kind: input, shape index: {}]   ;;  %s7629_s8 = inlined_call_operand.vmem [shape: f32[1,384], index: 8, kind: input, shape index: {}]   ;;  %s7630_s10 = inlined_call_operand.vmem [shape: f32[128,128], index: 10, kind: input, shape index: {}]   ;;  %s7631_s11 = inlined_call_operand.vmem [shape: f32[1,128], index: 11, kind: input, shape index: {}]   ;;  %s7632_s12 = inlined_call_operand.vmem [shape: f32[8,128], index: 12, kind: output, shape index: {0}]  }
   0x1   :  { %v52_v0 = vld [vmem:[%s7619_s2 + $0x8] sm:$0xff]  ;;  %v55_v1 = vld [vmem:[%s7619_s2 + $0x20] sm:$0xff]  ;;  %180 = vmatprep.mubr.f32.mxu0 %v5960_v3  ;;  %v54_v5 = vld [vmem:[%s7619_s2 + $0x18] sm:$0xff] }
   0x2   :  { %v51_v2 = vld [vmem:[%s7619_s2] sm:$0xff]  ;;  %v4653_v4 = vpack.c.bf16 %v55_v1, %v52_v0  ;;  %v58_v6 = vld [vmem:[%s7619_s2 + $0x38] sm:$0xff]  ;;  %v61_v7 = vld [vmem:[%s7619_s2 + $0x50] sm:$0xff] }
   0x3   :  { %v4655_v8 = vpack.c.bf16 %v54_v5, %v51_v2  ;;  %v4657_v9 = vpack.c.bf16 %v61_v7, %v58_v6  ;;  %v57_v10 = vld [vmem:[%s7619_s2 + $0x30] sm:$0xff]  ;;  %v60_v11 = vld [vmem:[%s7619_s2 + $0x48] sm:$0xff]  ;;  %v67_v13 = vld [vmem:[%s7619_s2 + $0x80] sm:$0xff] }
   0x4   :  { %v64_v12 = vld [vmem:[%s7619_s2 + $0x68] sm:$0xff]  ;;  %4654 = vmatprep.subr.bf16.mxu0 %v4653_v4  ;;  %v4659_v14 = vpack.c.bf16 %v60_v11, %v57_v10  ;;  %v63_v16 = vld [vmem:[%s7619_s2 + $0x60] sm:$0xff]  ;;  %v66_v17 = vld [vmem:[%s7619_s2 + $0x78] sm:$0xff] }
   0x5   :  { %4656 = vmatpush1.bf16.msra.mxu0 %v4655_v8  ;;  %v4661_v15 = vpack.c.bf16 %v67_v13, %v64_v12  ;;  %v70_v18 = vld [vmem:[%s7619_s2 + $0x98] sm:$0xff]  ;;  %v73_v19 = vld [vmem:[%s7619_s2 + $0xb0] sm:$0xff]  ;;  %v4663_v20 = vpack.c.bf16 %v66_v17, %v63_v16  ;;  %v72_v23 = vld [vmem:[%s7619_s2 + $0xa8] sm:$0xff] }
   0x6   :  { %4658 = vmatprep.subr.bf16.mxu0 %v4657_v9  ;;  %v69_v21 = vld [vmem:[%s7619_s2 + $0x90] sm:$0xff]  ;;  %v4665_v22 = vpack.c.bf16 %v73_v19, %v70_v18  ;;  %v56_v25 = vld [vmem:[%s7619_s2 + $0x28] sm:$0xff]  ;;  %v79_v27 = vld [vmem:[%s7619_s2 + $0xe0] sm:$0xff] }
   0x7   :  { %v53_v24 = vld [vmem:[%s7619_s2 + $0x10] sm:$0xff]  ;;  %v76_v26 = vld [vmem:[%s7619_s2 + $0xc8] sm:$0xff]  ;;  %v59_v29 = vld [vmem:[%s7619_s2 + $0x40] sm:$0xff]  ;;  %v4667_v31 = vpack.c.bf16 %v72_v23, %v69_v21 }
   0x8   :  { %v4685_v28 = vpack.c.bf16 %v56_v25, %v53_v24  ;;  %v62_v30 = vld [vmem:[%s7619_s2 + $0x58] sm:$0xff]  ;;  %v75_v32 = vld [vmem:[%s7619_s2 + $0xc0] sm:$0xff]  ;;  %v4669_v34 = vpack.c.bf16 %v79_v27, %v76_v26  ;;  %v65_v37 = vld [vmem:[%s7619_s2 + $0x70] sm:$0xff] }
   0x9   :  { %4660 = vmatpush1.bf16.msra.mxu0 %v4659_v14  ;;  %v4689_v33 = vpack.c.bf16 %v62_v30, %v59_v29  ;;  %v78_v35 = vld [vmem:[%s7619_s2 + $0xd8] sm:$0xff]  ;;  %v6109_v36 = vld [vmem:[%s7620_s0] sm:$0xff]  ;;  %v85_v39 = vld [vmem:[%s7619_s2 + $0x110] sm:$0xff] }
   0xa   :  { %4662 = vmatprep.subr.bf16.mxu0 %v4661_v15  ;;  %4686 = vmatprep.subr.bf16.mxu1 %v4685_v28  ;;  %v82_v38 = vld [vmem:[%s7619_s2 + $0xf8] sm:$0xff]  ;;  %v68_v40 = vld [vmem:[%s7619_s2 + $0x88] sm:$0xff]  ;;  %v4671_v42 = vpack.c.bf16 %v78_v35, %v75_v32  ;;  %v71_v43 = vld [vmem:[%s7619_s2 + $0xa0] sm:$0xff] }
   0xb   :  { %4688 = vmatpush3.bf16.msra.mxu1 %v4685_v28  ;;  %4002 = vmatprep.mubr.f32.mxu1 %v6109_v36  ;;  %v4693_v41 = vpack.c.bf16 %v68_v40, %v65_v37  ;;  %v74_v44 = vld [vmem:[%s7619_s2 + $0xb8] sm:$0xff]  ;;  %v4673_v45 = vpack.c.bf16 %v85_v39, %v82_v38  ;;  %v81_v46 = vld [vmem:[%s7619_s2 + $0xf0] sm:$0xff]  ;;  %v84_v47 = vld [vmem:[%s7619_s2 + $0x108] sm:$0xff]  ;;  %v5961_v40 = vmov 0.0|0.0  }
   0xc   :  { %4690 = vmatprep.subr.bf16.mxu1 %v4689_v33  ;;  %v88_v48 = vld [vmem:[%s7619_s2 + $0x128] sm:$0xff]  ;;  %v91_v49 = vld [vmem:[%s7619_s2 + $0x140] sm:$0xff]  ;;  %v4697_v50 = vpack.c.bf16 %v74_v44, %v71_v43  ;;  %v77_v51 = vld [vmem:[%s7619_s2 + $0xd0] sm:$0xff]  ;;  %v4675_v53 = vpack.c.bf16 %v84_v47, %v81_v46 }
   0xd   :  { %4664 = vmatpush1.bf16.msra.mxu0 %v4663_v20  ;;  %v80_v52 = vld [vmem:[%s7619_s2 + $0xe8] sm:$0xff]  ;;  %v4677_v54 = vpack.c.bf16 %v91_v49, %v88_v48  ;;  %v87_v55 = vld [vmem:[%s7619_s2 + $0x120] sm:$0xff]  ;;  %v90_v56 = vld [vmem:[%s7619_s2 + $0x138] sm:$0xff] }
   0xe   :  { %4666 = vmatprep.subr.bf16.mxu0 %v4665_v22  ;;  %v94_v57 = vld [vmem:[%s7619_s2 + $0x158] sm:$0xff]  ;;  %v97_v58 = vld [vmem:[%s7619_s2 + $0x170] sm:$0xff]  ;;  %v4701_v59 = vpack.c.bf16 %v80_v52, %v77_v51  ;;  %v83_v60 = vld [vmem:[%s7619_s2 + $0x100] sm:$0xff]  ;;  %v4679_v62 = vpack.c.bf16 %v90_v56, %v87_v55 }
   0xf   :  { %4692 = vmatpush3.bf16.msra.mxu1 %v4689_v33  ;;  %v86_v61 = vld [vmem:[%s7619_s2 + $0x118] sm:$0xff]  ;;  %v4681_v63 = vpack.c.bf16 %v97_v58, %v94_v57  ;;  %v93_v0 = vld [vmem:[%s7619_s2 + $0x150] sm:$0xff]  ;;  %v96_v1 = vld [vmem:[%s7619_s2 + $0x168] sm:$0xff] }
  0x10   :  { %4694 = vmatprep.subr.bf16.mxu1 %v4693_v41  ;;  %v359_v2 = vld [vmem:[%s7621_s3 + $0x8] sm:$0xff]  ;;  %v362_v4 = vld [vmem:[%s7621_s3 + $0x20] sm:$0xff]  ;;  %v4705_v5 = vpack.c.bf16 %v86_v61, %v83_v60  ;;  %v89_v6 = vld [vmem:[%s7619_s2 + $0x130] sm:$0xff]  ;;  %v4683_v8 = vpack.c.bf16 %v96_v1, %v93_v0 }
  0x11   :  { %4668 = vmatpush1.bf16.msra.mxu0 %v4667_v31  ;;  %v92_v7 = vld [vmem:[%s7619_s2 + $0x148] sm:$0xff]  ;;  %v6184_v9 = vpack.c.bf16 %v362_v4, %v359_v2  ;;  %v358_v10 = vld [vmem:[%s7621_s3] sm:$0xff]  ;;  %v361_v11 = vld [vmem:[%s7621_s3 + $0x18] sm:$0xff] }
  0x12   :  { %4670 = vmatprep.subr.bf16.mxu0 %v4669_v34  ;;  %v365_v12 = vld [vmem:[%s7621_s3 + $0x38] sm:$0xff]  ;;  %v368_v13 = vld [vmem:[%s7621_s3 + $0x50] sm:$0xff]  ;;  %v4709_v14 = vpack.c.bf16 %v92_v7, %v89_v6  ;;  %v95_v15 = vld [vmem:[%s7619_s2 + $0x160] sm:$0xff]  ;;  %v6204_v17 = vpack.c.bf16 %v361_v11, %v358_v10 }
  0x13   :  { %4696 = vmatpush3.bf16.msra.mxu1 %v4693_v41  ;;  %v98_v16 = vld [vmem:[%s7619_s2 + $0x178] sm:$0xff]  ;;  %v6207_v18 = vpack.c.bf16 %v368_v13, %v365_v12  ;;  %v364_v19 = vld [vmem:[%s7621_s3 + $0x30] sm:$0xff]  ;;  %v367_v20 = vld [vmem:[%s7621_s3 + $0x48] sm:$0xff] }
  0x14   :  { %4698 = vmatprep.subr.bf16.mxu1 %v4697_v50  ;;  %v371_v21 = vld [vmem:[%s7621_s3 + $0x68] sm:$0xff]  ;;  %v374_v22 = vld [vmem:[%s7621_s3 + $0x80] sm:$0xff]  ;;  %v4713_v23 = vpack.c.bf16 %v98_v16, %v95_v15  ;;  %v6227_v25 = vpack.c.bf16 %v367_v20, %v364_v19  ;;  %v373_v28 = vld [vmem:[%s7621_s3 + $0x78] sm:$0xff] }
  0x15   :  { %4672 = vmatpush1.bf16.msra.mxu0 %v4671_v42  ;;  %v44_v24 = vld [vmem:[%s7620_s0 + $0x8] sm:$0xff]  ;;  %v6230_v26 = vpack.c.bf16 %v374_v22, %v371_v21  ;;  %v370_v27 = vld [vmem:[%s7621_s3 + $0x60] sm:$0xff]  ;;  %v377_v29 = vld [vmem:[%s7621_s3 + $0x98] sm:$0xff] }
  0x16   :  { %4674 = vmatprep.subr.bf16.mxu0 %v4673_v45  ;;  %v380_v30 = vld [vmem:[%s7621_s3 + $0xb0] sm:$0xff]  ;;  %v363_v32 = vld [vmem:[%s7621_s3 + $0x28] sm:$0xff]  ;;  %v6255_v34 = vpack.c.bf16 %v373_v28, %v370_v27  ;;  %v386_v39 = vld [vmem:[%s7621_s3 + $0xe0] sm:$0xff] }
  0x17   :  { %4700 = vmatpush3.bf16.msra.mxu1 %v4697_v50  ;;  %v360_v31 = vld [vmem:[%s7621_s3 + $0x10] sm:$0xff]  ;;  %v6258_v35 = vpack.c.bf16 %v380_v30, %v377_v29  ;;  %v379_v37 = vld [vmem:[%s7621_s3 + $0xa8] sm:$0xff]  ;;  %v366_v42 = vld [vmem:[%s7621_s3 + $0x40] sm:$0xff] }
  0x18   :  { %4702 = vmatprep.subr.bf16.mxu1 %v4701_v59  ;;  %v45_v33 = vld [vmem:[%s7620_s0 + $0x10] sm:$0xff]  ;;  %v383_v38 = vld [vmem:[%s7621_s3 + $0xc8] sm:$0xff]  ;;  %v6273_v41 = vpack.c.bf16 %v363_v32, %v360_v31  ;;  %v369_v43 = vld [vmem:[%s7621_s3 + $0x58] sm:$0xff] }
  0x19   :  { %4676 = vmatpush1.bf16.msra.mxu0 %v4675_v53  ;;  %v46_v44 = vld [vmem:[%s7620_s0 + $0x18] sm:$0xff]  ;;  %v6289_v46 = vpack.c.bf16 %v386_v39, %v383_v38  ;;  %v382_v47 = vld [vmem:[%s7621_s3 + $0xc0] sm:$0xff]  ;;  %v392_v50 = vld [vmem:[%s7621_s3 + $0x110] sm:$0xff]  ;;  %v6304_v51 = vpack.c.bf16 %v369_v43, %v366_v42 }
  0x1a   :  { %4678 = vmatprep.subr.bf16.mxu0 %v4677_v54  ;;  %v385_v48 = vld [vmem:[%s7621_s3 + $0xd8] sm:$0xff]  ;;  %v372_v52 = vld [vmem:[%s7621_s3 + $0x70] sm:$0xff]  ;;  %v375_v53 = vld [vmem:[%s7621_s3 + $0x88] sm:$0xff] }
  0x1b   :  { %4704 = vmatpush3.bf16.msra.mxu1 %v4701_v59  ;;  %v389_v49 = vld [vmem:[%s7621_s3 + $0xf8] sm:$0xff]  ;;  %v47_v54 = vld [vmem:[%s7620_s0 + $0x20] sm:$0xff]  ;;  %v6318_v55 = vpack.c.bf16 %v385_v48, %v382_v47  ;;  %v388_v57 = vld [vmem:[%s7621_s3 + $0xf0] sm:$0xff]  ;;  %v6336_v61 = vpack.c.bf16 %v375_v53, %v372_v52 }
  0x1c   :  { %4706 = vmatprep.subr.bf16.mxu1 %v4705_v5  ;;  %v6321_v56 = vpack.c.bf16 %v392_v50, %v389_v49  ;;  %v391_v58 = vld [vmem:[%s7621_s3 + $0x108] sm:$0xff]  ;;  %v398_v60 = vld [vmem:[%s7621_s3 + $0x140] sm:$0xff]  ;;  %v49_v2 = vld [vmem:[%s7620_s0 + $0x30] sm:$0xff] }
  0x1d   :  { %4680 = vmatpush1.bf16.msra.mxu0 %v4679_v62  ;;  %v395_v59 = vld [vmem:[%s7621_s3 + $0x128] sm:$0xff]  ;;  %v378_v62 = vld [vmem:[%s7621_s3 + $0xa0] sm:$0xff]  ;;  %v6350_v1 = vpack.c.bf16 %v391_v58, %v388_v57  ;;  %v397_v6 = vld [vmem:[%s7621_s3 + $0x138] sm:$0xff] }
  0x1e   :  { %4682 = vmatprep.subr.bf16.mxu0 %v4681_v63  ;;  %v381_v63 = vld [vmem:[%s7621_s3 + $0xb8] sm:$0xff]  ;;  %v48_v0 = vld [vmem:[%s7620_s0 + $0x28] sm:$0xff]  ;;  %v6356_v4 = vpack.c.bf16 %v398_v60, %v395_v59  ;;  %v384_v11 = vld [vmem:[%s7621_s3 + $0xd0] sm:$0xff] }
  0x1f   :  { %4708 = vmatpush3.bf16.msra.mxu1 %v4705_v5  ;;  %v394_v5 = vld [vmem:[%s7621_s3 + $0x120] sm:$0xff]  ;;  %v401_v7 = vld [vmem:[%s7621_s3 + $0x158] sm:$0xff]  ;;  %v6371_v10 = vpack.c.bf16 %v381_v63, %v378_v62  ;;  %v387_v12 = vld [vmem:[%s7621_s3 + $0xe8] sm:$0xff] }
  0x20   :  { %4710 = vmatprep.subr.bf16.mxu1 %v4709_v14  ;;  %v6382_v13 = vpack.c.bf16 %v397_v6, %v394_v5  ;;  %v400_v16 = vld [vmem:[%s7621_s3 + $0x150] sm:$0xff]  ;;  %v403_v19 = vld [vmem:[%s7621_s3 + $0x168] sm:$0xff]  ;;  %v6397_v20 = vpack.c.bf16 %v387_v12, %v384_v11  ;;  %v390_v21 = vld [vmem:[%s7621_s3 + $0x100] sm:$0xff] }
  0x21   :  { %4684 = vmatpush1.bf16.msra.mxu0 %v4683_v8  ;;  %v404_v8 = vld [vmem:[%s7621_s3 + $0x170] sm:$0xff]  ;;  %v393_v22 = vld [vmem:[%s7621_s3 + $0x118] sm:$0xff]  ;;  %v399_v28 = vld [vmem:[%s7621_s3 + $0x148] sm:$0xff] }
  0x22   :  { %4718 = vmatprep.subr.bf16.mxu0 %v6184_v9  ;;  %v6388_v15 = vpack.c.bf16 %v404_v8, %v401_v7  ;;  %v396_v27 = vld [vmem:[%s7621_s3 + $0x130] sm:$0xff]  ;;  %v6428_v29 = vld [vmem:[%s7622_s1] sm:$0xff]  ;;  %v405_v32 = vld [vmem:[%s7621_s3 + $0x178] sm:$0xff] }
  0x23   :  { %4712 = vmatpush3.bf16.msra.mxu1 %v4709_v14  ;;  %v50_v14 = vld [vmem:[%s7620_s0 + $0x38] sm:$0xff]  ;;  %v6432_v30 = vpack.c.bf16 %v399_v28, %v396_v27  ;;  %v402_v31 = vld [vmem:[%s7621_s3 + $0x160] sm:$0xff] }
  0x24   :  { %181 = vmatmul.mubr.f32.vlgmr.msra.gmra.mrb[0].mxu0 %v6109_v36  ;;  %4714 = vmatprep.subr.bf16.mxu1 %v4713_v23  ;;  %v376_v36 = vld [vmem:[%s7621_s3 + $0x90] sm:$0xff]  ;;  %v99_v39 = vld [vmem:[%s7623_s4] sm:$0x7] }
  0x25   :  { %4720 = vmatpush1.bf16.msra.mxu0 %v6204_v17  ;;  %186 = vmatprep.mubr.f32.mxu0 %v5960_v3  ;;  %v6286_v45 = vpack.c.bf16 %v379_v37, %v376_v36  ;;  %v101_v36 = vlaneseq  ;;  %v406_v60 = vld [vmem:[%s7624_s5] sm:$0x7] }
  0x26   :  { %4722 = vmatprep.subr.bf16.mxu0 %v6207_v18 }
  0x27   :  { %4716 = vmatpush3.bf16.msra.mxu1 %v4713_v23  ;;  %v6410_v23 = vpack.c.bf16 %v403_v19, %v400_v16  ;;  %v102_v37 = vshrl.u32 %v101_v36, 7 }
  0x28   :  { %187 = vmatmul.mubr.f32.gmra.mrb[2].mxu0 %v44_v24  ;;  %4749 = vmatprep.subr.bf16.mxu1 %v5961_v40 }
  0x29   :  { %4724 = vmatpush1.bf16.msra.mxu0 %v6227_v25  ;;  %192 = vmatprep.mubr.f32.mxu0 %v5960_v3  ;;  %v6484_v38 = vsub.s32 2, %v102_v37  ;;  %v6500_v59 = vsub.s32 0, %v102_v37 }
  0x2a   :  { %4726 = vmatprep.subr.bf16.mxu0 %v6230_v26  ;;  %4003 = vmatmul.mubr.f32.vlgmr.msra.gmra.mrb[0].mxu1 %v44_v24  ;;  %v6414_v24 = vpack.c.bf16 %v393_v22, %v390_v21 }
  0x2b   :  { %4751 = vmatpush3.bf16.msra.mxu1 %v6273_v41  ;;  %4005 = vmatprep.mubr.f32.mxu1 %v45_v33  ;;  %v112_v42 = vrot.slane %v99_v39, %v6484_v38  ;;  %v104_v6 = vrot.slane %v99_v39, %v6500_v59  ;;  %v418_v7 = vrot.slane %v406_v60, %v6500_v59 }
  0x2c   :  { %193 = vmatmul.mubr.f32.gmra.mrb[4].mxu0 %v45_v33  ;;  %4752 = vmatprep.subr.bf16.mxu1 %v5961_v40  ;;  %v6446_v33 = vpack.c.bf16 %v405_v32, %v402_v31 }
  0x2d   :  { %4728 = vmatpush1.bf16.msra.mxu0 %v6255_v34  ;;  %198 = vmatprep.mubr.f32.mxu0 %v5960_v3  ;;  %v6515_v12 = vadd.f32 %v418_v7, %v104_v6 }
  0x2e   :  { %4730 = vmatprep.subr.bf16.mxu0 %v6258_v35  ;;  %4006 = vmatmul.mubr.f32.gmra.mrb[2].mxu1 %v46_v44 }
  0x2f   :  { %4754 = vmatpush3.bf16.msra.mxu1 %v6304_v51  ;;  %4008 = vmatprep.mubr.f32.mxu1 %v47_v54 }
  0x30   :  { %199 = vmatmul.mubr.f32.gmra.mrb[6].mxu0 %v46_v44  ;;  %4755 = vmatprep.subr.bf16.mxu1 %v5961_v40 }
  0x31   :  { %4732 = vmatpush1.bf16.msra.mxu0 %v6286_v45  ;;  %204 = vmatprep.mubr.f32.mxu0 %v5960_v3 }
  0x32   :  { %4734 = vmatprep.subr.bf16.mxu0 %v6289_v46  ;;  %4009 = vmatmul.mubr.f32.gmra.mrb[4].mxu1 %v48_v0 }
  0x33   :  { %4757 = vmatpush3.bf16.msra.mxu1 %v6336_v61  ;;  %4011 = vmatprep.mubr.f32.mxu1 %v49_v2 }
  0x34   :  { %205 = vmatmul.mubr.f32.gmra.mrb[8].mxu0 %v47_v54  ;;  %4758 = vmatprep.subr.bf16.mxu1 %v5961_v40 }
  0x35   :  { %4736 = vmatpush1.bf16.msra.mxu0 %v6318_v55  ;;  %210 = vmatprep.mubr.f32.mxu0 %v5960_v3 }
  0x36   :  { %4738 = vmatprep.subr.bf16.mxu0 %v6321_v56  ;;  %4012 = vmatmul.mubr.f32.gmra.mrb[6].mxu1 %v50_v14 }
  0x37   :  { %4760 = vmatpush3.bf16.msra.mxu1 %v6371_v10  ;;  %4046 = vmatprep.mubr.msk.f32.mxu1 %vm5962_vm0, %v5960_v3 }
  0x38   :  { %211 = vmatmul.mubr.f32.gmra.mrb[10].mxu0 %v48_v0  ;;  %4761 = vmatprep.subr.bf16.mxu1 %v5961_v40 }
  0x39   :  { %4740 = vmatpush1.bf16.msra.mxu0 %v6350_v1  ;;  %216 = vmatprep.mubr.f32.mxu0 %v5960_v3 }
  0x3a   :  { %4742 = vmatprep.subr.bf16.mxu0 %v6356_v4 }
  0x3b   :  { %4763 = vmatpush3.bf16.msra.mxu1 %v6397_v20 }
  0x3c   :  { %217 = vmatmul.mubr.f32.gmra.mrb[12].mxu0 %v49_v2  ;;  %4764 = vmatprep.subr.bf16.mxu1 %v5961_v40  ;;  %v6507_v2 = vsub.s32 1, %v102_v37 }
  0x3d   :  { %4744 = vmatpush1.bf16.msra.mxu0 %v6382_v13  ;;  %222 = vmatprep.mubr.f32.mxu0 %v5960_v3 }
  0x3e   :  { %4746 = vmatprep.subr.bf16.mxu0 %v6388_v15  ;;  %v108_v8 = vrot.slane %v99_v39, %v6507_v2  ;;  %v422_v11 = vrot.slane %v406_v60, %v6507_v2  ;;  %v6522_v39 = vrot.slane %v406_v60, %v6484_v38 }
  0x3f   :  { %4766 = vmatpush3.bf16.msra.mxu1 %v6414_v24 }
  0x40   :  { %223 = vmatmul.mubr.f32.gmra.mrb[14].mxu0 %v50_v14  ;;  %4767 = vmatprep.subr.bf16.mxu1 %v5961_v40  ;;  %v6517_v16 = vadd.f32 %v422_v11, %v108_v8 }
  0x41   :  { %4748 = vmatpush1.bf16.msra.mxu0 %v6410_v23  ;;  %494 = vmatprep.mubr.f32.mxu0 %v5960_v3 }
  0x42   :  { %4774 = vmatprep.subr.bf16.mxu0 %v6184_v9 }
  0x43   :  { %4769 = vmatpush3.bf16.msra.mxu1 %v6432_v30 }
  0x44   :  { %495 = vmatmul.mubr.f32.vlgmr.msra.gmra.mrb[0].mxu0 %v6428_v29  ;;  %4770 = vmatprep.subr.bf16.mxu1 %v5961_v40 }
  0x45   :  { %4776 = vmatpush1.bf16.msra.mxu0 %v6204_v17  ;;  %663 = vmatprep.mubr.f32.mxu0 %v5960_v3 }
  0x46   :  { %4778 = vmatprep.subr.bf16.mxu0 %v6207_v18 }
  0x47   :  { %4772 = vmatpush3.bf16.msra.mxu1 %v6446_v33 }
  0x48   :  { %4805 = vmatprep.subr.bf16.mxu1 %v5961_v40 }
  0x49   :  { %4780 = vmatpush1.bf16.msra.mxu0 %v6227_v25 }
  0x4a   :  { %4782 = vmatprep.subr.bf16.mxu0 %v6230_v26  ;;  %4047 = vmatmul.mubr.f32.vlgmr.msra.gmra.mrb[8].mxu1 %v6428_v29 }
  0x4b   :  { %4807 = vmatpush3.bf16.msra.mxu1 %v6273_v41  ;;  %4081 = vmatprep.mubr.msk.f32.mxu1 %vm5962_vm0, %v5960_v3 }
  0x4c   :  { %4808 = vmatprep.subr.bf16.mxu1 %v5961_v40 }
  0x4d   :  { %4784 = vmatpush1.bf16.msra.mxu0 %v6255_v34 }
  0x4e   :  { %4786 = vmatprep.subr.bf16.mxu0 %v6258_v35 }
  0x4f   :  { %4810 = vmatpush3.bf16.msra.mxu1 %v6304_v51 }
  0x50   :  { %4811 = vmatprep.subr.bf16.mxu1 %v5961_v40 }
  0x51   :  { %4788 = vmatpush1.bf16.msra.mxu0 %v6286_v45 }
  0x52   :  { %4790 = vmatprep.subr.bf16.mxu0 %v6289_v46 }
  0x53   :  { %4813 = vmatpush3.bf16.msra.mxu1 %v6336_v61 }
  0x54   :  { %4814 = vmatprep.subr.bf16.mxu1 %v5961_v40 }
  0x55   :  { %4792 = vmatpush1.bf16.msra.mxu0 %v6318_v55 }
  0x56   :  { %4794 = vmatprep.subr.bf16.mxu0 %v6321_v56 }
  0x57   :  { %4816 = vmatpush3.bf16.msra.mxu1 %v6371_v10 }
  0x58   :  { %4817 = vmatprep.subr.bf16.mxu1 %v5961_v40 }
  0x59   :  { %4796 = vmatpush1.bf16.msra.mxu0 %v6350_v1 }
  0x5a   :  { %4798 = vmatprep.subr.bf16.mxu0 %v6356_v4 }
  0x5b   :  { %4819 = vmatpush3.bf16.msra.mxu1 %v6397_v20 }
  0x5c   :  { %4820 = vmatprep.subr.bf16.mxu1 %v5961_v40 }
  0x5d   :  { %4800 = vmatpush1.bf16.msra.mxu0 %v6382_v13 }
  0x5e   :  { %4802 = vmatprep.subr.bf16.mxu0 %v6388_v15 }
  0x5f   :  { %4822 = vmatpush3.bf16.msra.mxu1 %v6414_v24 }
  0x60   :  { %4823 = vmatprep.subr.bf16.mxu1 %v5961_v40 }
  0x61   :  { %4804 = vmatpush1.bf16.msra.mxu0 %v6410_v23 }
  0x62   :  { %4830 = vmatprep.subr.bf16.mxu0 %v6184_v9 }
  0x63   :  { %4825 = vmatpush3.bf16.msra.mxu1 %v6432_v30 }
  0x64   :  { %4826 = vmatprep.subr.bf16.mxu1 %v5961_v40 }
  0x67   :  { %4828 = vmatpush3.bf16.msra.mxu1 %v6446_v33 }
  0x68   :  { %4861 = vmatprep.subr.bf16.mxu1 %v5961_v40 }
  0xfd   :  { %v4004_v43 = vpop.f32.mrb[0].mxu1 }
  0xfe   :  { %v6490_v44 = vadd.f32 %v4004_v43, %v112_v42  ;;  %v295_v47 = vpop.f32.mrb[1].mxu1 }
 0x101   :  { %v4007_v48 = vpop.f32.mrb[2].mxu1 }
 0x102   :  { %v6492_v49 = vadd.f32 %v4007_v48, %v112_v42  ;;  %v305_v50 = vpop.f32.mrb[3].mxu1 }
 0x103   :  { %v6494_v52 = vadd.f32 %v305_v50, %v112_v42 }
 0x105   :  { %v4010_v53 = vpop.f32.mrb[4].mxu1 }
 0x106   :  { %v6496_v54 = vadd.f32 %v4010_v53, %v112_v42  ;;  %v315_v57 = vpop.f32.mrb[5].mxu1 }
 0x107   :  { %v6498_v58 = vadd.f32 %v315_v57, %v112_v42  ;;  %v296_v57 = vadd.f32 %v295_v47, %v112_v42 }
 0x109   :  { %v4013_v62 = vpop.f32.mrb[6].mxu1 }
 0x10a   :  { %v6505_v63 = vadd.f32 %v4013_v62, %v112_v42  ;;  %v325_v0 = vpop.f32.mrb[7].mxu1 }
 0x10b   :  { %v6509_v5 = vadd.f32 %v325_v0, %v112_v42 }
 0x117   :  { %v496_v14 = vpop.f32.mrb[0].mxu0 }
 0x118   :  { %v5702_v19 = vadd.f32 %v6515_v12, %v496_v14  ;;  %v498_v21 = vpop.f32.mrb[1].mxu0 }
 0x119   :  { %v5704_v27 = vadd.f32 %v6517_v16, %v498_v21 }
 0x11a   :  { %v3598_v22 = vmul.f32 -1.442695, %v5702_v19 }
 0x11b   :  { %v3599_v28 = vmul.f32 -1.442695, %v5704_v27 }
 0x11c   :  { %5800 = vpow2.f32 %v3598_v22 }
 0x11d   :  { %v567_v31 = vpop.f32.mrb[8].mxu1  ;;  %5802 = vpow2.f32 %v3599_v28 }
 0x11e   :  { %v4048_v32 = vpop.f32.mrb[9].mxu1  ;;  %v568_v50 = vadd.f32 %v567_v31, %v6522_v39 }
 0x126   :  { %v5801_v36 = vpop.eup %5800 }
 0x127   :  { %v575_v37 = vadd.f32 1.0, %v5801_v36  ;;  %v5803_v43 = vpop.eup %5802 }
 0x128   :  { %v582_v48 = vadd.f32 1.0, %v5803_v43 }
 0x129   :  { %5804 = vrcp.f32 %v575_v37 }
 0x12a   :  { %5806 = vrcp.f32 %v582_v48 }
 0x133   :  { %v5805_v53 = vpop.eup %5804 }
 0x134   :  { %v585_v62 = vmul.f32 %v5805_v53, %v568_v50  ;;  %v5807_v6 = vpop.eup %5806 }
 0x135   :  { %v588_v7 = vsub.f32 1.0, %v5807_v6  ;;  %v590_v14 = vmul.f32 %v5807_v6, %v6428_v29 }
 0x136   :  { %v586_v0 = vadd.f32 %v585_v62, %v296_v57 }
 0x138   :  { %5808 = vtanh.f32 %v586_v0 }
 0x142   :  { %v5809_v8 = vpop.eup %5808 }
 0x143   :  { %v589_v11 = vmul.f32 %v5809_v8, %v588_v7 }
 0x145   :  { %v6526_v19 = vadd.f32 %v590_v14, %v589_v11 }
 0x147   :  { %664 = vmatmul.mubr.f32.vlgmr.msra.gmra.mrb[2].mxu0 %v6526_v19  ;;  %4082 = vmatmul.mubr.f32.vlgmr.msra.gmra.mrb[10].mxu1 %v6526_v19 }
 0x148   :  { %4832 = vmatpush1.bf16.msra.mxu0 %v6204_v17  ;;  %4863 = vmatpush3.bf16.msra.mxu1 %v6273_v41 }
 0x149   :  { %4834 = vmatprep.subr.bf16.mxu0 %v6207_v18  ;;  %4864 = vmatprep.subr.bf16.mxu1 %v5961_v40 }
 0x14a   :  { %833 = vmatprep.mubr.f32.mxu0 %v5960_v3  ;;  %4116 = vmatprep.mubr.msk.f32.mxu1 %vm5962_vm0, %v5960_v3 }
 0x14c   :  { %4836 = vmatpush1.bf16.msra.mxu0 %v6227_v25  ;;  %4866 = vmatpush3.bf16.msra.mxu1 %v6304_v51 }
 0x14d   :  { %4838 = vmatprep.subr.bf16.mxu0 %v6230_v26  ;;  %4867 = vmatprep.subr.bf16.mxu1 %v5961_v40 }
 0x150   :  { %4840 = vmatpush1.bf16.msra.mxu0 %v6255_v34  ;;  %4869 = vmatpush3.bf16.msra.mxu1 %v6336_v61 }
 0x151   :  { %4842 = vmatprep.subr.bf16.mxu0 %v6258_v35  ;;  %4870 = vmatprep.subr.bf16.mxu1 %v5961_v40 }
 0x154   :  { %4844 = vmatpush1.bf16.msra.mxu0 %v6286_v45  ;;  %4872 = vmatpush3.bf16.msra.mxu1 %v6371_v10 }
 0x155   :  { %4846 = vmatprep.subr.bf16.mxu0 %v6289_v46  ;;  %4873 = vmatprep.subr.bf16.mxu1 %v5961_v40 }
 0x158   :  { %4848 = vmatpush1.bf16.msra.mxu0 %v6318_v55  ;;  %4875 = vmatpush3.bf16.msra.mxu1 %v6397_v20 }
 0x159   :  { %4850 = vmatprep.subr.bf16.mxu0 %v6321_v56  ;;  %4876 = vmatprep.subr.bf16.mxu1 %v5961_v40 }
 0x15c   :  { %4852 = vmatpush1.bf16.msra.mxu0 %v6350_v1  ;;  %4878 = vmatpush3.bf16.msra.mxu1 %v6414_v24 }
 0x15d   :  { %4854 = vmatprep.subr.bf16.mxu0 %v6356_v4  ;;  %4879 = vmatprep.subr.bf16.mxu1 %v5961_v40 }
 0x160   :  { %4856 = vmatpush1.bf16.msra.mxu0 %v6382_v13  ;;  %4881 = vmatpush3.bf16.msra.mxu1 %v6432_v30 }
 0x161   :  { %4858 = vmatprep.subr.bf16.mxu0 %v6388_v15  ;;  %4882 = vmatprep.subr.bf16.mxu1 %v5961_v40 }
 0x164   :  { %4860 = vmatpush1.bf16.msra.mxu0 %v6410_v23  ;;  %4884 = vmatpush3.bf16.msra.mxu1 %v6446_v33 }
 0x165   :  { %4886 = vmatprep.subr.bf16.mxu0 %v6184_v9  ;;  %4917 = vmatprep.subr.bf16.mxu1 %v5961_v40 }
 0x21a   :  { %v665_v29 = vpop.f32.mrb[2].mxu0  ;;  %v736_v42 = vpop.f32.mrb[10].mxu1 }
 0x21b   :  { %v5706_v47 = vadd.f32 %v6515_v12, %v665_v29  ;;  %v667_v60 = vpop.f32.mrb[3].mxu0  ;;  %v4083_v21 = vpop.f32.mrb[11].mxu1  ;;  %v737_v43 = vadd.f32 %v736_v42, %v6522_v39 }
 0x21c   :  { %v5708_v27 = vadd.f32 %v6517_v16, %v667_v60 }
 0x21d   :  { %v3600_v22 = vmul.f32 -1.442695, %v5706_v47 }
 0x21e   :  { %v3601_v28 = vmul.f32 -1.442695, %v5708_v27 }
 0x21f   :  { %5810 = vpow2.f32 %v3600_v22 }
 0x220   :  { %5812 = vpow2.f32 %v3601_v28 }
 0x229   :  { %v5811_v31 = vpop.eup %5810 }
 0x22a   :  { %v744_v32 = vadd.f32 1.0, %v5811_v31  ;;  %v5813_v36 = vpop.eup %5812 }
 0x22b   :  { %v751_v37 = vadd.f32 1.0, %v5813_v36 }
 0x22c   :  { %5814 = vrcp.f32 %v744_v32 }
 0x22d   :  { %5816 = vrcp.f32 %v751_v37 }
 0x236   :  { %v5815_v48 = vpop.eup %5814 }
 0x237   :  { %v754_v50 = vmul.f32 %v5815_v48, %v737_v43  ;;  %v5817_v57 = vpop.eup %5816 }
 0x238   :  { %v757_v62 = vsub.f32 1.0, %v5817_v57  ;;  %v759_v7 = vmul.f32 %v5817_v57, %v6526_v19 }
 0x239   :  { %v755_v53 = vadd.f32 %v754_v50, %v6490_v44 }
 0x23b   :  { %5818 = vtanh.f32 %v755_v53 }
 0x245   :  { %v5819_v0 = vpop.eup %5818 }
 0x246   :  { %v758_v6 = vmul.f32 %v5819_v0, %v757_v62 }
 0x248   :  { %v6570_v8 = vadd.f32 %v759_v7, %v758_v6 }
 0x24a   :  { %834 = vmatmul.mubr.f32.vlgmr.msra.gmra.mrb[4].mxu0 %v6570_v8  ;;  %4117 = vmatmul.mubr.f32.vlgmr.msra.gmra.mrb[12].mxu1 %v6570_v8 }
 0x24b   :  { %4888 = vmatpush1.bf16.msra.mxu0 %v6204_v17  ;;  %4919 = vmatpush3.bf16.msra.mxu1 %v6273_v41 }
 0x24c   :  { %4890 = vmatprep.subr.bf16.mxu0 %v6207_v18  ;;  %4920 = vmatprep.subr.bf16.mxu1 %v5961_v40 }
 0x24d   :  { %1003 = vmatprep.mubr.f32.mxu0 %v5960_v3  ;;  %4151 = vmatprep.mubr.msk.f32.mxu1 %vm5962_vm0, %v5960_v3 }
 0x24f   :  { %4892 = vmatpush1.bf16.msra.mxu0 %v6227_v25  ;;  %4922 = vmatpush3.bf16.msra.mxu1 %v6304_v51 }
 0x250   :  { %4894 = vmatprep.subr.bf16.mxu0 %v6230_v26  ;;  %4923 = vmatprep.subr.bf16.mxu1 %v5961_v40 }
 0x253   :  { %4896 = vmatpush1.bf16.msra.mxu0 %v6255_v34  ;;  %4925 = vmatpush3.bf16.msra.mxu1 %v6336_v61 }
 0x254   :  { %4898 = vmatprep.subr.bf16.mxu0 %v6258_v35  ;;  %4926 = vmatprep.subr.bf16.mxu1 %v5961_v40 }
 0x257   :  { %4900 = vmatpush1.bf16.msra.mxu0 %v6286_v45  ;;  %4928 = vmatpush3.bf16.msra.mxu1 %v6371_v10 }
 0x258   :  { %4902 = vmatprep.subr.bf16.mxu0 %v6289_v46  ;;  %4929 = vmatprep.subr.bf16.mxu1 %v5961_v40 }
 0x25b   :  { %4904 = vmatpush1.bf16.msra.mxu0 %v6318_v55  ;;  %4931 = vmatpush3.bf16.msra.mxu1 %v6397_v20 }
 0x25c   :  { %4906 = vmatprep.subr.bf16.mxu0 %v6321_v56  ;;  %4932 = vmatprep.subr.bf16.mxu1 %v5961_v40 }
 0x25f   :  { %4908 = vmatpush1.bf16.msra.mxu0 %v6350_v1  ;;  %4934 = vmatpush3.bf16.msra.mxu1 %v6414_v24 }
 0x260   :  { %4910 = vmatprep.subr.bf16.mxu0 %v6356_v4  ;;  %4935 = vmatprep.subr.bf16.mxu1 %v5961_v40 }
 0x263   :  { %4912 = vmatpush1.bf16.msra.mxu0 %v6382_v13  ;;  %4937 = vmatpush3.bf16.msra.mxu1 %v6432_v30 }
 0x264   :  { %4914 = vmatprep.subr.bf16.mxu0 %v6388_v15  ;;  %4938 = vmatprep.subr.bf16.mxu1 %v5961_v40 }
 0x267   :  { %4916 = vmatpush1.bf16.msra.mxu0 %v6410_v23  ;;  %4940 = vmatpush3.bf16.msra.mxu1 %v6446_v33 }
 0x268   :  { %4942 = vmatprep.subr.bf16.mxu0 %v6184_v9  ;;  %4973 = vmatprep.subr.bf16.mxu1 %v5961_v40 }
 0x31d   :  { %v835_v44 = vpop.f32.mrb[4].mxu0  ;;  %v906_v11 = vpop.f32.mrb[12].mxu1 }
 0x31e   :  { %v5710_v14 = vadd.f32 %v6515_v12, %v835_v44  ;;  %v837_v29 = vpop.f32.mrb[5].mxu0  ;;  %v4118_v42 = vpop.f32.mrb[13].mxu1  ;;  %v907_v32 = vadd.f32 %v906_v11, %v6522_v39 }
 0x31f   :  { %v5712_v60 = vadd.f32 %v6517_v16, %v837_v29 }
 0x320   :  { %v3602_v47 = vmul.f32 -1.442695, %v5710_v14 }
 0x321   :  { %v3603_v21 = vmul.f32 -1.442695, %v5712_v60 }
 0x322   :  { %5820 = vpow2.f32 %v3602_v47 }
 0x323   :  { %5822 = vpow2.f32 %v3603_v21 }
 0x32c   :  { %v5821_v22 = vpop.eup %5820 }
 0x32d   :  { %v914_v27 = vadd.f32 1.0, %v5821_v22  ;;  %v5823_v28 = vpop.eup %5822 }
 0x32e   :  { %v921_v31 = vadd.f32 1.0, %v5823_v28 }
 0x32f   :  { %5824 = vrcp.f32 %v914_v27 }
 0x330   :  { %5826 = vrcp.f32 %v921_v31 }
 0x339   :  { %v5825_v36 = vpop.eup %5824 }
 0x33a   :  { %v924_v37 = vmul.f32 %v5825_v36, %v907_v32  ;;  %v5827_v48 = vpop.eup %5826 }
 0x33b   :  { %v927_v50 = vsub.f32 1.0, %v5827_v48  ;;  %v929_v62 = vmul.f32 %v5827_v48, %v6570_v8 }
 0x33c   :  { %v925_v43 = vadd.f32 %v924_v37, %v6494_v52 }
 0x33e   :  { %5828 = vtanh.f32 %v925_v43 }
 0x348   :  { %v5829_v53 = vpop.eup %5828 }
 0x349   :  { %v928_v57 = vmul.f32 %v5829_v53, %v927_v50 }
 0x34b   :  { %v6614_v0 = vadd.f32 %v929_v62, %v928_v57 }
 0x34d   :  { %1004 = vmatmul.mubr.f32.vlgmr.msra.gmra.mrb[6].mxu0 %v6614_v0  ;;  %4152 = vmatmul.mubr.f32.vlgmr.msra.gmra.mrb[14].mxu1 %v6614_v0 }
 0x34e   :  { %4944 = vmatpush1.bf16.msra.mxu0 %v6204_v17  ;;  %4975 = vmatpush3.bf16.msra.mxu1 %v6273_v41 }
 0x34f   :  { %4946 = vmatprep.subr.bf16.mxu0 %v6207_v18  ;;  %4976 = vmatprep.subr.bf16.mxu1 %v5961_v40 }
 0x350   :  { %1173 = vmatprep.mubr.f32.mxu0 %v5960_v3  ;;  %4186 = vmatprep.mubr.msk.f32.mxu1 %vm5962_vm0, %v5960_v3 }
 0x352   :  { %4948 = vmatpush1.bf16.msra.mxu0 %v6227_v25  ;;  %4978 = vmatpush3.bf16.msra.mxu1 %v6304_v51 }
 0x353   :  { %4950 = vmatprep.subr.bf16.mxu0 %v6230_v26  ;;  %4979 = vmatprep.subr.bf16.mxu1 %v5961_v40 }
 0x356   :  { %4952 = vmatpush1.bf16.msra.mxu0 %v6255_v34  ;;  %4981 = vmatpush3.bf16.msra.mxu1 %v6336_v61 }
 0x357   :  { %4954 = vmatprep.subr.bf16.mxu0 %v6258_v35  ;;  %4982 = vmatprep.subr.bf16.mxu1 %v5961_v40 }
 0x35a   :  { %4956 = vmatpush1.bf16.msra.mxu0 %v6286_v45  ;;  %4984 = vmatpush3.bf16.msra.mxu1 %v6371_v10 }
 0x35b   :  { %4958 = vmatprep.subr.bf16.mxu0 %v6289_v46  ;;  %4985 = vmatprep.subr.bf16.mxu1 %v5961_v40 }
 0x35e   :  { %4960 = vmatpush1.bf16.msra.mxu0 %v6318_v55  ;;  %4987 = vmatpush3.bf16.msra.mxu1 %v6397_v20 }
 0x35f   :  { %4962 = vmatprep.subr.bf16.mxu0 %v6321_v56  ;;  %4988 = vmatprep.subr.bf16.mxu1 %v5961_v40 }
 0x362   :  { %4964 = vmatpush1.bf16.msra.mxu0 %v6350_v1  ;;  %4990 = vmatpush3.bf16.msra.mxu1 %v6414_v24 }
 0x363   :  { %4966 = vmatprep.subr.bf16.mxu0 %v6356_v4  ;;  %4991 = vmatprep.subr.bf16.mxu1 %v5961_v40 }
 0x366   :  { %4968 = vmatpush1.bf16.msra.mxu0 %v6382_v13  ;;  %4993 = vmatpush3.bf16.msra.mxu1 %v6432_v30 }
 0x367   :  { %4970 = vmatprep.subr.bf16.mxu0 %v6388_v15  ;;  %4994 = vmatprep.subr.bf16.mxu1 %v5961_v40 }
 0x36a   :  { %4972 = vmatpush1.bf16.msra.mxu0 %v6410_v23  ;;  %4996 = vmatpush3.bf16.msra.mxu1 %v6446_v33 }
 0x36b   :  { %4998 = vmatprep.subr.bf16.mxu0 %v6184_v9  ;;  %5029 = vmatprep.subr.bf16.mxu1 %v5961_v40 }
 0x420   :  { %v1005_v52 = vpop.f32.mrb[6].mxu0  ;;  %v1076_v6 = vpop.f32.mrb[14].mxu1 }
 0x421   :  { %v5714_v7 = vadd.f32 %v6515_v12, %v1005_v52  ;;  %v1007_v44 = vpop.f32.mrb[7].mxu0  ;;  %v4153_v11 = vpop.f32.mrb[15].mxu1  ;;  %v1077_v27 = vadd.f32 %v1076_v6, %v6522_v39 }
 0x422   :  { %v5716_v29 = vadd.f32 %v6517_v16, %v1007_v44 }
 0x423   :  { %v3604_v14 = vmul.f32 -1.442695, %v5714_v7 }
 0x424   :  { %v3605_v42 = vmul.f32 -1.442695, %v5716_v29 }
 0x425   :  { %5830 = vpow2.f32 %v3604_v14 }
 0x426   :  { %5832 = vpow2.f32 %v3605_v42 }
 0x42f   :  { %v5831_v47 = vpop.eup %5830 }
 0x430   :  { %v1084_v60 = vadd.f32 1.0, %v5831_v47  ;;  %v5833_v21 = vpop.eup %5832 }
 0x431   :  { %v1091_v22 = vadd.f32 1.0, %v5833_v21 }
 0x432   :  { %5834 = vrcp.f32 %v1084_v60 }
 0x433   :  { %5836 = vrcp.f32 %v1091_v22 }
 0x43c   :  { %v5835_v28 = vpop.eup %5834 }
 0x43d   :  { %v1094_v31 = vmul.f32 %v5835_v28, %v1077_v27  ;;  %v5837_v36 = vpop.eup %5836 }
 0x43e   :  { %v1097_v37 = vsub.f32 1.0, %v5837_v36  ;;  %v1099_v50 = vmul.f32 %v5837_v36, %v6614_v0 }
 0x43f   :  { %v1095_v32 = vadd.f32 %v1094_v31, %v6492_v49 }
 0x441   :  { %5838 = vtanh.f32 %v1095_v32 }
 0x44b   :  { %v5839_v43 = vpop.eup %5838 }
 0x44c   :  { %v1098_v48 = vmul.f32 %v5839_v43, %v1097_v37 }
 0x44e   :  { %v6658_v53 = vadd.f32 %v1099_v50, %v1098_v48 }
 0x450   :  { %1174 = vmatmul.mubr.f32.vlgmr.msra.gmra.mrb[8].mxu0 %v6658_v53  ;;  %4187 = vmatmul.mubr.f32.vlgmr.msra.gmra.mrb[16].mxu1 %v6658_v53 }
 0x451   :  { %5000 = vmatpush1.bf16.msra.mxu0 %v6204_v17  ;;  %5031 = vmatpush3.bf16.msra.mxu1 %v6273_v41 }
 0x452   :  { %5002 = vmatprep.subr.bf16.mxu0 %v6207_v18  ;;  %5032 = vmatprep.subr.bf16.mxu1 %v5961_v40 }
 0x453   :  { %1343 = vmatprep.mubr.f32.mxu0 %v5960_v3  ;;  %4221 = vmatprep.mubr.msk.f32.mxu1 %vm5962_vm0, %v5960_v3 }
 0x455   :  { %5004 = vmatpush1.bf16.msra.mxu0 %v6227_v25  ;;  %5034 = vmatpush3.bf16.msra.mxu1 %v6304_v51 }
 0x456   :  { %5006 = vmatprep.subr.bf16.mxu0 %v6230_v26  ;;  %5035 = vmatprep.subr.bf16.mxu1 %v5961_v40 }
 0x459   :  { %5008 = vmatpush1.bf16.msra.mxu0 %v6255_v34  ;;  %5037 = vmatpush3.bf16.msra.mxu1 %v6336_v61 }
 0x45a   :  { %5010 = vmatprep.subr.bf16.mxu0 %v6258_v35  ;;  %5038 = vmatprep.subr.bf16.mxu1 %v5961_v40 }
 0x45d   :  { %5012 = vmatpush1.bf16.msra.mxu0 %v6286_v45  ;;  %5040 = vmatpush3.bf16.msra.mxu1 %v6371_v10 }
 0x45e   :  { %5014 = vmatprep.subr.bf16.mxu0 %v6289_v46  ;;  %5041 = vmatprep.subr.bf16.mxu1 %v5961_v40 }
 0x461   :  { %5016 = vmatpush1.bf16.msra.mxu0 %v6318_v55  ;;  %5043 = vmatpush3.bf16.msra.mxu1 %v6397_v20 }
 0x462   :  { %5018 = vmatprep.subr.bf16.mxu0 %v6321_v56  ;;  %5044 = vmatprep.subr.bf16.mxu1 %v5961_v40 }
 0x465   :  { %5020 = vmatpush1.bf16.msra.mxu0 %v6350_v1  ;;  %5046 = vmatpush3.bf16.msra.mxu1 %v6414_v24 }
 0x466   :  { %5022 = vmatprep.subr.bf16.mxu0 %v6356_v4  ;;  %5047 = vmatprep.subr.bf16.mxu1 %v5961_v40 }
 0x469   :  { %5024 = vmatpush1.bf16.msra.mxu0 %v6382_v13  ;;  %5049 = vmatpush3.bf16.msra.mxu1 %v6432_v30 }
 0x46a   :  { %5026 = vmatprep.subr.bf16.mxu0 %v6388_v15  ;;  %5050 = vmatprep.subr.bf16.mxu1 %v5961_v40 }
 0x46d   :  { %5028 = vmatpush1.bf16.msra.mxu0 %v6410_v23  ;;  %5052 = vmatpush3.bf16.msra.mxu1 %v6446_v33 }
 0x46e   :  { %5054 = vmatprep.subr.bf16.mxu0 %v6184_v9  ;;  %5085 = vmatprep.subr.bf16.mxu1 %v5961_v40 }
 0x523   :  { %v1175_v49 = vpop.f32.mrb[8].mxu0  ;;  %v1246_v57 = vpop.f32.mrb[16].mxu1 }
 0x524   :  { %v5718_v62 = vadd.f32 %v6515_v12, %v1175_v49  ;;  %v1177_v52 = vpop.f32.mrb[9].mxu0  ;;  %v4188_v6 = vpop.f32.mrb[17].mxu1  ;;  %v1247_v60 = vadd.f32 %v1246_v57, %v6522_v39 }
 0x525   :  { %v5720_v44 = vadd.f32 %v6517_v16, %v1177_v52 }
 0x526   :  { %v3606_v7 = vmul.f32 -1.442695, %v5718_v62 }
 0x527   :  { %v3607_v11 = vmul.f32 -1.442695, %v5720_v44 }
 0x528   :  { %5840 = vpow2.f32 %v3606_v7 }
 0x529   :  { %5842 = vpow2.f32 %v3607_v11 }
 0x532   :  { %v5841_v14 = vpop.eup %5840 }
 0x533   :  { %v1254_v29 = vadd.f32 1.0, %v5841_v14  ;;  %v5843_v42 = vpop.eup %5842 }
 0x534   :  { %v1261_v47 = vadd.f32 1.0, %v5843_v42 }
 0x535   :  { %5844 = vrcp.f32 %v1254_v29 }
 0x536   :  { %5846 = vrcp.f32 %v1261_v47 }
 0x53f   :  { %v5845_v21 = vpop.eup %5844 }
 0x540   :  { %v1264_v22 = vmul.f32 %v5845_v21, %v1247_v60  ;;  %v5847_v28 = vpop.eup %5846 }
 0x541   :  { %v1267_v31 = vsub.f32 1.0, %v5847_v28  ;;  %v1269_v37 = vmul.f32 %v5847_v28, %v6658_v53 }
 0x542   :  { %v1265_v27 = vadd.f32 %v1264_v22, %v6498_v58 }
 0x544   :  { %5848 = vtanh.f32 %v1265_v27 }
 0x54e   :  { %v5849_v32 = vpop.eup %5848 }
 0x54f   :  { %v1268_v36 = vmul.f32 %v5849_v32, %v1267_v31  ;;  %v1792_v32 = vld [vmem:[%s7625_s6] sm:$0xff] }
 0x551   :  { %v6702_v43 = vadd.f32 %v1269_v37, %v1268_v36  ;;  %v1795_v36 = vld [vmem:[%s7625_s6 + $0x18] sm:$0xff] }
 0x553   :  { %1344 = vmatmul.mubr.f32.vlgmr.msra.gmra.mrb[10].mxu0 %v6702_v43  ;;  %4222 = vmatmul.mubr.f32.vlgmr.msra.gmra.mrb[18].mxu1 %v6702_v43 }
 0x554   :  { %5056 = vmatpush1.bf16.msra.mxu0 %v6204_v17  ;;  %5087 = vmatpush3.bf16.msra.mxu1 %v6273_v41 }
 0x555   :  { %5058 = vmatprep.subr.bf16.mxu0 %v6207_v18  ;;  %5088 = vmatprep.subr.bf16.mxu1 %v5961_v40 }
 0x556   :  { %1513 = vmatprep.mubr.f32.mxu0 %v5960_v3  ;;  %4256 = vmatprep.mubr.msk.f32.mxu1 %vm5962_vm0, %v5960_v3 }
 0x558   :  { %5060 = vmatpush1.bf16.msra.mxu0 %v6227_v25  ;;  %5090 = vmatpush3.bf16.msra.mxu1 %v6304_v51 }
 0x559   :  { %5062 = vmatprep.subr.bf16.mxu0 %v6230_v26  ;;  %5091 = vmatprep.subr.bf16.mxu1 %v5961_v40 }
 0x55c   :  { %5064 = vmatpush1.bf16.msra.mxu0 %v6255_v34  ;;  %5093 = vmatpush3.bf16.msra.mxu1 %v6336_v61 }
 0x55d   :  { %5066 = vmatprep.subr.bf16.mxu0 %v6258_v35  ;;  %5094 = vmatprep.subr.bf16.mxu1 %v5961_v40 }
 0x560   :  { %5068 = vmatpush1.bf16.msra.mxu0 %v6286_v45  ;;  %5096 = vmatpush3.bf16.msra.mxu1 %v6371_v10 }
 0x561   :  { %5070 = vmatprep.subr.bf16.mxu0 %v6289_v46  ;;  %5097 = vmatprep.subr.bf16.mxu1 %v5961_v40 }
 0x564   :  { %5072 = vmatpush1.bf16.msra.mxu0 %v6318_v55  ;;  %5099 = vmatpush3.bf16.msra.mxu1 %v6397_v20 }
 0x565   :  { %5074 = vmatprep.subr.bf16.mxu0 %v6321_v56  ;;  %5100 = vmatprep.subr.bf16.mxu1 %v5961_v40 }
 0x568   :  { %5076 = vmatpush1.bf16.msra.mxu0 %v6350_v1  ;;  %5102 = vmatpush3.bf16.msra.mxu1 %v6414_v24 }
 0x569   :  { %5078 = vmatprep.subr.bf16.mxu0 %v6356_v4  ;;  %5103 = vmatprep.subr.bf16.mxu1 %v5961_v40 }
 0x56c   :  { %5080 = vmatpush1.bf16.msra.mxu0 %v6382_v13  ;;  %5105 = vmatpush3.bf16.msra.mxu1 %v6432_v30 }
 0x56d   :  { %5082 = vmatprep.subr.bf16.mxu0 %v6388_v15  ;;  %5106 = vmatprep.subr.bf16.mxu1 %v5961_v40 }
 0x570   :  { %5084 = vmatpush1.bf16.msra.mxu0 %v6410_v23  ;;  %5108 = vmatpush3.bf16.msra.mxu1 %v6446_v33 }
 0x571   :  { %5110 = vmatprep.subr.bf16.mxu0 %v6184_v9  ;;  %5141 = vmatprep.subr.bf16.mxu1 %v5961_v40 }
 0x626   :  { %v1345_v58 = vpop.f32.mrb[10].mxu0  ;;  %v1416_v48 = vpop.f32.mrb[18].mxu1 }
 0x627   :  { %v5722_v50 = vadd.f32 %v6515_v12, %v1345_v58  ;;  %v1347_v49 = vpop.f32.mrb[11].mxu0  ;;  %v4223_v57 = vpop.f32.mrb[19].mxu1  ;;  %v1417_v9 = vadd.f32 %v1416_v48, %v6522_v39  ;;  %v1799_v58 = vld [vmem:[%s7625_s6 + $0x38] sm:$0xff] }
 0x628   :  { %v5724_v52 = vadd.f32 %v6517_v16, %v1347_v49  ;;  %v1800_v49 = vld [vmem:[%s7625_s6 + $0x40] sm:$0xff]  ;;  %v1803_v57 = vld [vmem:[%s7625_s6 + $0x58] sm:$0xff] }
 0x629   :  { %v3608_v62 = vmul.f32 -1.442695, %v5722_v50 }
 0x62a   :  { %v3609_v6 = vmul.f32 -1.442695, %v5724_v52 }
 0x62b   :  { %5850 = vpow2.f32 %v3608_v62  ;;  %v5167_v62 = vpack.c.bf16 %v1795_v36, %v1792_v32  ;;  %v1822_v32 = vld [vmem:[%s7625_s6 + $0xf0] sm:$0xff]  ;;  %v1825_v36 = vld [vmem:[%s7625_s6 + $0x108] sm:$0xff] }
 0x62c   :  { %5852 = vpow2.f32 %v3609_v6 }
 0x635   :  { %v5851_v7 = vpop.eup %5850 }
 0x636   :  { %v1424_v44 = vadd.f32 1.0, %v5851_v7  ;;  %v5853_v11 = vpop.eup %5852  ;;  %v1798_v7 = vld [vmem:[%s7625_s6 + $0x30] sm:$0xff] }
 0x637   :  { %v1431_v14 = vadd.f32 1.0, %v5853_v11  ;;  %v1805_v11 = vld [vmem:[%s7625_s6 + $0x68] sm:$0xff] }
 0x638   :  { %5854 = vrcp.f32 %v1424_v44  ;;  %v1801_v44 = vld [vmem:[%s7625_s6 + $0x48] sm:$0xff] }
 0x639   :  { %5856 = vrcp.f32 %v1431_v14  ;;  %v5201_v14 = vpack.c.bf16 %v1803_v57, %v1800_v49 }
 0x642   :  { %v5855_v29 = vpop.eup %5854 }
 0x643   :  { %v1434_v42 = vmul.f32 %v5855_v29, %v1417_v9  ;;  %v5857_v60 = vpop.eup %5856  ;;  %v1808_v9 = vld [vmem:[%s7625_s6 + $0x80] sm:$0xff]  ;;  %v1806_v29 = vld [vmem:[%s7625_s6 + $0x70] sm:$0xff] }
 0x644   :  { %v1437_v21 = vsub.f32 1.0, %v5857_v60  ;;  %v1439_v28 = vmul.f32 %v5857_v60, %v6702_v43  ;;  %v5173_v60 = vpack.c.bf16 %v1808_v9, %v1805_v11  ;;  %v1836_v11 = vld [vmem:[%s7625_s6 + $0x160] sm:$0xff] }
 0x645   :  { %v1435_v47 = vadd.f32 %v1434_v42, %v6496_v54  ;;  %v1809_v42 = vld [vmem:[%s7625_s6 + $0x88] sm:$0xff] }
 0x647   :  { %5858 = vtanh.f32 %v1435_v47  ;;  %v5171_v47 = vpack.c.bf16 %v1801_v44, %v1798_v7  ;;  %v1835_v7 = vld [vmem:[%s7625_s6 + $0x158] sm:$0xff]  ;;  %v1838_v44 = vld [vmem:[%s7625_s6 + $0x170] sm:$0xff] }
 0x651   :  { %v5859_v22 = vpop.eup %5858 }
 0x652   :  { %v1438_v27 = vmul.f32 %v5859_v22, %v1437_v21  ;;  %v5205_v21 = vpack.c.bf16 %v1809_v42, %v1806_v29  ;;  %v1804_v22 = vld [vmem:[%s7625_s6 + $0x60] sm:$0xff]  ;;  %v5193_v29 = vpack.c.bf16 %v1838_v44, %v1835_v7  ;;  %v2142_v44 = vld [vmem:[%s7626_s7 + $0x158] sm:$0xff] }
 0x654   :  { %v6746_v31 = vadd.f32 %v1439_v28, %v1438_v27  ;;  %v1807_v27 = vld [vmem:[%s7625_s6 + $0x78] sm:$0xff] }
 0x655   :  { %v1811_v28 = vld [vmem:[%s7625_s6 + $0x98] sm:$0xff] }
 0x656   :  { %1514 = vmatmul.mubr.f32.vlgmr.msra.gmra.mrb[12].mxu0 %v6746_v31  ;;  %4257 = vmatmul.mubr.f32.vlgmr.msra.gmra.mrb[20].mxu1 %v6746_v31 }
 0x657   :  { %5112 = vmatpush1.bf16.msra.mxu0 %v6204_v17  ;;  %5143 = vmatpush3.bf16.msra.mxu1 %v6273_v41  ;;  %v1793_v17 = vld [vmem:[%s7625_s6 + $0x8] sm:$0xff] }
 0x658   :  { %5114 = vmatprep.subr.bf16.mxu0 %v6207_v18  ;;  %5144 = vmatprep.subr.bf16.mxu1 %v5961_v40  ;;  %v1796_v18 = vld [vmem:[%s7625_s6 + $0x20] sm:$0xff] }
 0x659   :  { %1683 = vmatprep.mubr.f32.mxu0 %v5960_v3  ;;  %4291 = vmatprep.mubr.msk.f32.mxu1 %vm5962_vm0, %v5960_v3 }
 0x65b   :  { %5116 = vmatpush1.bf16.msra.mxu0 %v6227_v25  ;;  %5146 = vmatpush3.bf16.msra.mxu1 %v6304_v51  ;;  %v1794_v25 = vld [vmem:[%s7625_s6 + $0x10] sm:$0xff] }
 0x65c   :  { %5118 = vmatprep.subr.bf16.mxu0 %v6230_v26  ;;  %5147 = vmatprep.subr.bf16.mxu1 %v5961_v40  ;;  %v5165_v26 = vpack.c.bf16 %v1796_v18, %v1793_v17  ;;  %v1814_v17 = vld [vmem:[%s7625_s6 + $0xb0] sm:$0xff]  ;;  %v1812_v18 = vld [vmem:[%s7625_s6 + $0xa0] sm:$0xff] }
 0x65f   :  { %5120 = vmatpush1.bf16.msra.mxu0 %v6255_v34  ;;  %5149 = vmatpush3.bf16.msra.mxu1 %v6336_v61  ;;  %v1797_v34 = vld [vmem:[%s7625_s6 + $0x28] sm:$0xff] }
 0x660   :  { %5122 = vmatprep.subr.bf16.mxu0 %v6258_v35  ;;  %5150 = vmatprep.subr.bf16.mxu1 %v5961_v40  ;;  %v5197_v35 = vpack.c.bf16 %v1797_v34, %v1794_v25  ;;  %v1815_v25 = vld [vmem:[%s7625_s6 + $0xb8] sm:$0xff]  ;;  %v5177_v34 = vpack.c.bf16 %v1814_v17, %v1811_v28  ;;  %v2105_v17 = vld [vmem:[%s7626_s7 + $0x30] sm:$0xff] }
 0x663   :  { %5124 = vmatpush1.bf16.msra.mxu0 %v6286_v45  ;;  %5152 = vmatpush3.bf16.msra.mxu1 %v6371_v10 }
 0x664   :  { %5126 = vmatprep.subr.bf16.mxu0 %v6289_v46  ;;  %5153 = vmatprep.subr.bf16.mxu1 %v5961_v40 }
 0x667   :  { %5128 = vmatpush1.bf16.msra.mxu0 %v6318_v55  ;;  %5155 = vmatpush3.bf16.msra.mxu1 %v6397_v20 }
 0x668   :  { %5130 = vmatprep.subr.bf16.mxu0 %v6321_v56  ;;  %5156 = vmatprep.subr.bf16.mxu1 %v5961_v40 }
 0x66b   :  { %5132 = vmatpush1.bf16.msra.mxu0 %v6350_v1  ;;  %5158 = vmatpush3.bf16.msra.mxu1 %v6414_v24 }
 0x66c   :  { %5134 = vmatprep.subr.bf16.mxu0 %v6356_v4  ;;  %5159 = vmatprep.subr.bf16.mxu1 %v5961_v40 }
 0x66f   :  { %5136 = vmatpush1.bf16.msra.mxu0 %v6382_v13  ;;  %5161 = vmatpush3.bf16.msra.mxu1 %v6432_v30 }
 0x670   :  { %5138 = vmatprep.subr.bf16.mxu0 %v6388_v15  ;;  %5162 = vmatprep.subr.bf16.mxu1 %v5961_v40 }
 0x673   :  { %5140 = vmatpush1.bf16.msra.mxu0 %v6410_v23  ;;  %5164 = vmatpush3.bf16.msra.mxu1 %v6446_v33 }
 0x674   :  { %5166 = vmatprep.subr.bf16.mxu0 %v5165_v26  ;;  %5198 = vmatprep.subr.bf16.mxu1 %v5197_v35  ;;  %v5175_v26 = vpack.c.bf16 %v1807_v27, %v1804_v22  ;;  %v2106_v22 = vld [vmem:[%s7626_s7 + $0x38] sm:$0xff]  ;;  %v2109_v27 = vld [vmem:[%s7626_s7 + $0x50] sm:$0xff] }
 0x675   :  { %v6983_v28 = vpack.c.bf16 %v2109_v27, %v2106_v22  ;;  %v2122_v22 = vld [vmem:[%s7626_s7 + $0xb8] sm:$0xff] }
 0x729   :  { %v1515_v41 = vpop.f32.mrb[12].mxu0  ;;  %v1586_v45 = vpop.f32.mrb[20].mxu1 }
 0x72a   :  { %v5726_v46 = vadd.f32 %v6515_v12, %v1515_v41  ;;  %v1517_v51 = vpop.f32.mrb[13].mxu0  ;;  %v4258_v55 = vpop.f32.mrb[21].mxu1  ;;  %v1587_v20 = vadd.f32 %v1586_v45, %v6522_v39  ;;  %v1810_v41 = vld [vmem:[%s7625_s6 + $0x90] sm:$0xff]  ;;  %v1813_v45 = vld [vmem:[%s7625_s6 + $0xa8] sm:$0xff] }
 0x72b   :  { %v5728_v61 = vadd.f32 %v6517_v16, %v1517_v51  ;;  %v1820_v51 = vld [vmem:[%s7625_s6 + $0xe0] sm:$0xff]  ;;  %v1818_v55 = vld [vmem:[%s7625_s6 + $0xd0] sm:$0xff] }
 0x72c   :  { %v3610_v56 = vmul.f32 -1.442695, %v5726_v46  ;;  %v1817_v46 = vld [vmem:[%s7625_s6 + $0xc8] sm:$0xff] }
 0x72d   :  { %v3611_v1 = vmul.f32 -1.442695, %v5728_v61  ;;  %v5179_v61 = vpack.c.bf16 %v1813_v45, %v1810_v41  ;;  %v2111_v41 = vld [vmem:[%s7626_s7 + $0x60] sm:$0xff]  ;;  %v2114_v45 = vld [vmem:[%s7626_s7 + $0x78] sm:$0xff] }
 0x72e   :  { %5860 = vpow2.f32 %v3610_v56  ;;  %v1821_v56 = vld [vmem:[%s7625_s6 + $0xe8] sm:$0xff] }
 0x72f   :  { %5862 = vpow2.f32 %v3611_v1  ;;  %v5181_v1 = vpack.c.bf16 %v1820_v51, %v1817_v46  ;;  %v7009_v46 = vpack.c.bf16 %v2114_v45, %v2111_v41  ;;  %v2118_v51 = vld [vmem:[%s7626_s7 + $0x98] sm:$0xff] }
 0x730   :  { %v2134_v41 = vld [vmem:[%s7626_s7 + $0x118] sm:$0xff] }
 0x738   :  { %v5861_v4 = vpop.eup %5860 }
 0x739   :  { %v1594_v10 = vadd.f32 1.0, %v5861_v4  ;;  %v5863_v13 = vpop.eup %5862  ;;  %v5213_v4 = vpack.c.bf16 %v1821_v56, %v1818_v55  ;;  %v2121_v55 = vld [vmem:[%s7626_s7 + $0xb0] sm:$0xff] }
 0x73a   :  { %v1601_v15 = vadd.f32 1.0, %v5863_v13  ;;  %v1819_v13 = vld [vmem:[%s7625_s6 + $0xd8] sm:$0xff]  ;;  %v7019_v56 = vpack.c.bf16 %v2121_v55, %v2118_v51  ;;  %v2137_v51 = vld [vmem:[%s7626_s7 + $0x130] sm:$0xff]  ;;  %v2140_v55 = vld [vmem:[%s7626_s7 + $0x148] sm:$0xff] }
 0x73b   :  { %5864 = vrcp.f32 %v1594_v10  ;;  %v1816_v10 = vld [vmem:[%s7625_s6 + $0xc0] sm:$0xff] }
 0x73c   :  { %5866 = vrcp.f32 %v1601_v15  ;;  %v1823_v15 = vld [vmem:[%s7625_s6 + $0xf8] sm:$0xff] }
 0x745   :  { %v5865_v23 = vpop.eup %5864 }
 0x746   :  { %v1604_v24 = vmul.f32 %v5865_v23, %v1587_v20  ;;  %v5867_v33 = vpop.eup %5866  ;;  %v1826_v20 = vld [vmem:[%s7625_s6 + $0x110] sm:$0xff]  ;;  %v1824_v23 = vld [vmem:[%s7625_s6 + $0x100] sm:$0xff] }
 0x747   :  { %v1607_v54 = vsub.f32 1.0, %v5867_v33  ;;  %v1609_v50 = vmul.f32 %v5867_v33, %v6746_v31  ;;  %v5185_v33 = vpack.c.bf16 %v1826_v20, %v1823_v15  ;;  %v2123_v20 = vld [vmem:[%s7626_s7 + $0xc0] sm:$0xff] }
 0x748   :  { %v1605_v30 = vadd.f32 %v1604_v24, %v6509_v5  ;;  %v1802_v5 = vld [vmem:[%s7625_s6 + $0x50] sm:$0xff]  ;;  %v1827_v24 = vld [vmem:[%s7625_s6 + $0x118] sm:$0xff] }
 0x749   :  { %v5169_v6 = vpack.c.bf16 %v1802_v5, %v1799_v58  ;;  %v1832_v58 = vld [vmem:[%s7625_s6 + $0x140] sm:$0xff]  ;;  %v1830_v5 = vld [vmem:[%s7625_s6 + $0x130] sm:$0xff] }
 0x74a   :  { %5868 = vtanh.f32 %v1605_v30  ;;  %v5183_v30 = vpack.c.bf16 %v1819_v13, %v1816_v10  ;;  %v2124_v10 = vld [vmem:[%s7626_s7 + $0xc8] sm:$0xff]  ;;  %v2127_v13 = vld [vmem:[%s7626_s7 + $0xe0] sm:$0xff] }
 0x74b   :  { %v7037_v15 = vpack.c.bf16 %v2127_v13, %v2124_v10  ;;  %v2146_v10 = vld [vmem:[%s7626_s7 + $0x178] sm:$0xff] }
 0x754   :  { %v5869_v37 = vpop.eup %5868 }
 0x755   :  { %v1608_v48 = vmul.f32 %v5869_v37, %v1607_v54  ;;  %v5217_v54 = vpack.c.bf16 %v1827_v24, %v1824_v23  ;;  %v1829_v37 = vld [vmem:[%s7625_s6 + $0x128] sm:$0xff]  ;;  %v2126_v23 = vld [vmem:[%s7626_s7 + $0xd8] sm:$0xff] }
 0x756   :  { %v5189_v49 = vpack.c.bf16 %v1832_v58, %v1829_v37  ;;  %v7045_v24 = vpack.c.bf16 %v2126_v23, %v2123_v20  ;;  %v2136_v58 = vld [vmem:[%s7626_s7 + $0x128] sm:$0xff] }
 0x757   :  { %v6818_v52 = vadd.f32 %v1609_v50, %v1608_v48  ;;  %v1833_v48 = vld [vmem:[%s7625_s6 + $0x148] sm:$0xff]  ;;  %v5187_v50 = vpack.c.bf16 %v1825_v36, %v1822_v32  ;;  %v2129_v32 = vld [vmem:[%s7626_s7 + $0xf0] sm:$0xff] }
 0x758   :  { %v5221_v57 = vpack.c.bf16 %v1833_v48, %v1830_v5  ;;  %v2132_v36 = vld [vmem:[%s7626_s7 + $0x108] sm:$0xff]  ;;  %v2139_v5 = vld [vmem:[%s7626_s7 + $0x140] sm:$0xff] }
 0x759   :  { %1684 = vmatmul.mubr.f32.vlgmr.msra.gmra.mrb[14].mxu0 %v6818_v52  ;;  %4292 = vmatmul.mubr.f32.vlgmr.msra.gmra.mrb[22].mxu1 %v6818_v52  ;;  %v7063_v37 = vpack.c.bf16 %v2132_v36, %v2129_v32  ;;  %v2135_v48 = vld [vmem:[%s7626_s7 + $0x120] sm:$0xff] }
 0x75a   :  { %5168 = vmatpush1.bf16.msra.mxu0 %v5167_v62  ;;  %5200 = vmatpush3.bf16.msra.mxu1 %v5197_v35  ;;  %v5209_v35 = vpack.c.bf16 %v1815_v25, %v1812_v18  ;;  %v1828_v62 = vld [vmem:[%s7625_s6 + $0x120] sm:$0xff]  ;;  %v2108_v18 = vld [vmem:[%s7626_s7 + $0x48] sm:$0xff] }
 0x75b   :  { %4326 = vmatprep.mubr.f32.mxu1 %v6526_v19  ;;  %5170 = vmatprep.subr.bf16.mxu0 %v5169_v6  ;;  %v1831_v6 = vld [vmem:[%s7625_s6 + $0x138] sm:$0xff]  ;;  %v6991_v25 = vpack.c.bf16 %v2108_v18, %v2105_v17  ;;  %v2125_v17 = vld [vmem:[%s7626_s7 + $0xd0] sm:$0xff]  ;;  %v2128_v18 = vld [vmem:[%s7626_s7 + $0xe8] sm:$0xff] }
 0x75c   :  { %5202 = vmatprep.subr.bf16.mxu1 %v5201_v14  ;;  %1921 = vmatprep.mubr.f32.mxu0 %v5960_v3  ;;  %v5191_v9 = vpack.c.bf16 %v1831_v6, %v1828_v62  ;;  %v2104_v62 = vld [vmem:[%s7626_s7 + $0x28] sm:$0xff] }
 0x75e   :  { %5172 = vmatpush1.bf16.msra.mxu0 %v5171_v47  ;;  %5204 = vmatpush3.bf16.msra.mxu1 %v5201_v14  ;;  %v1839_v14 = vld [vmem:[%s7625_s6 + $0x178] sm:$0xff]  ;;  %v1834_v47 = vld [vmem:[%s7625_s6 + $0x150] sm:$0xff] }
 0x75f   :  { %5174 = vmatprep.subr.bf16.mxu0 %v5173_v60  ;;  %5206 = vmatprep.subr.bf16.mxu1 %v5205_v21  ;;  %v5225_v42 = vpack.c.bf16 %v1839_v14, %v1836_v11  ;;  %v1837_v60 = vld [vmem:[%s7625_s6 + $0x168] sm:$0xff]  ;;  %v2145_v11 = vld [vmem:[%s7626_s7 + $0x170] sm:$0xff] }
 0x760   :  { %v7100_v14 = vpack.c.bf16 %v2145_v11, %v2142_v44 }
 0x762   :  { %5176 = vmatpush1.bf16.msra.mxu0 %v5175_v26  ;;  %5208 = vmatpush3.bf16.msra.mxu1 %v5205_v21  ;;  %v5195_v21 = vpack.c.bf16 %v1837_v60, %v1834_v47  ;;  %v2112_v26 = vld [vmem:[%s7626_s7 + $0x68] sm:$0xff]  ;;  %v2107_v47 = vld [vmem:[%s7626_s7 + $0x40] sm:$0xff]  ;;  %v2110_v60 = vld [vmem:[%s7626_s7 + $0x58] sm:$0xff] }
 0x763   :  { %5178 = vmatprep.subr.bf16.mxu0 %v5177_v34  ;;  %5210 = vmatprep.subr.bf16.mxu1 %v5209_v35  ;;  %v2115_v34 = vld [vmem:[%s7626_s7 + $0x80] sm:$0xff] }
 0x766   :  { %5180 = vmatpush1.bf16.msra.mxu0 %v5179_v61  ;;  %5212 = vmatpush3.bf16.msra.mxu1 %v5209_v35  ;;  %v7001_v35 = vpack.c.bf16 %v2115_v34, %v2112_v26  ;;  %v2117_v61 = vld [vmem:[%s7626_s7 + $0x90] sm:$0xff]  ;;  %v7149_v26 = vpack.c.bf16 %v2128_v18, %v2125_v17  ;;  %v2131_v34 = vld [vmem:[%s7626_s7 + $0x100] sm:$0xff] }
 0x767   :  { %5182 = vmatprep.subr.bf16.mxu0 %v5181_v1  ;;  %5214 = vmatprep.subr.bf16.mxu1 %v5213_v4  ;;  %v2120_v1 = vld [vmem:[%s7626_s7 + $0xa8] sm:$0xff]  ;;  %v7159_v45 = vpack.c.bf16 %v2134_v41, %v2131_v34  ;;  %v1840_v41 = vld [vmem:[%s7629_s8] sm:$0x7] }
 0x768   :  { %v7208_v34 = vld [vmem:[%s7622_s1 + $0x8] sm:$0xff] }
 0x76a   :  { %5184 = vmatpush1.bf16.msra.mxu0 %v5183_v30  ;;  %5216 = vmatpush3.bf16.msra.mxu1 %v5213_v4  ;;  %v7027_v4 = vpack.c.bf16 %v2120_v1, %v2117_v61  ;;  %v2130_v30 = vld [vmem:[%s7626_s7 + $0xf8] sm:$0xff]  ;;  %v7169_v61 = vpack.c.bf16 %v2140_v55, %v2137_v51  ;;  %v2143_v1 = vld [vmem:[%s7626_s7 + $0x160] sm:$0xff]  ;;  %v1845_v51 = vrot.slane %v1840_v41, %v6500_v59 }
 0x76b   :  { %5186 = vmatprep.subr.bf16.mxu0 %v5185_v33  ;;  %5218 = vmatprep.subr.bf16.mxu1 %v5217_v54  ;;  %v2133_v33 = vld [vmem:[%s7626_s7 + $0x110] sm:$0xff]  ;;  %v7179_v13 = vpack.c.bf16 %v2146_v10, %v2143_v1  ;;  %v1849_v10 = vrot.slane %v1840_v41, %v6507_v2 }
 0x76e   :  { %5188 = vmatpush1.bf16.msra.mxu0 %v5187_v50  ;;  %5220 = vmatpush3.bf16.msra.mxu1 %v5217_v54  ;;  %v7055_v54 = vpack.c.bf16 %v2133_v33, %v2130_v30  ;;  %v7076_v50 = vpack.c.bf16 %v2139_v5, %v2136_v58 }
 0x76f   :  { %5190 = vmatprep.subr.bf16.mxu0 %v5189_v49  ;;  %5222 = vmatprep.subr.bf16.mxu1 %v5221_v57  ;;  %v2138_v49 = vld [vmem:[%s7626_s7 + $0x138] sm:$0xff] }
 0x770   :  { %v7087_v6 = vpack.c.bf16 %v2138_v49, %v2135_v48 }
 0x772   :  { %5192 = vmatpush1.bf16.msra.mxu0 %v5191_v9  ;;  %5224 = vmatpush3.bf16.msra.mxu1 %v5221_v57  ;;  %v2101_v57 = vld [vmem:[%s7626_s7 + $0x10] sm:$0xff] }
 0x773   :  { %5194 = vmatprep.subr.bf16.mxu0 %v5193_v29  ;;  %5226 = vmatprep.subr.bf16.mxu1 %v5225_v42  ;;  %v7089_v7 = vpack.c.bf16 %v2104_v62, %v2101_v57  ;;  %v2141_v9 = vld [vmem:[%s7626_s7 + $0x150] sm:$0xff]  ;;  %v2144_v29 = vld [vmem:[%s7626_s7 + $0x168] sm:$0xff] }
 0x776   :  { %5196 = vmatpush1.bf16.msra.mxu0 %v5195_v21  ;;  %5228 = vmatpush3.bf16.msra.mxu1 %v5225_v42  ;;  %v7109_v42 = vpack.c.bf16 %v2144_v29, %v2141_v9  ;;  %v7118_v21 = vpack.c.bf16 %v2110_v60, %v2107_v47 }
 0x777   :  { %5261 = vmatprep.subr.bf16.mxu1 %v5961_v40 }
 0x779   :  { %1922 = vmatmul.mubr.f32.vlgmr.msra.gmra.mrb[16].mxu0 %v6526_v19  ;;  %4327 = vmatmul.mubr.f32.vlgmr.msra.gmra.mrb[24].mxu1 %v6570_v8  ;;  %v2100_v19 = vld [vmem:[%s7626_s7 + $0x8] sm:$0xff] }
 0x77a   :  { %4329 = vmatprep.mubr.f32.mxu1 %v6614_v0  ;;  %1927 = vmatprep.mubr.f32.mxu0 %v5960_v3 }
 0x77b   :  { %5263 = vmatpush3.bf16.msra.mxu1 %v7089_v7 }
 0x77c   :  { %5264 = vmatprep.subr.bf16.mxu1 %v5961_v40 }
 0x77d   :  { %1928 = vmatmul.mubr.f32.gmra.mrb[18].mxu0 %v6570_v8  ;;  %4330 = vmatmul.mubr.f32.gmra.mrb[26].mxu1 %v6658_v53  ;;  %v2103_v8 = vld [vmem:[%s7626_s7 + $0x20] sm:$0xff] }
 0x77e   :  { %4332 = vmatprep.mubr.f32.mxu1 %v6702_v43  ;;  %1933 = vmatprep.mubr.f32.mxu0 %v5960_v3 }
 0x77f   :  { %5266 = vmatpush3.bf16.msra.mxu1 %v7118_v21 }
 0x780   :  { %5267 = vmatprep.subr.bf16.mxu1 %v5961_v40 }
 0x781   :  { %1934 = vmatmul.mubr.f32.gmra.mrb[20].mxu0 %v6614_v0  ;;  %4333 = vmatmul.mubr.f32.gmra.mrb[28].mxu1 %v6746_v31  ;;  %v6965_v0 = vpack.c.bf16 %v2103_v8, %v2100_v19  ;;  %v2113_v19 = vld [vmem:[%s7626_s7 + $0x70] sm:$0xff]  ;;  %v2116_v8 = vld [vmem:[%s7626_s7 + $0x88] sm:$0xff] }
 0x782   :  { %4335 = vmatprep.mubr.f32.mxu1 %v6818_v52  ;;  %1939 = vmatprep.mubr.f32.mxu0 %v5960_v3 }
 0x783   :  { %5230 = vmatprep.subr.bf16.mxu0 %v6965_v0 }
 0x785   :  { %1940 = vmatmul.mubr.f32.gmra.mrb[22].mxu0 %v6658_v53  ;;  %v2099_v53 = vld [vmem:[%s7626_s7] sm:$0xff] }
 0x786   :  { %1945 = vmatprep.mubr.f32.mxu0 %v5960_v3 }
 0x789   :  { %1946 = vmatmul.mubr.f32.gmra.mrb[24].mxu0 %v6702_v43  ;;  %v2102_v43 = vld [vmem:[%s7626_s7 + $0x18] sm:$0xff] }
 0x78a   :  { %1951 = vmatprep.mubr.f32.mxu0 %v5960_v3 }
 0x78d   :  { %1952 = vmatmul.mubr.f32.gmra.mrb[26].mxu0 %v6746_v31  ;;  %v6973_v31 = vpack.c.bf16 %v2102_v43, %v2099_v53  ;;  %v2119_v53 = vld [vmem:[%s7626_s7 + $0xa0] sm:$0xff]  ;;  %v7133_v43 = vpack.c.bf16 %v2116_v8, %v2113_v19 }
 0x78e   :  { %1957 = vmatprep.mubr.f32.mxu0 %v5960_v3  ;;  %v7139_v27 = vpack.c.bf16 %v2122_v22, %v2119_v53 }
 0x78f   :  { %5232 = vmatpush1.bf16.msra.mxu0 %v6973_v31  ;;  %5269 = vmatpush3.bf16.msra.mxu1 %v7133_v43 }
 0x790   :  { %5234 = vmatprep.subr.bf16.mxu0 %v6983_v28  ;;  %5270 = vmatprep.subr.bf16.mxu1 %v5961_v40 }
 0x791   :  { %1958 = vmatmul.mubr.f32.gmra.mrb[28].mxu0 %v6818_v52 }
 0x792   :  { %1963 = vmatprep.mubr.f32.mxu0 %v5960_v3 }
 0x793   :  { %5236 = vmatpush1.bf16.msra.mxu0 %v6991_v25  ;;  %5272 = vmatpush3.bf16.msra.mxu1 %v7139_v27 }
 0x794   :  { %5238 = vmatprep.subr.bf16.mxu0 %v7001_v35  ;;  %5273 = vmatprep.subr.bf16.mxu1 %v5961_v40 }
 0x797   :  { %5240 = vmatpush1.bf16.msra.mxu0 %v7009_v46  ;;  %5275 = vmatpush3.bf16.msra.mxu1 %v7149_v26 }
 0x798   :  { %5242 = vmatprep.subr.bf16.mxu0 %v7019_v56  ;;  %5276 = vmatprep.subr.bf16.mxu1 %v5961_v40 }
 0x79b   :  { %5244 = vmatpush1.bf16.msra.mxu0 %v7027_v4  ;;  %5278 = vmatpush3.bf16.msra.mxu1 %v7159_v45 }
 0x79c   :  { %5246 = vmatprep.subr.bf16.mxu0 %v7037_v15  ;;  %5279 = vmatprep.subr.bf16.mxu1 %v5961_v40 }
 0x79f   :  { %5248 = vmatpush1.bf16.msra.mxu0 %v7045_v24  ;;  %5281 = vmatpush3.bf16.msra.mxu1 %v7169_v61 }
 0x7a0   :  { %5250 = vmatprep.subr.bf16.mxu0 %v7055_v54  ;;  %5282 = vmatprep.subr.bf16.mxu1 %v5961_v40 }
 0x7a3   :  { %5252 = vmatpush1.bf16.msra.mxu0 %v7063_v37  ;;  %5284 = vmatpush3.bf16.msra.mxu1 %v7179_v13 }
 0x7a4   :  { %5254 = vmatprep.subr.bf16.mxu0 %v7076_v50  ;;  %5317 = vmatprep.subr.bf16.mxu1 %v5961_v40 }
 0x7a7   :  { %5256 = vmatpush1.bf16.msra.mxu0 %v7087_v6 }
 0x7a8   :  { %5258 = vmatprep.subr.bf16.mxu0 %v7100_v14 }
 0x7ab   :  { %5260 = vmatpush1.bf16.msra.mxu0 %v7109_v42 }
 0x7ac   :  { %5286 = vmatprep.subr.bf16.mxu0 %v6965_v0 }
 0x82c   :  { %v1685_v20 = vpop.f32.mrb[14].mxu0  ;;  %v1756_v23 = vpop.f32.mrb[22].mxu1 }
 0x82d   :  { %v5730_v30 = vadd.f32 %v6515_v12, %v1685_v20  ;;  %v1687_v33 = vpop.f32.mrb[15].mxu0  ;;  %v4293_v32 = vpop.f32.mrb[23].mxu1  ;;  %v1757_v44 = vadd.f32 %v1756_v23, %v6522_v39 }
 0x82e   :  { %v5732_v58 = vadd.f32 %v6517_v16, %v1687_v33 }
 0x82f   :  { %v3612_v36 = vmul.f32 -1.442695, %v5730_v30 }
 0x830   :  { %v3613_v5 = vmul.f32 -1.442695, %v5732_v58 }
 0x831   :  { %5870 = vpow2.f32 %v3612_v36 }
 0x832   :  { %5872 = vpow2.f32 %v3613_v5 }
 0x83b   :  { %v5871_v48 = vpop.eup %5870 }
 0x83c   :  { %v1764_v49 = vadd.f32 1.0, %v5871_v48  ;;  %v5873_v57 = vpop.eup %5872 }
 0x83d   :  { %v1771_v62 = vadd.f32 1.0, %v5873_v57 }
 0x83e   :  { %5874 = vrcp.f32 %v1764_v49 }
 0x83f   :  { %5876 = vrcp.f32 %v1771_v62 }
 0x848   :  { %v5875_v11 = vpop.eup %5874 }
 0x849   :  { %v1774_v9 = vmul.f32 %v5875_v11, %v1757_v44  ;;  %v5877_v19 = vpop.eup %5876 }
 0x84a   :  { %v1777_v39 = vsub.f32 1.0, %v5877_v19  ;;  %v1779_v18 = vmul.f32 %v5877_v19, %v6818_v52  ;;  %v2147_v52 = vld [vmem:[%s7628_s9] sm:$0x7] }
 0x84b   :  { %v1775_v12 = vadd.f32 %v1774_v9, %v6505_v63  ;;  %v2157_v55 = vrot.slane %v2147_v52, %v6500_v59  ;;  %v2161_v20 = vrot.slane %v2147_v52, %v6507_v2  ;;  %v7270_v44 = vrot.slane %v2147_v52, %v6484_v38 }
 0x84c   :  { %v7188_v29 = vpop.f32.mrb[24].mxu1  ;;  %v7273_v9 = vrot.slane %v1840_v41, %v6484_v38 }
 0x84d   :  { %5878 = vtanh.f32 %v1775_v12  ;;  %v7190_v47 = vpop.f32.mrb[25].mxu1  ;;  %v7263_v30 = vadd.f32 %v2157_v55, %v1845_v51  ;;  %v7265_v32 = vadd.f32 %v2161_v20, %v1849_v10 }
 0x850   :  { %v7192_v16 = vpop.f32.mrb[26].mxu1 }
 0x851   :  { %v7194_v60 = vpop.f32.mrb[27].mxu1 }
 0x854   :  { %v7196_v8 = vpop.f32.mrb[28].mxu1 }
 0x855   :  { %v7198_v53 = vpop.f32.mrb[29].mxu1 }
 0x857   :  { %v5879_v22 = vpop.eup %5878 }
 0x858   :  { %v1778_v17 = vmul.f32 %v5879_v22, %v1777_v39  ;;  %v2037_v22 = vadd.f32 %v7190_v47, %v7273_v9 }
 0x85a   :  { %v1780_v63 = vadd.f32 %v1779_v18, %v1778_v17 }
 0x85c   :  { %1783 = vst [vmem:[%s7627_s13] sm:$0xff] %v1780_v63  ;;  %1964 = vmatmul.mubr.f32.gmra.mrb[30].mxu0 %v1780_v63  ;;  %4336 = vmatmul.mubr.f32.gmra.mrb[30].mxu1 %v1780_v63 }
 0x85d   :  { %2233 = vmatprep.mubr.f32.mxu0 %v5960_v3  ;;  %4370 = vmatprep.mubr.msk.f32.mxu1 %vm5962_vm0, %v5960_v3 }
 0x860   :  { %2234 = vmatmul.mubr.f32.vlgmr.msra.gmra.mrb[16].mxu0 %v7208_v34  ;;  %4371 = vmatmul.mubr.f32.vlgmr.msra.gmra.mrb[32].mxu1 %v7208_v34 }
 0x861   :  { %5288 = vmatpush1.bf16.msra.mxu0 %v6973_v31  ;;  %5319 = vmatpush3.bf16.msra.mxu1 %v7089_v7 }
 0x862   :  { %5290 = vmatprep.subr.bf16.mxu0 %v6983_v28  ;;  %5320 = vmatprep.subr.bf16.mxu1 %v5961_v40 }
 0x863   :  { %2398 = vmatprep.mubr.f32.mxu0 %v5960_v3  ;;  %4405 = vmatprep.mubr.msk.f32.mxu1 %vm5962_vm0, %v5960_v3 }
 0x865   :  { %5292 = vmatpush1.bf16.msra.mxu0 %v6991_v25  ;;  %5322 = vmatpush3.bf16.msra.mxu1 %v7118_v21 }
 0x866   :  { %5294 = vmatprep.subr.bf16.mxu0 %v7001_v35  ;;  %5323 = vmatprep.subr.bf16.mxu1 %v5961_v40 }
 0x869   :  { %5296 = vmatpush1.bf16.msra.mxu0 %v7009_v46  ;;  %5325 = vmatpush3.bf16.msra.mxu1 %v7133_v43 }
 0x86a   :  { %5298 = vmatprep.subr.bf16.mxu0 %v7019_v56  ;;  %5326 = vmatprep.subr.bf16.mxu1 %v5961_v40 }
 0x86d   :  { %5300 = vmatpush1.bf16.msra.mxu0 %v7027_v4  ;;  %5328 = vmatpush3.bf16.msra.mxu1 %v7139_v27 }
 0x86e   :  { %5302 = vmatprep.subr.bf16.mxu0 %v7037_v15  ;;  %5329 = vmatprep.subr.bf16.mxu1 %v5961_v40 }
 0x871   :  { %5304 = vmatpush1.bf16.msra.mxu0 %v7045_v24  ;;  %5331 = vmatpush3.bf16.msra.mxu1 %v7149_v26 }
 0x872   :  { %5306 = vmatprep.subr.bf16.mxu0 %v7055_v54  ;;  %5332 = vmatprep.subr.bf16.mxu1 %v5961_v40 }
 0x875   :  { %5308 = vmatpush1.bf16.msra.mxu0 %v7063_v37  ;;  %5334 = vmatpush3.bf16.msra.mxu1 %v7159_v45 }
 0x876   :  { %5310 = vmatprep.subr.bf16.mxu0 %v7076_v50  ;;  %5335 = vmatprep.subr.bf16.mxu1 %v5961_v40 }
 0x879   :  { %5312 = vmatpush1.bf16.msra.mxu0 %v7087_v6  ;;  %5337 = vmatpush3.bf16.msra.mxu1 %v7169_v61 }
 0x87a   :  { %5314 = vmatprep.subr.bf16.mxu0 %v7100_v14  ;;  %5338 = vmatprep.subr.bf16.mxu1 %v5961_v40 }
 0x87d   :  { %5316 = vmatpush1.bf16.msra.mxu0 %v7109_v42  ;;  %5340 = vmatpush3.bf16.msra.mxu1 %v7179_v13 }
 0x87e   :  { %5342 = vmatprep.subr.bf16.mxu0 %v6965_v0  ;;  %5373 = vmatprep.subr.bf16.mxu1 %v5961_v40 }
 0x92f   :  { %v7257_v1 = vpop.f32.mrb[30].mxu1 }
 0x930   :  { %v7261_v23 = vpop.f32.mrb[31].mxu1 }
 0x933   :  { %v2235_v33 = vpop.f32.mrb[16].mxu0  ;;  %v2306_v36 = vpop.f32.mrb[32].mxu1 }
 0x934   :  { %v5734_v58 = vadd.f32 %v7263_v30, %v2235_v33  ;;  %v2237_v5 = vpop.f32.mrb[17].mxu0  ;;  %v4372_v48 = vpop.f32.mrb[33].mxu1  ;;  %v2307_v19 = vadd.f32 %v2306_v36, %v7270_v44 }
 0x935   :  { %v5736_v59 = vadd.f32 %v7265_v32, %v2237_v5 }
 0x936   :  { %v3615_v49 = vmul.f32 -1.442695, %v5734_v58 }
 0x937   :  { %v3616_v57 = vmul.f32 -1.442695, %v5736_v59 }
 0x938   :  { %5880 = vpow2.f32 %v3615_v49 }
 0x939   :  { %5882 = vpow2.f32 %v3616_v57 }
 0x942   :  { %v5881_v62 = vpop.eup %5880 }
 0x943   :  { %v2314_v2 = vadd.f32 1.0, %v5881_v62  ;;  %v5883_v11 = vpop.eup %5882 }
 0x944   :  { %v2321_v12 = vadd.f32 1.0, %v5883_v11  ;;  %v2042_v11 = vadd.f32 %v7188_v29, %v7273_v9 }
 0x945   :  { %5884 = vrcp.f32 %v2314_v2 }
 0x946   :  { %5886 = vrcp.f32 %v2321_v12 }
 0x94f   :  { %v5885_v39 = vpop.eup %5884 }
 0x950   :  { %v2324_v17 = vmul.f32 %v5885_v39, %v2307_v19  ;;  %v5887_v63 = vpop.eup %5886 }
 0x951   :  { %v2327_v51 = vsub.f32 1.0, %v5887_v63  ;;  %v2329_v10 = vmul.f32 %v5887_v63, %v7208_v34 }
 0x952   :  { %v2325_v18 = vadd.f32 %v2324_v17, %v2037_v22 }
 0x954   :  { %5888 = vtanh.f32 %v2325_v18 }
 0x95e   :  { %v5889_v55 = vpop.eup %5888 }
 0x95f   :  { %v2328_v52 = vmul.f32 %v5889_v55, %v2327_v51 }
 0x961   :  { %v7279_v20 = vadd.f32 %v2329_v10, %v2328_v52 }
 0x963   :  { %2399 = vmatmul.mubr.f32.vlgmr.msra.gmra.mrb[18].mxu0 %v7279_v20  ;;  %4406 = vmatmul.mubr.f32.vlgmr.msra.gmra.mrb[34].mxu1 %v7279_v20 }
 0x964   :  { %5344 = vmatpush1.bf16.msra.mxu0 %v6973_v31  ;;  %5375 = vmatpush3.bf16.msra.mxu1 %v7089_v7 }
 0x965   :  { %5346 = vmatprep.subr.bf16.mxu0 %v6983_v28  ;;  %5376 = vmatprep.subr.bf16.mxu1 %v5961_v40 }
 0x966   :  { %2563 = vmatprep.mubr.f32.mxu0 %v5960_v3  ;;  %4440 = vmatprep.mubr.msk.f32.mxu1 %vm5962_vm0, %v5960_v3 }
 0x968   :  { %5348 = vmatpush1.bf16.msra.mxu0 %v6991_v25  ;;  %5378 = vmatpush3.bf16.msra.mxu1 %v7118_v21 }
 0x969   :  { %5350 = vmatprep.subr.bf16.mxu0 %v7001_v35  ;;  %5379 = vmatprep.subr.bf16.mxu1 %v5961_v40 }
 0x96c   :  { %5352 = vmatpush1.bf16.msra.mxu0 %v7009_v46  ;;  %5381 = vmatpush3.bf16.msra.mxu1 %v7133_v43 }
 0x96d   :  { %5354 = vmatprep.subr.bf16.mxu0 %v7019_v56  ;;  %5382 = vmatprep.subr.bf16.mxu1 %v5961_v40 }
 0x970   :  { %5356 = vmatpush1.bf16.msra.mxu0 %v7027_v4  ;;  %5384 = vmatpush3.bf16.msra.mxu1 %v7139_v27 }
 0x971   :  { %5358 = vmatprep.subr.bf16.mxu0 %v7037_v15  ;;  %5385 = vmatprep.subr.bf16.mxu1 %v5961_v40 }
 0x974   :  { %5360 = vmatpush1.bf16.msra.mxu0 %v7045_v24  ;;  %5387 = vmatpush3.bf16.msra.mxu1 %v7149_v26 }
 0x975   :  { %5362 = vmatprep.subr.bf16.mxu0 %v7055_v54  ;;  %5388 = vmatprep.subr.bf16.mxu1 %v5961_v40 }
 0x978   :  { %5364 = vmatpush1.bf16.msra.mxu0 %v7063_v37  ;;  %5390 = vmatpush3.bf16.msra.mxu1 %v7159_v45 }
 0x979   :  { %5366 = vmatprep.subr.bf16.mxu0 %v7076_v50  ;;  %5391 = vmatprep.subr.bf16.mxu1 %v5961_v40 }
 0x97c   :  { %5368 = vmatpush1.bf16.msra.mxu0 %v7087_v6  ;;  %5393 = vmatpush3.bf16.msra.mxu1 %v7169_v61 }
 0x97d   :  { %5370 = vmatprep.subr.bf16.mxu0 %v7100_v14  ;;  %5394 = vmatprep.subr.bf16.mxu1 %v5961_v40 }
 0x980   :  { %5372 = vmatpush1.bf16.msra.mxu0 %v7109_v42  ;;  %5396 = vmatpush3.bf16.msra.mxu1 %v7179_v13 }
 0x981   :  { %5398 = vmatprep.subr.bf16.mxu0 %v6965_v0  ;;  %5429 = vmatprep.subr.bf16.mxu1 %v5961_v40 }
 0xa36   :  { %v2400_v38 = vpop.f32.mrb[18].mxu0  ;;  %v2471_v47 = vpop.f32.mrb[34].mxu1 }
 0xa37   :  { %v5738_v34 = vadd.f32 %v7263_v30, %v2400_v38  ;;  %v2402_v41 = vpop.f32.mrb[19].mxu0  ;;  %v4407_v33 = vpop.f32.mrb[35].mxu1  ;;  %v2472_v62 = vadd.f32 %v2471_v47, %v7270_v44 }
 0xa38   :  { %v5740_v58 = vadd.f32 %v7265_v32, %v2402_v41 }
 0xa39   :  { %v3617_v36 = vmul.f32 -1.442695, %v5738_v34 }
 0xa3a   :  { %v3618_v5 = vmul.f32 -1.442695, %v5740_v58 }
 0xa3b   :  { %5890 = vpow2.f32 %v3617_v36 }
 0xa3c   :  { %5892 = vpow2.f32 %v3618_v5 }
 0xa45   :  { %v5891_v48 = vpop.eup %5890 }
 0xa46   :  { %v2479_v49 = vadd.f32 1.0, %v5891_v48  ;;  %v5893_v59 = vpop.eup %5892 }
 0xa47   :  { %v2486_v57 = vadd.f32 1.0, %v5893_v59 }
 0xa48   :  { %5894 = vrcp.f32 %v2479_v49  ;;  %v2047_v49 = vadd.f32 %v7194_v60, %v7273_v9 }
 0xa49   :  { %5896 = vrcp.f32 %v2486_v57 }
 0xa52   :  { %v5895_v2 = vpop.eup %5894 }
 0xa53   :  { %v2489_v12 = vmul.f32 %v5895_v2, %v2472_v62  ;;  %v5897_v39 = vpop.eup %5896 }
 0xa54   :  { %v2492_v22 = vsub.f32 1.0, %v5897_v39  ;;  %v2494_v63 = vmul.f32 %v5897_v39, %v7279_v20 }
 0xa55   :  { %v2490_v19 = vadd.f32 %v2489_v12, %v2042_v11 }
 0xa57   :  { %5898 = vtanh.f32 %v2490_v19 }
 0xa61   :  { %v5899_v17 = vpop.eup %5898 }
 0xa62   :  { %v2493_v18 = vmul.f32 %v5899_v17, %v2492_v22 }
 0xa64   :  { %v7324_v51 = vadd.f32 %v2494_v63, %v2493_v18 }
 0xa66   :  { %2564 = vmatmul.mubr.f32.vlgmr.msra.gmra.mrb[20].mxu0 %v7324_v51  ;;  %4441 = vmatmul.mubr.f32.vlgmr.msra.gmra.mrb[36].mxu1 %v7324_v51 }
 0xa67   :  { %5400 = vmatpush1.bf16.msra.mxu0 %v6973_v31  ;;  %5431 = vmatpush3.bf16.msra.mxu1 %v7089_v7 }
 0xa68   :  { %5402 = vmatprep.subr.bf16.mxu0 %v6983_v28  ;;  %5432 = vmatprep.subr.bf16.mxu1 %v5961_v40 }
 0xa69   :  { %2728 = vmatprep.mubr.f32.mxu0 %v5960_v3  ;;  %4475 = vmatprep.mubr.msk.f32.mxu1 %vm5962_vm0, %v5960_v3 }
 0xa6b   :  { %5404 = vmatpush1.bf16.msra.mxu0 %v6991_v25  ;;  %5434 = vmatpush3.bf16.msra.mxu1 %v7118_v21 }
 0xa6c   :  { %5406 = vmatprep.subr.bf16.mxu0 %v7001_v35  ;;  %5435 = vmatprep.subr.bf16.mxu1 %v5961_v40 }
 0xa6f   :  { %5408 = vmatpush1.bf16.msra.mxu0 %v7009_v46  ;;  %5437 = vmatpush3.bf16.msra.mxu1 %v7133_v43 }
 0xa70   :  { %5410 = vmatprep.subr.bf16.mxu0 %v7019_v56  ;;  %5438 = vmatprep.subr.bf16.mxu1 %v5961_v40 }
 0xa73   :  { %5412 = vmatpush1.bf16.msra.mxu0 %v7027_v4  ;;  %5440 = vmatpush3.bf16.msra.mxu1 %v7139_v27 }
 0xa74   :  { %5414 = vmatprep.subr.bf16.mxu0 %v7037_v15  ;;  %5441 = vmatprep.subr.bf16.mxu1 %v5961_v40 }
 0xa77   :  { %5416 = vmatpush1.bf16.msra.mxu0 %v7045_v24  ;;  %5443 = vmatpush3.bf16.msra.mxu1 %v7149_v26 }
 0xa78   :  { %5418 = vmatprep.subr.bf16.mxu0 %v7055_v54  ;;  %5444 = vmatprep.subr.bf16.mxu1 %v5961_v40 }
 0xa7b   :  { %5420 = vmatpush1.bf16.msra.mxu0 %v7063_v37  ;;  %5446 = vmatpush3.bf16.msra.mxu1 %v7159_v45 }
 0xa7c   :  { %5422 = vmatprep.subr.bf16.mxu0 %v7076_v50  ;;  %5447 = vmatprep.subr.bf16.mxu1 %v5961_v40 }
 0xa7f   :  { %5424 = vmatpush1.bf16.msra.mxu0 %v7087_v6  ;;  %5449 = vmatpush3.bf16.msra.mxu1 %v7169_v61 }
 0xa80   :  { %5426 = vmatprep.subr.bf16.mxu0 %v7100_v14  ;;  %5450 = vmatprep.subr.bf16.mxu1 %v5961_v40 }
 0xa83   :  { %5428 = vmatpush1.bf16.msra.mxu0 %v7109_v42  ;;  %5452 = vmatpush3.bf16.msra.mxu1 %v7179_v13 }
 0xa84   :  { %5454 = vmatprep.subr.bf16.mxu0 %v6965_v0  ;;  %5485 = vmatprep.subr.bf16.mxu1 %v5961_v40 }
 0xb39   :  { %v2565_v29 = vpop.f32.mrb[20].mxu0  ;;  %v2636_v55 = vpop.f32.mrb[36].mxu1 }
 0xb3a   :  { %v5742_v52 = vadd.f32 %v7263_v30, %v2565_v29  ;;  %v2567_v10 = vpop.f32.mrb[21].mxu0  ;;  %v4442_v20 = vpop.f32.mrb[37].mxu1  ;;  %v2637_v5 = vadd.f32 %v2636_v55, %v7270_v44 }
 0xb3b   :  { %v5744_v47 = vadd.f32 %v7265_v32, %v2567_v10 }
 0xb3c   :  { %v3619_v38 = vmul.f32 -1.442695, %v5742_v52 }
 0xb3d   :  { %v3620_v34 = vmul.f32 -1.442695, %v5744_v47 }
 0xb3e   :  { %5900 = vpow2.f32 %v3619_v38 }
 0xb3f   :  { %5902 = vpow2.f32 %v3620_v34 }
 0xb48   :  { %v5901_v41 = vpop.eup %5900 }
 0xb49   :  { %v2644_v33 = vadd.f32 1.0, %v5901_v41  ;;  %v5903_v36 = vpop.eup %5902  ;;  %v2052_v41 = vadd.f32 %v7192_v16, %v7273_v9 }
 0xb4a   :  { %v2651_v58 = vadd.f32 1.0, %v5903_v36 }
 0xb4b   :  { %5904 = vrcp.f32 %v2644_v33 }
 0xb4c   :  { %5906 = vrcp.f32 %v2651_v58 }
 0xb55   :  { %v5905_v48 = vpop.eup %5904 }
 0xb56   :  { %v2654_v59 = vmul.f32 %v5905_v48, %v2637_v5  ;;  %v5907_v62 = vpop.eup %5906 }
 0xb57   :  { %v2657_v2 = vsub.f32 1.0, %v5907_v62  ;;  %v2659_v19 = vmul.f32 %v5907_v62, %v7324_v51 }
 0xb58   :  { %v2655_v57 = vadd.f32 %v2654_v59, %v2047_v49 }
 0xb5a   :  { %5908 = vtanh.f32 %v2655_v57 }
 0xb64   :  { %v5909_v11 = vpop.eup %5908 }
 0xb65   :  { %v2658_v12 = vmul.f32 %v5909_v11, %v2657_v2 }
 0xb67   :  { %v7369_v39 = vadd.f32 %v2659_v19, %v2658_v12 }
 0xb69   :  { %2729 = vmatmul.mubr.f32.vlgmr.msra.gmra.mrb[22].mxu0 %v7369_v39  ;;  %4476 = vmatmul.mubr.f32.vlgmr.msra.gmra.mrb[38].mxu1 %v7369_v39 }
 0xb6a   :  { %5456 = vmatpush1.bf16.msra.mxu0 %v6973_v31  ;;  %5487 = vmatpush3.bf16.msra.mxu1 %v7089_v7 }
 0xb6b   :  { %5458 = vmatprep.subr.bf16.mxu0 %v6983_v28  ;;  %5488 = vmatprep.subr.bf16.mxu1 %v5961_v40 }
 0xb6c   :  { %2893 = vmatprep.mubr.f32.mxu0 %v5960_v3  ;;  %4510 = vmatprep.mubr.msk.f32.mxu1 %vm5962_vm0, %v5960_v3 }
 0xb6e   :  { %5460 = vmatpush1.bf16.msra.mxu0 %v6991_v25  ;;  %5490 = vmatpush3.bf16.msra.mxu1 %v7118_v21 }
 0xb6f   :  { %5462 = vmatprep.subr.bf16.mxu0 %v7001_v35  ;;  %5491 = vmatprep.subr.bf16.mxu1 %v5961_v40 }
 0xb72   :  { %5464 = vmatpush1.bf16.msra.mxu0 %v7009_v46  ;;  %5493 = vmatpush3.bf16.msra.mxu1 %v7133_v43 }
 0xb73   :  { %5466 = vmatprep.subr.bf16.mxu0 %v7019_v56  ;;  %5494 = vmatprep.subr.bf16.mxu1 %v5961_v40 }
 0xb76   :  { %5468 = vmatpush1.bf16.msra.mxu0 %v7027_v4  ;;  %5496 = vmatpush3.bf16.msra.mxu1 %v7139_v27 }
 0xb77   :  { %5470 = vmatprep.subr.bf16.mxu0 %v7037_v15  ;;  %5497 = vmatprep.subr.bf16.mxu1 %v5961_v40 }
 0xb7a   :  { %5472 = vmatpush1.bf16.msra.mxu0 %v7045_v24  ;;  %5499 = vmatpush3.bf16.msra.mxu1 %v7149_v26 }
 0xb7b   :  { %5474 = vmatprep.subr.bf16.mxu0 %v7055_v54  ;;  %5500 = vmatprep.subr.bf16.mxu1 %v5961_v40 }
 0xb7e   :  { %5476 = vmatpush1.bf16.msra.mxu0 %v7063_v37  ;;  %5502 = vmatpush3.bf16.msra.mxu1 %v7159_v45 }
 0xb7f   :  { %5478 = vmatprep.subr.bf16.mxu0 %v7076_v50  ;;  %5503 = vmatprep.subr.bf16.mxu1 %v5961_v40 }
 0xb82   :  { %5480 = vmatpush1.bf16.msra.mxu0 %v7087_v6  ;;  %5505 = vmatpush3.bf16.msra.mxu1 %v7169_v61 }
 0xb83   :  { %5482 = vmatprep.subr.bf16.mxu0 %v7100_v14  ;;  %5506 = vmatprep.subr.bf16.mxu1 %v5961_v40 }
 0xb86   :  { %5484 = vmatpush1.bf16.msra.mxu0 %v7109_v42  ;;  %5508 = vmatpush3.bf16.msra.mxu1 %v7179_v13 }
 0xb87   :  { %5510 = vmatprep.subr.bf16.mxu0 %v6965_v0  ;;  %5541 = vmatprep.subr.bf16.mxu1 %v5961_v40 }
 0xc3c   :  { %v2730_v60 = vpop.f32.mrb[22].mxu0  ;;  %v2801_v22 = vpop.f32.mrb[38].mxu1 }
 0xc3d   :  { %v5746_v17 = vadd.f32 %v7263_v30, %v2730_v60  ;;  %v2732_v18 = vpop.f32.mrb[23].mxu0  ;;  %v4477_v63 = vpop.f32.mrb[39].mxu1  ;;  %v2802_v47 = vadd.f32 %v2801_v22, %v7270_v44 }
 0xc3e   :  { %v5748_v29 = vadd.f32 %v7265_v32, %v2732_v18 }
 0xc3f   :  { %v3621_v51 = vmul.f32 -1.442695, %v5746_v17 }
 0xc40   :  { %v3622_v55 = vmul.f32 -1.442695, %v5748_v29 }
 0xc41   :  { %5910 = vpow2.f32 %v3621_v51 }
 0xc42   :  { %5912 = vpow2.f32 %v3622_v55  ;;  %v2057_v55 = vadd.f32 %v7198_v53, %v7273_v9 }
 0xc4b   :  { %v5911_v52 = vpop.eup %5910 }
 0xc4c   :  { %v2809_v10 = vadd.f32 1.0, %v5911_v52  ;;  %v5913_v20 = vpop.eup %5912 }
 0xc4d   :  { %v2816_v38 = vadd.f32 1.0, %v5913_v20 }
 0xc4e   :  { %5914 = vrcp.f32 %v2809_v10 }
 0xc4f   :  { %5916 = vrcp.f32 %v2816_v38 }
 0xc58   :  { %v5915_v34 = vpop.eup %5914 }
 0xc59   :  { %v2819_v33 = vmul.f32 %v5915_v34, %v2802_v47  ;;  %v5917_v58 = vpop.eup %5916 }
 0xc5a   :  { %v2822_v5 = vsub.f32 1.0, %v5917_v58  ;;  %v2824_v59 = vmul.f32 %v5917_v58, %v7369_v39 }
 0xc5b   :  { %v2820_v36 = vadd.f32 %v2819_v33, %v2052_v41 }
 0xc5d   :  { %5918 = vtanh.f32 %v2820_v36 }
 0xc67   :  { %v5919_v48 = vpop.eup %5918 }
 0xc68   :  { %v2823_v49 = vmul.f32 %v5919_v48, %v2822_v5 }
 0xc6a   :  { %v7414_v57 = vadd.f32 %v2824_v59, %v2823_v49 }
 0xc6c   :  { %2894 = vmatmul.mubr.f32.vlgmr.msra.gmra.mrb[24].mxu0 %v7414_v57  ;;  %4511 = vmatmul.mubr.f32.vlgmr.msra.gmra.mrb[40].mxu1 %v7414_v57 }
 0xc6d   :  { %5512 = vmatpush1.bf16.msra.mxu0 %v6973_v31  ;;  %5543 = vmatpush3.bf16.msra.mxu1 %v7089_v7 }
 0xc6e   :  { %5514 = vmatprep.subr.bf16.mxu0 %v6983_v28  ;;  %5544 = vmatprep.subr.bf16.mxu1 %v5961_v40 }
 0xc6f   :  { %3058 = vmatprep.mubr.f32.mxu0 %v5960_v3  ;;  %4545 = vmatprep.mubr.msk.f32.mxu1 %vm5962_vm0, %v5960_v3 }
 0xc71   :  { %5516 = vmatpush1.bf16.msra.mxu0 %v6991_v25  ;;  %5546 = vmatpush3.bf16.msra.mxu1 %v7118_v21 }
 0xc72   :  { %5518 = vmatprep.subr.bf16.mxu0 %v7001_v35  ;;  %5547 = vmatprep.subr.bf16.mxu1 %v5961_v40 }
 0xc75   :  { %5520 = vmatpush1.bf16.msra.mxu0 %v7009_v46  ;;  %5549 = vmatpush3.bf16.msra.mxu1 %v7133_v43 }
 0xc76   :  { %5522 = vmatprep.subr.bf16.mxu0 %v7019_v56  ;;  %5550 = vmatprep.subr.bf16.mxu1 %v5961_v40 }
 0xc79   :  { %5524 = vmatpush1.bf16.msra.mxu0 %v7027_v4  ;;  %5552 = vmatpush3.bf16.msra.mxu1 %v7139_v27 }
 0xc7a   :  { %5526 = vmatprep.subr.bf16.mxu0 %v7037_v15  ;;  %5553 = vmatprep.subr.bf16.mxu1 %v5961_v40 }
 0xc7d   :  { %5528 = vmatpush1.bf16.msra.mxu0 %v7045_v24  ;;  %5555 = vmatpush3.bf16.msra.mxu1 %v7149_v26 }
 0xc7e   :  { %5530 = vmatprep.subr.bf16.mxu0 %v7055_v54  ;;  %5556 = vmatprep.subr.bf16.mxu1 %v5961_v40 }
 0xc81   :  { %5532 = vmatpush1.bf16.msra.mxu0 %v7063_v37  ;;  %5558 = vmatpush3.bf16.msra.mxu1 %v7159_v45 }
 0xc82   :  { %5534 = vmatprep.subr.bf16.mxu0 %v7076_v50  ;;  %5559 = vmatprep.subr.bf16.mxu1 %v5961_v40 }
 0xc85   :  { %5536 = vmatpush1.bf16.msra.mxu0 %v7087_v6  ;;  %5561 = vmatpush3.bf16.msra.mxu1 %v7169_v61 }
 0xc86   :  { %5538 = vmatprep.subr.bf16.mxu0 %v7100_v14  ;;  %5562 = vmatprep.subr.bf16.mxu1 %v5961_v40 }
 0xc89   :  { %5540 = vmatpush1.bf16.msra.mxu0 %v7109_v42  ;;  %5564 = vmatpush3.bf16.msra.mxu1 %v7179_v13 }
 0xc8a   :  { %5566 = vmatprep.subr.bf16.mxu0 %v6965_v0  ;;  %5597 = vmatprep.subr.bf16.mxu1 %v5961_v40 }
 0xd3f   :  { %v2895_v16 = vpop.f32.mrb[24].mxu0  ;;  %v2966_v62 = vpop.f32.mrb[40].mxu1 }
 0xd40   :  { %v5750_v2 = vadd.f32 %v7263_v30, %v2895_v16  ;;  %v2897_v11 = vpop.f32.mrb[25].mxu0  ;;  %v4512_v12 = vpop.f32.mrb[41].mxu1  ;;  %v2967_v51 = vadd.f32 %v2966_v62, %v7270_v44 }
 0xd41   :  { %v5752_v39 = vadd.f32 %v7265_v32, %v2897_v11 }
 0xd42   :  { %v3623_v19 = vmul.f32 -1.442695, %v5750_v2 }
 0xd43   :  { %v3624_v60 = vmul.f32 -1.442695, %v5752_v39 }
 0xd44   :  { %5920 = vpow2.f32 %v3623_v19  ;;  %v2062_v19 = vadd.f32 %v7196_v8, %v7273_v9  ;;  %v3489_v8 = vld [vmem:[%s7630_s10] sm:$0xff] }
 0xd45   :  { %5922 = vpow2.f32 %v3624_v60 }
 0xd4e   :  { %v5921_v22 = vpop.eup %5920 }
 0xd4f   :  { %v2974_v17 = vadd.f32 1.0, %v5921_v22  ;;  %v5923_v18 = vpop.eup %5922 }
 0xd50   :  { %v2981_v63 = vadd.f32 1.0, %v5923_v18 }
 0xd51   :  { %5924 = vrcp.f32 %v2974_v17 }
 0xd52   :  { %5926 = vrcp.f32 %v2981_v63 }
 0xd5b   :  { %v5925_v29 = vpop.eup %5924 }
 0xd5c   :  { %v2984_v52 = vmul.f32 %v5925_v29, %v2967_v51  ;;  %v5927_v20 = vpop.eup %5926 }
 0xd5d   :  { %v2987_v38 = vsub.f32 1.0, %v5927_v20  ;;  %v2989_v41 = vmul.f32 %v5927_v20, %v7414_v57  ;;  %v3493_v20 = vld [vmem:[%s7630_s10 + $0x20] sm:$0xff] }
 0xd5e   :  { %v2985_v10 = vadd.f32 %v2984_v52, %v2057_v55  ;;  %v3491_v52 = vld [vmem:[%s7630_s10 + $0x10] sm:$0xff] }
 0xd60   :  { %5928 = vtanh.f32 %v2985_v10 }
 0xd6a   :  { %v5929_v47 = vpop.eup %5928 }
 0xd6b   :  { %v2988_v34 = vmul.f32 %v5929_v47, %v2987_v38  ;;  %v3494_v38 = vld [vmem:[%s7630_s10 + $0x28] sm:$0xff] }
 0xd6c   :  { %v5684_v47 = vpack.c.bf16 %v3494_v38, %v3493_v20 }
 0xd6d   :  { %v7459_v33 = vadd.f32 %v2989_v41, %v2988_v34  ;;  %v3495_v34 = vld [vmem:[%s7630_s10 + $0x30] sm:$0xff]  ;;  %v3496_v41 = vld [vmem:[%s7630_s10 + $0x38] sm:$0xff] }
 0xd6f   :  { %3059 = vmatmul.mubr.f32.vlgmr.msra.gmra.mrb[26].mxu0 %v7459_v33  ;;  %4546 = vmatmul.mubr.f32.vlgmr.msra.gmra.mrb[42].mxu1 %v7459_v33 }
 0xd70   :  { %5568 = vmatpush1.bf16.msra.mxu0 %v6973_v31  ;;  %5599 = vmatpush3.bf16.msra.mxu1 %v7089_v7 }
 0xd71   :  { %5570 = vmatprep.subr.bf16.mxu0 %v6983_v28  ;;  %5600 = vmatprep.subr.bf16.mxu1 %v5961_v40 }
 0xd72   :  { %3223 = vmatprep.mubr.f32.mxu0 %v5960_v3  ;;  %4580 = vmatprep.mubr.msk.f32.mxu1 %vm5962_vm0, %v5960_v3 }
 0xd74   :  { %5572 = vmatpush1.bf16.msra.mxu0 %v6991_v25  ;;  %5602 = vmatpush3.bf16.msra.mxu1 %v7118_v21 }
 0xd75   :  { %5574 = vmatprep.subr.bf16.mxu0 %v7001_v35  ;;  %5603 = vmatprep.subr.bf16.mxu1 %v5961_v40 }
 0xd78   :  { %5576 = vmatpush1.bf16.msra.mxu0 %v7009_v46  ;;  %5605 = vmatpush3.bf16.msra.mxu1 %v7133_v43 }
 0xd79   :  { %5578 = vmatprep.subr.bf16.mxu0 %v7019_v56  ;;  %5606 = vmatprep.subr.bf16.mxu1 %v5961_v40 }
 0xd7c   :  { %5580 = vmatpush1.bf16.msra.mxu0 %v7027_v4  ;;  %5608 = vmatpush3.bf16.msra.mxu1 %v7139_v27 }
 0xd7d   :  { %5582 = vmatprep.subr.bf16.mxu0 %v7037_v15  ;;  %5609 = vmatprep.subr.bf16.mxu1 %v5961_v40 }
 0xd80   :  { %5584 = vmatpush1.bf16.msra.mxu0 %v7045_v24  ;;  %5611 = vmatpush3.bf16.msra.mxu1 %v7149_v26 }
 0xd81   :  { %5586 = vmatprep.subr.bf16.mxu0 %v7055_v54  ;;  %5612 = vmatprep.subr.bf16.mxu1 %v5961_v40 }
 0xd84   :  { %5588 = vmatpush1.bf16.msra.mxu0 %v7063_v37  ;;  %5614 = vmatpush3.bf16.msra.mxu1 %v7159_v45 }
 0xd85   :  { %5590 = vmatprep.subr.bf16.mxu0 %v7076_v50  ;;  %5615 = vmatprep.subr.bf16.mxu1 %v5961_v40 }
 0xd88   :  { %5592 = vmatpush1.bf16.msra.mxu0 %v7087_v6  ;;  %5617 = vmatpush3.bf16.msra.mxu1 %v7169_v61 }
 0xd89   :  { %5594 = vmatprep.subr.bf16.mxu0 %v7100_v14  ;;  %5618 = vmatprep.subr.bf16.mxu1 %v5961_v40 }
 0xd8c   :  { %5596 = vmatpush1.bf16.msra.mxu0 %v7109_v42  ;;  %5620 = vmatpush3.bf16.msra.mxu1 %v7179_v13 }
 0xd8d   :  { %5622 = vmatprep.subr.bf16.mxu0 %v6965_v0  ;;  %5653 = vmatprep.subr.bf16.mxu1 %v5961_v40 }
 0xe42   :  { %v3060_v53 = vpop.f32.mrb[26].mxu0  ;;  %v3131_v36 = vpop.f32.mrb[42].mxu1 }
 0xe43   :  { %v5754_v58 = vadd.f32 %v7263_v30, %v3060_v53  ;;  %v3062_v5 = vpop.f32.mrb[27].mxu0  ;;  %v4547_v48 = vpop.f32.mrb[43].mxu1  ;;  %v3132_v0 = vadd.f32 %v3131_v36, %v7270_v44  ;;  %v3497_v53 = vld [vmem:[%s7630_s10 + $0x40] sm:$0xff]  ;;  %v3498_v36 = vld [vmem:[%s7630_s10 + $0x48] sm:$0xff] }
 0xe44   :  { %v5756_v59 = vadd.f32 %v7265_v32, %v3062_v5  ;;  %v5690_v5 = vpack.c.bf16 %v3498_v36, %v3497_v53  ;;  %v3500_v48 = vld [vmem:[%s7630_s10 + $0x58] sm:$0xff] }
 0xe45   :  { %v3625_v49 = vmul.f32 -1.442695, %v5754_v58  ;;  %v3499_v58 = vld [vmem:[%s7630_s10 + $0x50] sm:$0xff] }
 0xe46   :  { %v3626_v57 = vmul.f32 -1.442695, %v5756_v59  ;;  %v3501_v59 = vld [vmem:[%s7630_s10 + $0x60] sm:$0xff] }
 0xe47   :  { %5930 = vpow2.f32 %v3625_v49  ;;  %v5693_v49 = vpack.c.bf16 %v3500_v48, %v3499_v58 }
 0xe48   :  { %5932 = vpow2.f32 %v3626_v57  ;;  %v3502_v57 = vld [vmem:[%s7630_s10 + $0x68] sm:$0xff] }
 0xe51   :  { %v5931_v16 = vpop.eup %5930 }
 0xe52   :  { %v3139_v62 = vadd.f32 1.0, %v5931_v16  ;;  %v5933_v2 = vpop.eup %5932  ;;  %v5696_v16 = vpack.c.bf16 %v3502_v57, %v3501_v59 }
 0xe53   :  { %v3146_v11 = vadd.f32 1.0, %v5933_v2  ;;  %v3504_v2 = vld [vmem:[%s7630_s10 + $0x78] sm:$0xff] }
 0xe54   :  { %5934 = vrcp.f32 %v3139_v62  ;;  %v3503_v62 = vld [vmem:[%s7630_s10 + $0x70] sm:$0xff] }
 0xe55   :  { %5936 = vrcp.f32 %v3146_v11  ;;  %v5699_v11 = vpack.c.bf16 %v3504_v2, %v3503_v62 }
 0xe5e   :  { %v5935_v12 = vpop.eup %5934 }
 0xe5f   :  { %v3149_v39 = vmul.f32 %v5935_v12, %v3132_v0  ;;  %v5937_v22 = vpop.eup %5936 }
 0xe60   :  { %v3152_v17 = vsub.f32 1.0, %v5937_v22  ;;  %v3154_v51 = vmul.f32 %v5937_v22, %v7459_v33  ;;  %v5687_v33 = vpack.c.bf16 %v3496_v41, %v3495_v34 }
 0xe61   :  { %v3150_v60 = vadd.f32 %v3149_v39, %v2062_v19 }
 0xe63   :  { %5938 = vtanh.f32 %v3150_v60 }
 0xe6d   :  { %v5939_v18 = vpop.eup %5938 }
 0xe6e   :  { %v3153_v63 = vmul.f32 %v5939_v18, %v3152_v17 }
 0xe70   :  { %v3155_v29 = vadd.f32 %v3154_v51, %v3153_v63 }
 0xe72   :  { %3224 = vmatmul.mubr.f32.vlgmr.msra.gmra.mrb[28].mxu0 %v3155_v29  ;;  %4581 = vmatmul.mubr.f32.vlgmr.msra.gmra.mrb[44].mxu1 %v3155_v29 }
 0xe73   :  { %5624 = vmatpush1.bf16.msra.mxu0 %v6973_v31  ;;  %5655 = vmatpush3.bf16.msra.mxu1 %v7089_v7 }
 0xe74   :  { %5626 = vmatprep.subr.bf16.mxu0 %v6983_v28  ;;  %5656 = vmatprep.subr.bf16.mxu1 %v5961_v40 }
 0xe75   :  { %3388 = vmatprep.mubr.f32.mxu0 %v5960_v3  ;;  %4615 = vmatprep.mubr.msk.f32.mxu1 %vm5962_vm0, %v5960_v3 }
 0xe77   :  { %5628 = vmatpush1.bf16.msra.mxu0 %v6991_v25  ;;  %5658 = vmatpush3.bf16.msra.mxu1 %v7118_v21 }
 0xe78   :  { %5630 = vmatprep.subr.bf16.mxu0 %v7001_v35  ;;  %5659 = vmatprep.subr.bf16.mxu1 %v5961_v40 }
 0xe7b   :  { %5632 = vmatpush1.bf16.msra.mxu0 %v7009_v46  ;;  %5661 = vmatpush3.bf16.msra.mxu1 %v7133_v43 }
 0xe7c   :  { %5634 = vmatprep.subr.bf16.mxu0 %v7019_v56  ;;  %5662 = vmatprep.subr.bf16.mxu1 %v5961_v40 }
 0xe7f   :  { %5636 = vmatpush1.bf16.msra.mxu0 %v7027_v4  ;;  %5664 = vmatpush3.bf16.msra.mxu1 %v7139_v27 }
 0xe80   :  { %5638 = vmatprep.subr.bf16.mxu0 %v7037_v15  ;;  %5665 = vmatprep.subr.bf16.mxu1 %v5961_v40 }
 0xe83   :  { %5640 = vmatpush1.bf16.msra.mxu0 %v7045_v24  ;;  %5667 = vmatpush3.bf16.msra.mxu1 %v7149_v26 }
 0xe84   :  { %5642 = vmatprep.subr.bf16.mxu0 %v7055_v54  ;;  %5668 = vmatprep.subr.bf16.mxu1 %v5961_v40 }
 0xe87   :  { %5644 = vmatpush1.bf16.msra.mxu0 %v7063_v37  ;;  %5670 = vmatpush3.bf16.msra.mxu1 %v7159_v45 }
 0xe88   :  { %5646 = vmatprep.subr.bf16.mxu0 %v7076_v50  ;;  %5671 = vmatprep.subr.bf16.mxu1 %v5961_v40 }
 0xe8b   :  { %5648 = vmatpush1.bf16.msra.mxu0 %v7087_v6  ;;  %5673 = vmatpush3.bf16.msra.mxu1 %v7169_v61 }
 0xe8c   :  { %5650 = vmatprep.subr.bf16.mxu0 %v7100_v14  ;;  %5674 = vmatprep.subr.bf16.mxu1 %v5961_v40  ;;  %v2067_v14 = vadd.f32 %v7261_v23, %v7273_v9  ;;  %v3490_v23 = vld [vmem:[%s7630_s10 + $0x8] sm:$0xff] }
 0xe8d   :  { %v5678_v55 = vpack.c.bf16 %v3490_v23, %v3489_v8 }
 0xe8f   :  { %5652 = vmatpush1.bf16.msra.mxu0 %v7109_v42  ;;  %5676 = vmatpush3.bf16.msra.mxu1 %v7179_v13 }
 0xe90   :  { %5677 = vmatprep.subr.bf16.mxu0 %v5961_v40 }
 0xf45   :  { %v3225_v31 = vpop.f32.mrb[28].mxu0  ;;  %v3296_v28 = vpop.f32.mrb[44].mxu1 }
 0xf46   :  { %v5758_v25 = vadd.f32 %v7263_v30, %v3225_v31  ;;  %v3227_v35 = vpop.f32.mrb[29].mxu0  ;;  %v4582_v46 = vpop.f32.mrb[45].mxu1  ;;  %v3297_v6 = vadd.f32 %v3296_v28, %v7270_v44 }
 0xf47   :  { %v5760_v4 = vadd.f32 %v7265_v32, %v3227_v35 }
 0xf48   :  { %v3627_v56 = vmul.f32 -1.442695, %v5758_v25  ;;  %v2072_v25 = vadd.f32 %v7257_v1, %v7273_v9  ;;  %v3632_v1 = vld [vmem:[%s7631_s11] ss:$0 sm:$0xff] }
 0xf49   :  { %v3628_v15 = vmul.f32 -1.442695, %v5760_v4 }
 0xf4a   :  { %5940 = vpow2.f32 %v3627_v56 }
 0xf4b   :  { %5942 = vpow2.f32 %v3628_v15 }
 0xf54   :  { %v5941_v24 = vpop.eup %5940 }
 0xf55   :  { %v3304_v54 = vadd.f32 1.0, %v5941_v24  ;;  %v5943_v37 = vpop.eup %5942 }
 0xf56   :  { %v3311_v50 = vadd.f32 1.0, %v5943_v37 }
 0xf57   :  { %5944 = vrcp.f32 %v3304_v54 }
 0xf58   :  { %5946 = vrcp.f32 %v3311_v50 }
 0xf61   :  { %v5945_v7 = vpop.eup %5944 }
 0xf62   :  { %v3314_v42 = vmul.f32 %v5945_v7, %v3297_v6  ;;  %v5947_v43 = vpop.eup %5946 }
 0xf63   :  { %v3317_v27 = vsub.f32 1.0, %v5947_v43  ;;  %v3319_v61 = vmul.f32 %v5947_v43, %v3155_v29 }
 0xf64   :  { %v3315_v21 = vadd.f32 %v3314_v42, %v2067_v14 }
 0xf66   :  { %5948 = vtanh.f32 %v3315_v21 }
 0xf70   :  { %v5949_v26 = vpop.eup %5948 }
 0xf71   :  { %v3318_v45 = vmul.f32 %v5949_v26, %v3317_v27 }
 0xf73   :  { %v7543_v13 = vadd.f32 %v3319_v61, %v3318_v45 }
 0xf75   :  { %3389 = vmatmul.mubr.f32.vlgmr.msra.gmra.mrb[30].mxu0 %v7543_v13  ;;  %4616 = vmatmul.mubr.f32.vlgmr.msra.gmra.mrb[46].mxu1 %v7543_v13 }
 0xf76   :  { %4650 = vmatprep.mubr.msk.f32.mxu0 %vm5962_vm0, %v5960_v3  ;;  %5679 = vmatpush3.bf16.msra.mxu0 %v5678_v55  ;;  %v3492_v3 = vld [vmem:[%s7630_s10 + $0x18] sm:$0xff] }
 0xf77   :  { %5680 = vmatprep.subr.bf16.mxu0 %v5961_v40  ;;  %v5681_v10 = vpack.c.bf16 %v3492_v3, %v3491_v52 }
 0xf7a   :  { %5682 = vmatpush3.bf16.msra.mxu0 %v5681_v10 }
 0xf7b   :  { %5683 = vmatprep.subr.bf16.mxu0 %v5961_v40 }
 0xf7e   :  { %5685 = vmatpush3.bf16.msra.mxu0 %v5684_v47 }
 0xf7f   :  { %5686 = vmatprep.subr.bf16.mxu0 %v5961_v40 }
 0xf82   :  { %5688 = vmatpush3.bf16.msra.mxu0 %v5687_v33 }
 0xf83   :  { %5689 = vmatprep.subr.bf16.mxu0 %v5961_v40 }
 0xf86   :  { %5691 = vmatpush3.bf16.msra.mxu0 %v5690_v5 }
 0xf87   :  { %5692 = vmatprep.subr.bf16.mxu0 %v5961_v40 }
 0xf8a   :  { %5694 = vmatpush3.bf16.msra.mxu0 %v5693_v49 }
 0xf8b   :  { %5695 = vmatprep.subr.bf16.mxu0 %v5961_v40 }
 0xf8e   :  { %5697 = vmatpush3.bf16.msra.mxu0 %v5696_v16 }
 0xf8f   :  { %5698 = vmatprep.subr.bf16.mxu0 %v5961_v40 }
 0xf92   :  { %5700 = vmatpush3.bf16.msra.mxu0 %v5699_v11 }
0x1048   :  { %v3390_v0 = vpop.f32.mrb[30].mxu0  ;;  %v3461_v12 = vpop.f32.mrb[46].mxu1 }
0x1049   :  { %v5762_v19 = vadd.f32 %v7263_v30, %v3390_v0  ;;  %v3392_v39 = vpop.f32.mrb[31].mxu0  ;;  %v4617_v60 = vpop.f32.mrb[47].mxu1  ;;  %v3462_v40 = vadd.f32 %v3461_v12, %v7270_v44 }
0x104a   :  { %v5764_v17 = vadd.f32 %v7265_v32, %v3392_v39 }
0x104b   :  { %v3629_v22 = vmul.f32 -1.442695, %v5762_v19 }
0x104c   :  { %v3630_v18 = vmul.f32 -1.442695, %v5764_v17 }
0x104d   :  { %5950 = vpow2.f32 %v3629_v22 }
0x104e   :  { %5952 = vpow2.f32 %v3630_v18 }
0x1057   :  { %v5951_v63 = vpop.eup %5950 }
0x1058   :  { %v3469_v51 = vadd.f32 1.0, %v5951_v63  ;;  %v5953_v29 = vpop.eup %5952 }
0x1059   :  { %v3476_v31 = vadd.f32 1.0, %v5953_v29 }
0x105a   :  { %5954 = vrcp.f32 %v3469_v51 }
0x105b   :  { %5956 = vrcp.f32 %v3476_v31 }
0x1064   :  { %v5955_v28 = vpop.eup %5954 }
0x1065   :  { %v3479_v30 = vmul.f32 %v5955_v28, %v3462_v40  ;;  %v5957_v46 = vpop.eup %5956 }
0x1066   :  { %v3482_v32 = vsub.f32 1.0, %v5957_v46  ;;  %v3484_v15 = vmul.f32 %v5957_v46, %v7543_v13 }
0x1067   :  { %v3480_v35 = vadd.f32 %v3479_v30, %v2072_v25 }
0x1069   :  { %5958 = vtanh.f32 %v3480_v35 }
0x1073   :  { %v5959_v56 = vpop.eup %5958 }
0x1074   :  { %v3483_v4 = vmul.f32 %v5959_v56, %v3482_v32 }
0x1076   :  { %v3485_v24 = vadd.f32 %v3484_v15, %v3483_v4 }
0x1078   :  { %3631 = vst [vmem:[%s7627_s13 + $0x8] sm:$0xff] %v3485_v24  ;;  %v3488_v44 = vmax.f32 %v3485_v24, 0.0 }
0x107a   :  { %4651 = vmatmul.mubr.f32.vlgmr.msra.gmra.mrb[32].mxu0 %v3488_v44 }
0x114d   :  { %v3578_v9 = vpop.f32.mrb[32].mxu0 }
0x114e   :  { %v3579_v54 = vadd.f32 %v3632_v1, %v3578_v9  ;;  %v4652_v37 = vpop.f32.mrb[33].mxu0 }
0x1150   :  { %3582 = vst [vmem:[%s7632_s12] sm:$0xff] %v3579_v54 }

</bundles_post_ra>
